<compile_context>
chip_gen: v7x
topology: tpu7x:2x2x1
jax: 0.10.0
libtpu: 0.0.40
codegen_flags: <defaults>
</compile_context>

<pallas_src>
import functools

import jax
import jax.numpy as jnp
from jax.experimental import pallas as pl
from jax.experimental.pallas import tpu as pltpu

EPSILON = 1e-4  # self.epsilon in the torch module
LANE = 128
SUBLANE = 8


def _round_up(n, m):
    return ((n + m - 1) // m) * m


def _pick_hw_tile(hw, max_rows=2048):
    """Largest divisor of hw that is a multiple of 128 and <= max_rows.

    Falls back to the full extent (always a legal block) when hw has no
    128-multiple divisor.
    """
    cap = min(max_rows, hw)
    t = (cap // LANE) * LANE
    while t >= LANE:
        if hw % t == 0:
            return t
        t -= LANE
    return hw


def _pick_batch_tile(b, thw, max_rows=1024):
    """Largest divisor of b such that Bt*thw stays under max_rows."""
    bt = 1
    for cand in range(1, b + 1):
        if b % cand == 0 and cand * thw <= max_rows:
            bt = cand
    return bt


def _pad2(a, shape):
    out = jnp.zeros(shape, a.dtype)
    return out.at[: a.shape[0], : a.shape[1]].set(a)


# ----------------------------------------------------------------------------
# Fused kernel: backbone(1x1 conv+relu) -> proj(1x1+relu, 1x1+sigmoid)
#   -> L2 prototype distances -> running spatial min -> similarity
#   -> head (fc_classes or fc_concepts) matmul.
# Grid: (B//Bt, HW_tiles); HW is the reduction ("arbitrary") axis, batch
# tiles parallel.  min_dists / logits blocks are resident across the HW axis
# (init at hw==0, finalize at hw==last).
# ----------------------------------------------------------------------------
def _fused_kernel(x_ref, bw_ref, bb_ref, p1w_ref, p1b_ref, p2w_ref, p2b_ref,
                  protoT_ref, psq_ref, headT_ref, *out_refs,
                  bt, ps, emit_dists, use_log, bf16_matmul):
    if emit_dists:
        dists_ref, mind_ref, logits_ref = out_refs
    else:
        mind_ref, logits_ref = out_refs
        dists_ref = None

    hw_i = pl.program_id(1)
    hw_last = pl.num_programs(1) - 1

    def mm(a, w):
        if bf16_matmul:
            a = a.astype(jnp.bfloat16)
            w = w.astype(jnp.bfloat16)
        return jnp.dot(a, w, preferred_element_type=jnp.float32)

    # ---- fused pointwise MLP (backbone + proj), f32 accumulation -----------
    x = x_ref[...]                                                   # (Bt, thw, Cin)
    thw = x.shape[1]
    xr = x.reshape(bt * thw, x.shape[2])                             # (Bt*thw, Cin)
    h = jnp.maximum(mm(xr, bw_ref[...]) + bb_ref[...], 0.0)
    h = jnp.maximum(mm(h, p1w_ref[...]) + p1b_ref[...], 0.0)
    f = jax.nn.sigmoid(mm(h, p2w_ref[...]) + p2b_ref[...])           # (Bt*thw, D)

    # ---- L2^2 distances: relu(||x||^2 - 2 x.p + ||p||^2), formed in f32 ----
    x2 = jnp.sum(f * f, axis=-1, keepdims=True)                      # (Bt*thw, 1)
    xp = mm(f, protoT_ref[...])                                      # (Bt*thw, Pp)
    d = jnp.maximum(x2 - 2.0 * xp + psq_ref[...], 0.0)               # (Bt*thw, Pp)
    d3 = d.reshape(bt, thw, d.shape[-1])                             # (Bt, thw, Pp)

    if emit_dists:
        # Prototype-major, lane-dense (thw multiple of 128) store; only the
        # first Ps (>=P, multiple of 8) prototype rows are written.
        for i in range(bt):
            dists_ref[i] = jnp.transpose(d3[i, :, :ps]).astype(dists_ref.dtype)

    # ---- running spatial min (output block resident across the hw axis) ----
    tile_min = jnp.min(d3, axis=1, keepdims=True)                    # (Bt, 1, Pp)

    @pl.when(hw_i == 0)
    def _():
        mind_ref[...] = tile_min

    @pl.when(hw_i > 0)
    def _():
        mind_ref[...] = jnp.minimum(mind_ref[...], tile_min)

    # ---- finalize: distance->similarity + head matmul -----------------------
    @pl.when(hw_i == hw_last)
    def _():
        md = mind_ref[...][:, 0, :]                                   # (Bt, Pp)
        if use_log:
            act = jnp.log((md + 1.0) / (md + EPSILON))
        else:
            act = -md
        logits = jnp.dot(act, headT_ref[...],
                         preferred_element_type=jnp.float32)          # (Bt, Cp)
        logits_ref[...] = logits[:, None, :]


# ----------------------------------------------------------------------------
# Full forward (single fused pallas_call + a bit of layout glue).
# ----------------------------------------------------------------------------
def protop_forward(params, x_nchw, with_concepts=False, return_dists=True,
                   activation_fn="log", dists_dtype=jnp.float32,
                   bf16_matmul=False):
    assert activation_fn in ("log", "linear")
    B, Cin, H, W = x_nchw.shape
    HW = H * W
    x_bhwc = jnp.transpose(x_nchw, (0, 2, 3, 1)).reshape(B, HW, Cin)

    # TODO(synk): the torch module takes arbitrary backbone/proj nn.Modules;
    # here they are stand-in 1x1-conv layers (relu, relu, sigmoid).
    bw, bb = params["backbone_w"], params["backbone_b"]
    p1w, p1b = params["proj1_w"], params["proj1_b"]
    p2w, p2b = params["proj2_w"], params["proj2_b"]
    Cb = bw.shape[1]
    D = p2w.shape[1]

    protos = params["prototype_vectors"]                             # (P, D)
    P = protos.shape[0]
    Pp = _round_up(P, LANE)                                          # lane-dense matmul width
    Ps = _round_up(P, SUBLANE)                                       # sublane-dense dists rows
    protoT = _pad2(protos.T, (D, Pp))                                # (D, Pp)
    psq = _pad2(jnp.sum(protos ** 2, axis=1)[None, :], (1, Pp))      # (1, Pp)

    # Head matmul done in-kernel: fc_classes (default) or fc_concepts.
    head = params["fc_concepts_w"] if with_concepts else params["fc_classes"]
    Chead = head.shape[0]
    Cp = _round_up(Chead, LANE)
    headT = _pad2(head.T, (Pp, Cp))                                  # (Pp, Cp)

    thw = _pick_hw_tile(HW)
    Bt = _pick_batch_tile(B, thw)
    n_hw = HW // thw
    grid = (B // Bt, n_hw)

    # ---- VMEM budget / cost estimate ---------------------------------------
    dsize = jnp.dtype(dists_dtype).itemsize
    step_bytes = (
        2 * Bt * thw * Cin * 4                                        # x (dbl-buffered)
        + (2 * Bt * Ps * thw * dsize if return_dists else 0)          # dists
        + 2 * (Bt * Pp + Bt * Cp) * 4                                 # min / logits
        + 2 * 4 * (Cin * Cb + Cb + Cb * D + 2 * D + D * D
                   + D * Pp + Pp + Pp * Cp)                           # weights
        + Bt * thw * (Cb + 2 * D + 2 * Pp) * 4                        # live intermediates
    )
    vmem_limit = int(min(max(2 * step_bytes, 32 * 1024 * 1024),
                         48 * 1024 * 1024))

    flops = 2 * B * HW * (Cin * Cb + Cb * D + D * D + D * Pp) + 2 * B * Pp * Cp
    bytes_accessed = (
        B * HW * Cin * 4
        + (B * Ps * HW * dsize if return_dists else 0)
        + (B * Pp + B * Cp) * 4
        + 4 * (Cin * Cb + Cb * D + D * D + D * Pp + Pp * Cp))
    cost = pl.CostEstimate(flops=flops,
                           transcendentals=B * HW * D + B * Pp,
                           bytes_accessed=bytes_accessed)

    # ---- specs --------------------------------------------------------------
    def wspec(shape):
        return pl.BlockSpec(shape, lambda b, h: (0, 0))

    in_specs = [
        pl.BlockSpec((Bt, thw, Cin), lambda b, h: (b, h, 0)),
        wspec((Cin, Cb)), wspec((1, Cb)),
        wspec((Cb, D)), wspec((1, D)),
        wspec((D, D)), wspec((1, D)),
        wspec((D, Pp)), wspec((1, Pp)),
        wspec((Pp, Cp)),
    ]

    out_shape, out_specs = [], []
    if return_dists:
        out_shape.append(jax.ShapeDtypeStruct((B, Ps, HW), dists_dtype))
        out_specs.append(pl.BlockSpec((Bt, Ps, thw), lambda b, h: (b, 0, h)))
    out_shape.append(jax.ShapeDtypeStruct((B, 1, Pp), jnp.float32))
    out_specs.append(pl.BlockSpec((Bt, 1, Pp), lambda b, h: (b, 0, 0)))
    out_shape.append(jax.ShapeDtypeStruct((B, 1, Cp), jnp.float32))
    out_specs.append(pl.BlockSpec((Bt, 1, Cp), lambda b, h: (b, 0, 0)))

    outs = pl.pallas_call(
        functools.partial(_fused_kernel, bt=Bt, ps=Ps,
                          emit_dists=return_dists,
                          use_log=(activation_fn == "log"),
                          bf16_matmul=bf16_matmul),
        out_shape=tuple(out_shape),
        grid=grid,
        in_specs=in_specs,
        out_specs=tuple(out_specs),
        compiler_params=pltpu.CompilerParams(
            dimension_semantics=("parallel", "arbitrary"),
            vmem_limit_bytes=vmem_limit),
        cost_estimate=cost,
    )(x_bhwc, bw, bb.reshape(1, Cb), p1w, p1b.reshape(1, D),
      p2w, p2b.reshape(1, D), protoT, psq, headT)

    if return_dists:
        distsT, mind_pad, logits_pad = outs
        # Already prototype-major: (B, Ps, HW) -> (B, P, H, W) is a free,
        # contiguous reshape (no extra HBM transpose pass).
        dists = distsT[:, :P, :].reshape(B, P, H, W)
    else:
        mind_pad, logits_pad = outs
        dists = None

    min_dists = mind_pad[:, 0, :P]                                   # (B, P)
    head_logits = logits_pad[:, 0, :Chead]

    if with_concepts:
        concept_logits = head_logits                                 # fc_concepts out
        class_logits = concept_logits @ params["concept_vectors"].T
    else:
        concept_logits = None
        class_logits = head_logits                                   # fc_classes out
    return class_logits, concept_logits, min_dists, dists


# ----------------------------------------------------------------------------
# Pure-JAX reference for correctness check.
# ----------------------------------------------------------------------------
def reference_forward(params, x_nchw, with_concepts=False):
    B, Cin, H, W = x_nchw.shape
    xf = jnp.transpose(x_nchw, (0, 2, 3, 1)).reshape(-1, Cin)
    f = jnp.maximum(xf @ params["backbone_w"] + params["backbone_b"][None], 0.0)
    f = jnp.maximum(f @ params["proj1_w"] + params["proj1_b"][None], 0.0)
    f = jax.nn.sigmoid(f @ params["proj2_w"] + params["proj2_b"][None])
    D = f.shape[-1]
    f = f.reshape(B, H * W, D)
    protos = params["prototype_vectors"]                             # (P, D)
    x2 = jnp.sum(f * f, axis=-1, keepdims=True)
    xp = jnp.einsum("bnd,pd->bnp", f, protos)
    p2 = jnp.sum(protos ** 2, axis=1)[None, None, :]
    d = jnp.maximum(x2 - 2.0 * xp + p2, 0.0)                         # (B, HW, P)
    min_d = jnp.min(d, axis=1)                                       # (B, P)
    act = jnp.log((min_d + 1.0) / (min_d + EPSILON))
    if with_concepts:
        concept_logits = act @ params["fc_concepts_w"].T
        logits = concept_logits @ params["concept_vectors"].T
    else:
        concept_logits = None
        logits = act @ params["fc_classes"].T
    dists = jnp.transpose(d.reshape(B, H, W, -1), (0, 3, 1, 2))
    return logits, concept_logits, min_d, dists


def make_params(key):
    Cin, Cb, D = 4, 16, 32
    num_classes, protos_per_class, num_concepts = 2, 8, 6
    P = num_classes * protos_per_class
    ks = jax.random.split(key, 8)
    params = {
        "backbone_w": jax.random.normal(ks[0], (Cin, Cb), jnp.float32) * 0.2,
        "backbone_b": jnp.zeros((Cb,), jnp.float32),
        "proj1_w": jax.random.normal(ks[1], (Cb, D), jnp.float32) * 0.2,
        "proj1_b": jnp.zeros((D,), jnp.float32),
        "proj2_w": jax.random.normal(ks[2], (D, D), jnp.float32) * 0.2,
        "proj2_b": jnp.zeros((D,), jnp.float32),
        # torch.rand -> uniform [0, 1)
        "prototype_vectors": jax.random.uniform(ks[3], (P, D), jnp.float32),
        "fc_concepts_w": jax.random.normal(ks[4], (num_concepts, P), jnp.float32) * 0.1,
        "concept_vectors": (jax.random.uniform(ks[5], (num_classes, num_concepts)) > 0.5
                            ).astype(jnp.float32),
    }
    # proto_class_association[j, j // num_proto_per_class] = 1 ; fc = pos - 0.5*neg
    assoc = jnp.zeros((P, num_classes), jnp.float32)
    assoc = assoc.at[jnp.arange(P), jnp.arange(P) // protos_per_class].set(1.0)
    pos = assoc.T
    params["fc_classes"] = 1.0 * pos - 0.5 * (1.0 - pos)             # (C, P)
    return params


if __name__ == "__main__":
    key = jax.random.PRNGKey(0)
    pkey, xkey = jax.random.split(key)
    params = make_params(pkey)
    x = jax.random.normal(xkey, (2, 4, 16, 16), jnp.float32)         # NCHW

    # Default path (matches torch forward: fc_classes head, full dists).
    class_logits, concept_logits, min_dists, dists = protop_forward(params, x)
    jax.block_until_ready((class_logits, min_dists, dists))

    ref_logits, _, ref_min, ref_dists = reference_forward(params, x)

    assert class_logits.shape == (2, 2)
    assert min_dists.shape == (2, 16)
    assert dists.shape == (2, 16, 16, 16)
    assert jnp.allclose(dists, ref_dists, atol=1e-4, rtol=1e-4)
    assert jnp.allclose(min_dists, ref_min, atol=1e-4, rtol=1e-4)
    assert jnp.allclose(class_logits, ref_logits, atol=1e-3, rtol=1e-3)

    # with_concepts path, dists writeback skipped (inference-style).
    c_logits, con_logits, min_d2, d2 = protop_forward(
        params, x, with_concepts=True, return_dists=False)
    jax.block_until_ready((c_logits, con_logits, min_d2))
    r_logits, r_con, r_min2, _ = reference_forward(params, x, with_concepts=True)
    assert d2 is None
    assert con_logits.shape == (2, 6)
    assert jnp.allclose(min_d2, r_min2, atol=1e-4, rtol=1e-4)
    assert jnp.allclose(con_logits, r_con, atol=1e-3, rtol=1e-3)
    assert jnp.allclose(c_logits, r_logits, atol=1e-3, rtol=1e-3)

    print("KERNEL_OK")
</pallas_src>

<mosaic_0001>
module attributes {stable_mosaic.version = 11 : i64} {
  func.func @_fused_kernel(%arg0: i32, %arg1: i32, %arg2: memref<2x256x4xf32, #tpu.memory_space<vmem>>, %arg3: memref<4x16xf32, #tpu.memory_space<vmem>>, %arg4: memref<1x16xf32, #tpu.memory_space<vmem>>, %arg5: memref<16x32xf32, #tpu.memory_space<vmem>>, %arg6: memref<1x32xf32, #tpu.memory_space<vmem>>, %arg7: memref<32x32xf32, #tpu.memory_space<vmem>>, %arg8: memref<1x32xf32, #tpu.memory_space<vmem>>, %arg9: memref<32x128xf32, #tpu.memory_space<vmem>>, %arg10: memref<1x128xf32, #tpu.memory_space<vmem>>, %arg11: memref<128x128xf32, #tpu.memory_space<vmem>>, %arg12: memref<2x16x256xf32, #tpu.memory_space<vmem>>, %arg13: memref<2x1x128xf32, #tpu.memory_space<vmem>>, %arg14: memref<2x1x128xf32, #tpu.memory_space<vmem>>) attributes {dimension_semantics = [#tpu.dimension_semantics<parallel>, #tpu.dimension_semantics<arbitrary>], iteration_bounds = array<i64: 1, 1>, scalar_prefetch = 0 : i64, scratch_operands = 0 : i64, tpu.core_type = #tpu.core_type<tc>, window_params = [{transform_indices = @transform_0, window_bounds = array<i64: 2, 256, 4>}, {pipeline_mode = #tpu.pipeline_mode<synchronous>, transform_indices = @transform_1, window_bounds = array<i64: 4, 16>}, {pipeline_mode = #tpu.pipeline_mode<synchronous>, transform_indices = @transform_2, window_bounds = array<i64: 1, 16>}, {pipeline_mode = #tpu.pipeline_mode<synchronous>, transform_indices = @transform_3, window_bounds = array<i64: 16, 32>}, {pipeline_mode = #tpu.pipeline_mode<synchronous>, transform_indices = @transform_4, window_bounds = array<i64: 1, 32>}, {pipeline_mode = #tpu.pipeline_mode<synchronous>, transform_indices = @transform_5, window_bounds = array<i64: 32, 32>}, {pipeline_mode = #tpu.pipeline_mode<synchronous>, transform_indices = @transform_6, window_bounds = array<i64: 1, 32>}, {pipeline_mode = #tpu.pipeline_mode<synchronous>, transform_indices = @transform_7, window_bounds = array<i64: 32, 128>}, {pipeline_mode = #tpu.pipeline_mode<synchronous>, transform_indices = @transform_8, window_bounds = array<i64: 1, 128>}, {pipeline_mode = #tpu.pipeline_mode<synchronous>, transform_indices = @transform_9, window_bounds = array<i64: 128, 128>}, {transform_indices = @transform_10, window_bounds = array<i64: 2, 16, 256>}, {transform_indices = @transform_11, window_bounds = array<i64: 2, 1, 128>}, {transform_indices = @transform_12, window_bounds = array<i64: 2, 1, 128>}]} {
    %c0 = arith.constant 0 : index
    %c0_0 = arith.constant 0 : index
    %c0_1 = arith.constant 0 : index
    %0 = vector.load %arg2[%c0, %c0_0, %c0_1] : memref<2x256x4xf32, #tpu.memory_space<vmem>>, vector<2x256x4xf32>
    %1 = vector.shape_cast %0 : vector<2x256x4xf32> to vector<512x4xf32>
    %c0_2 = arith.constant 0 : index
    %c0_3 = arith.constant 0 : index
    %2 = vector.load %arg3[%c0_2, %c0_3] : memref<4x16xf32, #tpu.memory_space<vmem>>, vector<4x16xf32>
    %cst = arith.constant dense<0.000000e+00> : vector<512x16xf32>
    %3 = tpu.matmul %1, %2, %cst {dimension_numbers = #tpu.dot_dimension_numbers<[1], [0], [0], [1], [0, 0, 1, 1], [], []>} : vector<512x4xf32>, vector<4x16xf32>, vector<512x16xf32> -> vector<512x16xf32>
    %c0_4 = arith.constant 0 : index
    %c0_5 = arith.constant 0 : index
    %4 = vector.load %arg4[%c0_4, %c0_5] : memref<1x16xf32, #tpu.memory_space<vmem>>, vector<1x16xf32>
    %5 = vector.broadcast %4 : vector<1x16xf32> to vector<512x16xf32>
    %6 = arith.addf %3, %5 : vector<512x16xf32>
    %cst_6 = arith.constant 0.000000e+00 : f32
    %7 = vector.broadcast %cst_6 : f32 to vector<512x16xf32>
    %8 = arith.maximumf %6, %7 : vector<512x16xf32>
    %c0_7 = arith.constant 0 : index
    %c0_8 = arith.constant 0 : index
    %9 = vector.load %arg5[%c0_7, %c0_8] : memref<16x32xf32, #tpu.memory_space<vmem>>, vector<16x32xf32>
    %cst_9 = arith.constant dense<0.000000e+00> : vector<512x32xf32>
    %10 = tpu.matmul %8, %9, %cst_9 {dimension_numbers = #tpu.dot_dimension_numbers<[1], [0], [0], [1], [0, 0, 1, 1], [], []>} : vector<512x16xf32>, vector<16x32xf32>, vector<512x32xf32> -> vector<512x32xf32>
    %c0_10 = arith.constant 0 : index
    %c0_11 = arith.constant 0 : index
    %11 = vector.load %arg6[%c0_10, %c0_11] : memref<1x32xf32, #tpu.memory_space<vmem>>, vector<1x32xf32>
    %12 = vector.broadcast %11 : vector<1x32xf32> to vector<512x32xf32>
    %13 = arith.addf %10, %12 : vector<512x32xf32>
    %cst_12 = arith.constant 0.000000e+00 : f32
    %14 = vector.broadcast %cst_12 : f32 to vector<512x32xf32>
    %15 = arith.maximumf %13, %14 : vector<512x32xf32>
    %c0_13 = arith.constant 0 : index
    %c0_14 = arith.constant 0 : index
    %16 = vector.load %arg7[%c0_13, %c0_14] : memref<32x32xf32, #tpu.memory_space<vmem>>, vector<32x32xf32>
    %cst_15 = arith.constant dense<0.000000e+00> : vector<512x32xf32>
    %17 = tpu.matmul %15, %16, %cst_15 {dimension_numbers = #tpu.dot_dimension_numbers<[1], [0], [0], [1], [0, 0, 1, 1], [], []>} : vector<512x32xf32>, vector<32x32xf32>, vector<512x32xf32> -> vector<512x32xf32>
    %c0_16 = arith.constant 0 : index
    %c0_17 = arith.constant 0 : index
    %18 = vector.load %arg8[%c0_16, %c0_17] : memref<1x32xf32, #tpu.memory_space<vmem>>, vector<1x32xf32>
    %19 = vector.broadcast %18 : vector<1x32xf32> to vector<512x32xf32>
    %20 = arith.addf %17, %19 : vector<512x32xf32>
    %21 = arith.negf %20 : vector<512x32xf32>
    %22 = math.exp %21 : vector<512x32xf32>
    %cst_18 = arith.constant 1.000000e+00 : f32
    %23 = vector.broadcast %cst_18 : f32 to vector<512x32xf32>
    %24 = arith.addf %23, %22 : vector<512x32xf32>
    %25 = arith.divf %23, %24 : vector<512x32xf32>
    %26 = arith.mulf %25, %25 : vector<512x32xf32>
    %cst_19 = arith.constant dense<0.000000e+00> : vector<512xf32>
    %27 = vector.multi_reduction <add>, %26, %cst_19 [1] : vector<512x32xf32> to vector<512xf32>
    %28 = vector.shape_cast %27 : vector<512xf32> to vector<512x1xf32>
    %c0_20 = arith.constant 0 : index
    %c0_21 = arith.constant 0 : index
    %29 = vector.load %arg9[%c0_20, %c0_21] : memref<32x128xf32, #tpu.memory_space<vmem>>, vector<32x128xf32>
    %cst_22 = arith.constant dense<0.000000e+00> : vector<512x128xf32>
    %30 = tpu.matmul %25, %29, %cst_22 {dimension_numbers = #tpu.dot_dimension_numbers<[1], [0], [0], [1], [0, 0, 1, 1], [], []>} : vector<512x32xf32>, vector<32x128xf32>, vector<512x128xf32> -> vector<512x128xf32>
    %cst_23 = arith.constant 2.000000e+00 : f32
    %31 = vector.broadcast %cst_23 : f32 to vector<512x128xf32>
    %32 = arith.mulf %31, %30 : vector<512x128xf32>
    %33 = vector.broadcast %28 : vector<512x1xf32> to vector<512x128xf32>
    %34 = arith.subf %33, %32 : vector<512x128xf32>
    %c0_24 = arith.constant 0 : index
    %c0_25 = arith.constant 0 : index
    %35 = vector.load %arg10[%c0_24, %c0_25] : memref<1x128xf32, #tpu.memory_space<vmem>>, vector<1x128xf32>
    %36 = vector.broadcast %35 : vector<1x128xf32> to vector<512x128xf32>
    %37 = arith.addf %34, %36 : vector<512x128xf32>
    %cst_26 = arith.constant 0.000000e+00 : f32
    %38 = vector.broadcast %cst_26 : f32 to vector<512x128xf32>
    %39 = arith.maximumf %37, %38 : vector<512x128xf32>
    %40 = vector.shape_cast %39 : vector<512x128xf32> to vector<2x256x128xf32>
    %41 = vector.extract_strided_slice %40 {offsets = [0, 0, 0], sizes = [1, 256, 16], strides = [1, 1, 1]} : vector<2x256x128xf32> to vector<1x256x16xf32>
    %42 = vector.shape_cast %41 : vector<1x256x16xf32> to vector<256x16xf32>
    %43 = tpu.transpose %42, [1, 0] : vector<256x16xf32> -> vector<16x256xf32>
    %c0_27 = arith.constant 0 : index
    %c0_28 = arith.constant 0 : index
    %c0_29 = arith.constant 0 : index
    %44 = vector.load %arg12[%c0_27, %c0_28, %c0_29] : memref<2x16x256xf32, #tpu.memory_space<vmem>>, vector<1x16x256xf32>
    %45 = vector.shape_cast %44 : vector<1x16x256xf32> to vector<16x256xf32>
    %46 = vector.shape_cast %43 : vector<16x256xf32> to vector<1x16x256xf32>
    tpu.vector_store %arg12[%c0_27, %c0_28, %c0_29], %46 {strides = array<i32>} : memref<2x16x256xf32, #tpu.memory_space<vmem>>, vector<1x16x256xf32>,
    %47 = vector.extract_strided_slice %40 {offsets = [1, 0, 0], sizes = [1, 256, 16], strides = [1, 1, 1]} : vector<2x256x128xf32> to vector<1x256x16xf32>
    %48 = vector.shape_cast %47 : vector<1x256x16xf32> to vector<256x16xf32>
    %49 = tpu.transpose %48, [1, 0] : vector<256x16xf32> -> vector<16x256xf32>
    %c1 = arith.constant 1 : index
    %c0_30 = arith.constant 0 : index
    %c0_31 = arith.constant 0 : index
    %50 = vector.load %arg12[%c1, %c0_30, %c0_31] : memref<2x16x256xf32, #tpu.memory_space<vmem>>, vector<1x16x256xf32>
    %51 = vector.shape_cast %50 : vector<1x16x256xf32> to vector<16x256xf32>
    %52 = vector.shape_cast %49 : vector<16x256xf32> to vector<1x16x256xf32>
    tpu.vector_store %arg12[%c1, %c0_30, %c0_31], %52 {strides = array<i32>} : memref<2x16x256xf32, #tpu.memory_space<vmem>>, vector<1x16x256xf32>,
    %cst_32 = arith.constant dense<0x7F800000> : vector<2x128xf32>
    %53 = vector.multi_reduction <minimumf>, %40, %cst_32 [1] : vector<2x256x128xf32> to vector<2x128xf32>
    %54 = vector.shape_cast %53 : vector<2x128xf32> to vector<2x1x128xf32>
    %c0_i32 = arith.constant 0 : i32
    %55 = arith.cmpi eq, %arg1, %c0_i32 : i32
    %56 = arith.extui %55 : i1 to i32
    %c0_i32_33 = arith.constant 0 : i32
    %57 = arith.cmpi ne, %56, %c0_i32_33 : i32
    scf.if %57 {
      %c0_38 = arith.constant 0 : index
      %c0_39 = arith.constant 0 : index
      %c0_40 = arith.constant 0 : index
      %64 = vector.load %arg13[%c0_38, %c0_39, %c0_40] : memref<2x1x128xf32, #tpu.memory_space<vmem>>, vector<2x1x128xf32>
      tpu.vector_store %arg13[%c0_38, %c0_39, %c0_40], %54 {strides = array<i32>} : memref<2x1x128xf32, #tpu.memory_space<vmem>>, vector<2x1x128xf32>,
    } else {
    }
    %c0_i32_34 = arith.constant 0 : i32
    %58 = arith.cmpi sgt, %arg1, %c0_i32_34 : i32
    %59 = arith.extui %58 : i1 to i32
    %c0_i32_35 = arith.constant 0 : i32
    %60 = arith.cmpi ne, %59, %c0_i32_35 : i32
    scf.if %60 {
      %c0_38 = arith.constant 0 : index
      %c0_39 = arith.constant 0 : index
      %c0_40 = arith.constant 0 : index
      %64 = vector.load %arg13[%c0_38, %c0_39, %c0_40] : memref<2x1x128xf32, #tpu.memory_space<vmem>>, vector<2x1x128xf32>
      %65 = arith.minimumf %64, %54 : vector<2x1x128xf32>
      %c0_41 = arith.constant 0 : index
      %c0_42 = arith.constant 0 : index
      %c0_43 = arith.constant 0 : index
      %66 = vector.load %arg13[%c0_41, %c0_42, %c0_43] : memref<2x1x128xf32, #tpu.memory_space<vmem>>, vector<2x1x128xf32>
      tpu.vector_store %arg13[%c0_41, %c0_42, %c0_43], %65 {strides = array<i32>} : memref<2x1x128xf32, #tpu.memory_space<vmem>>, vector<2x1x128xf32>,
    } else {
    }
    %c0_i32_36 = arith.constant 0 : i32
    %61 = arith.cmpi eq, %arg1, %c0_i32_36 : i32
    %62 = arith.extui %61 : i1 to i32
    %c0_i32_37 = arith.constant 0 : i32
    %63 = arith.cmpi ne, %62, %c0_i32_37 : i32
    scf.if %63 {
      %c0_38 = arith.constant 0 : index
      %c0_39 = arith.constant 0 : index
      %c0_40 = arith.constant 0 : index
      %64 = vector.load %arg13[%c0_38, %c0_39, %c0_40] : memref<2x1x128xf32, #tpu.memory_space<vmem>>, vector<2x1x128xf32>
      %65 = vector.shape_cast %64 : vector<2x1x128xf32> to vector<2x128xf32>
      %cst_41 = arith.constant 1.000000e+00 : f32
      %66 = vector.broadcast %cst_41 : f32 to vector<2x128xf32>
      %67 = arith.addf %65, %66 : vector<2x128xf32>
      %cst_42 = arith.constant 9.99999974E-5 : f32
      %68 = vector.broadcast %cst_42 : f32 to vector<2x128xf32>
      %69 = arith.addf %65, %68 : vector<2x128xf32>
      %70 = arith.divf %67, %69 : vector<2x128xf32>
      %71 = math.log %70 : vector<2x128xf32>
      %c0_43 = arith.constant 0 : index
      %c0_44 = arith.constant 0 : index
      %72 = vector.load %arg11[%c0_43, %c0_44] : memref<128x128xf32, #tpu.memory_space<vmem>>, vector<128x128xf32>
      %cst_45 = arith.constant dense<0.000000e+00> : vector<2x128xf32>
      %73 = tpu.matmul %71, %72, %cst_45 {dimension_numbers = #tpu.dot_dimension_numbers<[1], [0], [0], [1], [0, 0, 1, 1], [], []>} : vector<2x128xf32>, vector<128x128xf32>, vector<2x128xf32> -> vector<2x128xf32>
      %74 = vector.shape_cast %73 : vector<2x128xf32> to vector<2x1x128xf32>
      %c0_46 = arith.constant 0 : index
      %c0_47 = arith.constant 0 : index
      %c0_48 = arith.constant 0 : index
      %75 = vector.load %arg14[%c0_46, %c0_47, %c0_48] : memref<2x1x128xf32, #tpu.memory_space<vmem>>, vector<2x1x128xf32>
      tpu.vector_store %arg14[%c0_46, %c0_47, %c0_48], %74 {strides = array<i32>} : memref<2x1x128xf32, #tpu.memory_space<vmem>>, vector<2x1x128xf32>,
    } else {
    }
    return
  }
  func.func @transform_0(%arg0: i32, %arg1: i32) -> (i32, i32, i32) {
    %c0_i32 = arith.constant 0 : i32
    %c0_i32_0 = arith.constant 0 : i32
    return %arg0, %arg1, %c0_i32 : i32, i32, i32
  }
  func.func @transform_1(%arg0: i32, %arg1: i32) -> (i32, i32) {
    %c0_i32 = arith.constant 0 : i32
    %c0_i32_0 = arith.constant 0 : i32
    %c0_i32_1 = arith.constant 0 : i32
    return %c0_i32, %c0_i32_0 : i32, i32
  }
  func.func @transform_2(%arg0: i32, %arg1: i32) -> (i32, i32) {
    %c0_i32 = arith.constant 0 : i32
    %c0_i32_0 = arith.constant 0 : i32
    %c0_i32_1 = arith.constant 0 : i32
    return %c0_i32, %c0_i32_0 : i32, i32
  }
  func.func @transform_3(%arg0: i32, %arg1: i32) -> (i32, i32) {
    %c0_i32 = arith.constant 0 : i32
    %c0_i32_0 = arith.constant 0 : i32
    %c0_i32_1 = arith.constant 0 : i32
    return %c0_i32, %c0_i32_0 : i32, i32
  }
  func.func @transform_4(%arg0: i32, %arg1: i32) -> (i32, i32) {
    %c0_i32 = arith.constant 0 : i32
    %c0_i32_0 = arith.constant 0 : i32
    %c0_i32_1 = arith.constant 0 : i32
    return %c0_i32, %c0_i32_0 : i32, i32
  }
  func.func @transform_5(%arg0: i32, %arg1: i32) -> (i32, i32) {
    %c0_i32 = arith.constant 0 : i32
    %c0_i32_0 = arith.constant 0 : i32
    %c0_i32_1 = arith.constant 0 : i32
    return %c0_i32, %c0_i32_0 : i32, i32
  }
  func.func @transform_6(%arg0: i32, %arg1: i32) -> (i32, i32) {
    %c0_i32 = arith.constant 0 : i32
    %c0_i32_0 = arith.constant 0 : i32
    %c0_i32_1 = arith.constant 0 : i32
    return %c0_i32, %c0_i32_0 : i32, i32
  }
  func.func @transform_7(%arg0: i32, %arg1: i32) -> (i32, i32) {
    %c0_i32 = arith.constant 0 : i32
    %c0_i32_0 = arith.constant 0 : i32
    %c0_i32_1 = arith.constant 0 : i32
    return %c0_i32, %c0_i32_0 : i32, i32
  }
  func.func @transform_8(%arg0: i32, %arg1: i32) -> (i32, i32) {
    %c0_i32 = arith.constant 0 : i32
    %c0_i32_0 = arith.constant 0 : i32
    %c0_i32_1 = arith.constant 0 : i32
    return %c0_i32, %c0_i32_0 : i32, i32
  }
  func.func @transform_9(%arg0: i32, %arg1: i32) -> (i32, i32) {
    %c0_i32 = arith.constant 0 : i32
    %c0_i32_0 = arith.constant 0 : i32
    %c0_i32_1 = arith.constant 0 : i32
    return %c0_i32, %c0_i32_0 : i32, i32
  }
  func.func @transform_10(%arg0: i32, %arg1: i32) -> (i32, i32, i32) {
    %c0_i32 = arith.constant 0 : i32
    %c0_i32_0 = arith.constant 0 : i32
    return %arg0, %c0_i32, %arg1 : i32, i32, i32
  }
  func.func @transform_11(%arg0: i32, %arg1: i32) -> (i32, i32, i32) {
    %c0_i32 = arith.constant 0 : i32
    %c0_i32_0 = arith.constant 0 : i32
    %c0_i32_1 = arith.constant 0 : i32
    return %arg0, %c0_i32, %c0_i32_0 : i32, i32, i32
  }
  func.func @transform_12(%arg0: i32, %arg1: i32) -> (i32, i32, i32) {
    %c0_i32 = arith.constant 0 : i32
    %c0_i32_0 = arith.constant 0 : i32
    %c0_i32_1 = arith.constant 0 : i32
    return %arg0, %c0_i32, %c0_i32_0 : i32, i32, i32
  }
}

</mosaic_0001>

<bundles_post_ra>
// kernel: tpu_custom_call.1
= control target key start
LH: loop header
LB: loop body
LE: loop exit
PB: predicated region body
PF: predicated region fallthrough
CT: control target
= control target key end

     0   :  { %18 = vsyncpa [#allocation3], 0  ;;  %vm305_vm0 = vcmask 1043456   ;;  %vm112_vm1 = vcmask 31744   ;;  %s6689_s0 = inlined_call_operand.vmem [shape: f32[2,256,4], index: 0, kind: input, shape index: {}]   ;;  %s6690_s1 = inlined_call_operand.vmem [shape: f32[4,16], index: 1, kind: input, shape index: {}]   ;;  %s6691_s2 = inlined_call_operand.vmem [shape: f32[1,16], index: 2, kind: input, shape index: {}]   ;;  %s6692_s3 = inlined_call_operand.vmem [shape: f32[16,32], index: 3, kind: input, shape index: {}]   ;;  %s6693_s4 = inlined_call_operand.vmem [shape: f32[1,32], index: 4, kind: input, shape index: {}]   ;;  %s6694_s5 = inlined_call_operand.vmem [shape: f32[32,32], index: 5, kind: input, shape index: {}]   ;;  %s6695_s6 = inlined_call_operand.vmem [shape: f32[1,32], index: 6, kind: input, shape index: {}]   ;;  %s6696_s7 = inlined_call_operand.vmem [shape: f32[32,128], index: 7, kind: input, shape index: {}]   ;;  %s6697_s8 = inlined_call_operand.vmem [shape: f32[1,128], index: 8, kind: input, shape index: {}]   ;;  %s6698_s9 = inlined_call_operand.vmem [shape: f32[128,128], index: 9, kind: input, shape index: {}]   ;;  %s6699_s10 = inlined_call_operand.hbm [shape: f32[2,16,256], index: 10, kind: output, shape index: {0}]   ;;  %s6700_s11 = inlined_call_operand.hbm [shape: f32[2,1,128], index: 11, kind: output, shape index: {1}]   ;;  %s6701_s12 = inlined_call_operand.hbm [shape: f32[2,1,128], index: 12, kind: output, shape index: {2}]  }
   0x1   :  { %v104_v0 = vld [vmem:[%s6690_s1] sm:$0xf]  ;;  %v41_v2 = vld [vmem:[%s6689_s0 + $0x8] sm:$0xff]  ;;  %v42_v3 = vld [vmem:[%s6689_s0 + $0x10] sm:$0xff] }
   0x2   :  { %v40_v1 = vld [vmem:[%s6689_s0] sm:$0xff]  ;;  %4515 = vmatprep.subr.msk.mxu0 %vm305_vm0, %v104_v0  ;;  %v43_v4 = vld [vmem:[%s6689_s0 + $0x18] sm:$0xff]  ;;  %v45_v6 = vld [vmem:[%s6689_s0 + $0x28] sm:$0xff] }
   0x3   :  { %4517 = vmatprep.mubr.msk.f32.mxu0 %vm112_vm1, %v40_v1  ;;  %4516 = vmatpush3.msk.msra.mxu0 %vm305_vm0, %v104_v0  ;;  %v44_v5 = vld [vmem:[%s6689_s0 + $0x20] sm:$0xff]  ;;  %v46_v7 = vld [vmem:[%s6689_s0 + $0x30] sm:$0xff]  ;;  %v47_v8 = vld [vmem:[%s6689_s0 + $0x38] sm:$0xff] }
   0x4   :  { %4518 = vmatmul.mubr.msk.f32.vlgmr.msra.gmra.mrb[0].mxu0 %vm112_vm1, %v41_v2  ;;  %v48_v9 = vld [vmem:[%s6689_s0 + $0x40] sm:$0xff]  ;;  %v49_v10 = vld [vmem:[%s6689_s0 + $0x48] sm:$0xff]  ;;  %v50_v11 = vld [vmem:[%s6689_s0 + $0x50] sm:$0xff] }
   0x5   :  { %4520 = vmatprep.mubr.msk.f32.mxu0 %vm112_vm1, %v42_v3  ;;  %v51_v12 = vld [vmem:[%s6689_s0 + $0x58] sm:$0xff]  ;;  %v52_v13 = vld [vmem:[%s6689_s0 + $0x60] sm:$0xff] }
   0x8   :  { %4521 = vmatmul.mubr.msk.f32.gmra.mrb[2].mxu0 %vm112_vm1, %v43_v4 }
   0x9   :  { %4523 = vmatprep.mubr.msk.f32.mxu0 %vm112_vm1, %v44_v5 }
   0xc   :  { %4524 = vmatmul.mubr.msk.f32.gmra.mrb[4].mxu0 %vm112_vm1, %v45_v6 }
   0xd   :  { %4526 = vmatprep.mubr.msk.f32.mxu0 %vm112_vm1, %v46_v7 }
  0x10   :  { %4527 = vmatmul.mubr.msk.f32.gmra.mrb[6].mxu0 %vm112_vm1, %v47_v8 }
  0x11   :  { %4529 = vmatprep.mubr.msk.f32.mxu0 %vm112_vm1, %v48_v9 }
  0x14   :  { %4530 = vmatmul.mubr.msk.f32.gmra.mrb[8].mxu0 %vm112_vm1, %v49_v10 }
  0x15   :  { %4532 = vmatprep.mubr.msk.f32.mxu0 %vm112_vm1, %v50_v11 }
  0x16   :  { %19 = vsyncpa [#allocation5], 0  ;;  %v53_v14 = vld [vmem:[%s6689_s0 + $0x68] sm:$0xff]  ;;  %v54_v15 = vld [vmem:[%s6689_s0 + $0x70] sm:$0xff]  ;;  %vm767_vm2 = vcmask 130048   ;;  %vm1420_vm3 = vcmask 261120  }
  0x17   :  { %v55_v16 = vld [vmem:[%s6689_s0 + $0x78] sm:$0xff]  ;;  %v56_v17 = vld [vmem:[%s6689_s0 + $0x80] sm:$0xff]  ;;  %v57_v18 = vld [vmem:[%s6689_s0 + $0x88] sm:$0xff]  ;;  %vm5346_vm4 = vmmov 0  }
  0x18   :  { %4533 = vmatmul.mubr.msk.f32.gmra.mrb[10].mxu0 %vm112_vm1, %v51_v12  ;;  %v58_v19 = vld [vmem:[%s6689_s0 + $0x90] sm:$0xff]  ;;  %v59_v20 = vld [vmem:[%s6689_s0 + $0x98] sm:$0xff]  ;;  %v60_v21 = vld [vmem:[%s6689_s0 + $0xa0] sm:$0xff] }
  0x19   :  { %4535 = vmatprep.mubr.msk.f32.mxu0 %vm112_vm1, %v52_v13  ;;  %v61_v22 = vld [vmem:[%s6689_s0 + $0xa8] sm:$0xff]  ;;  %v62_v23 = vld [vmem:[%s6689_s0 + $0xb0] sm:$0xff]  ;;  %v63_v24 = vld [vmem:[%s6689_s0 + $0xb8] sm:$0xff] }
  0x1a   :  { %v64_v25 = vld [vmem:[%s6689_s0 + $0xc0] sm:$0xff]  ;;  %v65_v26 = vld [vmem:[%s6689_s0 + $0xc8] sm:$0xff]  ;;  %v66_v27 = vld [vmem:[%s6689_s0 + $0xd0] sm:$0xff] }
  0x1b   :  { %v67_v28 = vld [vmem:[%s6689_s0 + $0xd8] sm:$0xff]  ;;  %v68_v29 = vld [vmem:[%s6689_s0 + $0xe0] sm:$0xff]  ;;  %v69_v30 = vld [vmem:[%s6689_s0 + $0xe8] sm:$0xff] }
  0x1c   :  { %4536 = vmatmul.mubr.msk.f32.gmra.mrb[12].mxu0 %vm112_vm1, %v53_v14  ;;  %v70_v31 = vld [vmem:[%s6689_s0 + $0xf0] sm:$0xff]  ;;  %v71_v32 = vld [vmem:[%s6689_s0 + $0xf8] sm:$0xff]  ;;  %v72_v33 = vld [vmem:[%s6689_s0 + $0x100] sm:$0xff] }
  0x1d   :  { %4538 = vmatprep.mubr.msk.f32.mxu0 %vm112_vm1, %v54_v15  ;;  %v73_v34 = vld [vmem:[%s6689_s0 + $0x108] sm:$0xff]  ;;  %v74_v35 = vld [vmem:[%s6689_s0 + $0x110] sm:$0xff]  ;;  %v75_v36 = vld [vmem:[%s6689_s0 + $0x118] sm:$0xff] }
  0x1e   :  { %v76_v37 = vld [vmem:[%s6689_s0 + $0x120] sm:$0xff]  ;;  %v77_v38 = vld [vmem:[%s6689_s0 + $0x128] sm:$0xff]  ;;  %v78_v39 = vld [vmem:[%s6689_s0 + $0x130] sm:$0xff] }
  0x1f   :  { %v79_v40 = vld [vmem:[%s6689_s0 + $0x138] sm:$0xff]  ;;  %v80_v41 = vld [vmem:[%s6689_s0 + $0x140] sm:$0xff]  ;;  %v81_v42 = vld [vmem:[%s6689_s0 + $0x148] sm:$0xff] }
  0x20   :  { %4539 = vmatmul.mubr.msk.f32.gmra.mrb[14].mxu0 %vm112_vm1, %v55_v16  ;;  %v82_v43 = vld [vmem:[%s6689_s0 + $0x150] sm:$0xff]  ;;  %v83_v44 = vld [vmem:[%s6689_s0 + $0x158] sm:$0xff]  ;;  %v84_v45 = vld [vmem:[%s6689_s0 + $0x160] sm:$0xff] }
  0x21   :  { %4541 = vmatprep.mubr.msk.f32.mxu0 %vm112_vm1, %v56_v17  ;;  %v758_v46 = vld [vmem:[%s6692_s3] sm:$0xff]  ;;  %v759_v47 = vld [vmem:[%s6692_s3 + $0x8] sm:$0xff]  ;;  %v86_v50 = vld [vmem:[%s6689_s0 + $0x170] sm:$0xff] }
  0x22   :  { %v4956_v48 = vpack.c.bf16 %v759_v47, %v758_v46  ;;  %v85_v49 = vld [vmem:[%s6689_s0 + $0x168] sm:$0xff]  ;;  %v87_v51 = vld [vmem:[%s6689_s0 + $0x178] sm:$0xff]  ;;  %v88_v52 = vld [vmem:[%s6689_s0 + $0x180] sm:$0xff] }
  0x23   :  { %v89_v53 = vld [vmem:[%s6689_s0 + $0x188] sm:$0xff]  ;;  %v90_v54 = vld [vmem:[%s6689_s0 + $0x190] sm:$0xff]  ;;  %v91_v55 = vld [vmem:[%s6689_s0 + $0x198] sm:$0xff] }
  0x24   :  { %4542 = vmatmul.mubr.msk.f32.gmra.mrb[16].mxu0 %vm112_vm1, %v57_v18  ;;  %4957 = vmatprep.subr.bf16.mxu1 %v4956_v48  ;;  %v92_v56 = vld [vmem:[%s6689_s0 + $0x1a0] sm:$0xff]  ;;  %v93_v57 = vld [vmem:[%s6689_s0 + $0x1a8] sm:$0xff]  ;;  %v94_v58 = vld [vmem:[%s6689_s0 + $0x1b0] sm:$0xff] }
  0x25   :  { %4544 = vmatprep.mubr.msk.f32.mxu0 %vm112_vm1, %v58_v19  ;;  %4959 = vmatpush3.bf16.msra.mxu1 %v4956_v48  ;;  %v95_v59 = vld [vmem:[%s6689_s0 + $0x1b8] sm:$0xff]  ;;  %v96_v60 = vld [vmem:[%s6689_s0 + $0x1c0] sm:$0xff]  ;;  %v97_v61 = vld [vmem:[%s6689_s0 + $0x1c8] sm:$0xff] }
  0x26   :  { %v98_v62 = vld [vmem:[%s6689_s0 + $0x1d0] sm:$0xff]  ;;  %v99_v63 = vld [vmem:[%s6689_s0 + $0x1d8] sm:$0xff]  ;;  %v100_v0 = vld [vmem:[%s6689_s0 + $0x1e0] sm:$0xff] }
  0x27   :  { %v101_v1 = vld [vmem:[%s6689_s0 + $0x1e8] sm:$0xff]  ;;  %v102_v2 = vld [vmem:[%s6689_s0 + $0x1f0] sm:$0xff]  ;;  %v103_v3 = vld [vmem:[%s6689_s0 + $0x1f8] sm:$0xff]  ;;  %s5350_s0 = smov [#allocation2]  }
  0x28   :  { %4545 = vmatmul.mubr.msk.f32.gmra.mrb[18].mxu0 %vm112_vm1, %v59_v20  ;;  %v1409_v4 = vld [vmem:[%s6694_s5] sm:$0xff]  ;;  %v1410_v5 = vld [vmem:[%s6694_s5 + $0x8] sm:$0xff]  ;;  %v1411_v12 = vld [vmem:[%s6694_s5 + $0x10] sm:$0xff]  ;;  %s3862_s3 = sshll.u32 %s5350_s0, 4  ;;  %s3863_s3 = int_to_ptr.vmem [resolvable:$true] %s3862_s3 }
  0x29   :  { %4547 = vmatprep.mubr.msk.f32.mxu0 %vm112_vm1, %v60_v21  ;;  %v4960_v6 = vpack.c.bf16 %v1410_v5, %v1409_v4  ;;  %v5694_v7 = vld [vmem:[%s6691_s2] ss:$0 sm:$0xff]  ;;  %v1412_v13 = vld [vmem:[%s6694_s5 + $0x18] sm:$0xff] }
  0x2a   :  { %v4964_v16 = vpack.c.bf16 %v1412_v13, %v1411_v12 }
  0x2b   :  { %4961 = vmatprep.subr.bf16.mxu0 %v4960_v6 }
  0x2c   :  { %4548 = vmatmul.mubr.msk.f32.gmra.mrb[20].mxu0 %vm112_vm1, %v61_v22 }
  0x2d   :  { %4550 = vmatprep.mubr.msk.f32.mxu0 %vm112_vm1, %v62_v23  ;;  %4963 = vmatpush3.bf16.msra.mxu0 %v4960_v6 }
  0x2e   :  { %4965 = vmatprep.subr.bf16.mxu0 %v4964_v16 }
  0x30   :  { %4551 = vmatmul.mubr.msk.f32.gmra.mrb[22].mxu0 %vm112_vm1, %v63_v24 }
  0x31   :  { %4553 = vmatprep.mubr.msk.f32.mxu0 %vm112_vm1, %v64_v25  ;;  %4967 = vmatpush3.bf16.msra.mxu0 %v4964_v16 }
  0x34   :  { %4554 = vmatmul.mubr.msk.f32.gmra.mrb[24].mxu0 %vm112_vm1, %v65_v26 }
  0x35   :  { %4556 = vmatprep.mubr.msk.f32.mxu0 %vm112_vm1, %v66_v27 }
  0x38   :  { %4557 = vmatmul.mubr.msk.f32.gmra.mrb[26].mxu0 %vm112_vm1, %v67_v28 }
  0x39   :  { %4559 = vmatprep.mubr.msk.f32.mxu0 %vm112_vm1, %v68_v29 }
  0x3c   :  { %4560 = vmatmul.mubr.msk.f32.gmra.mrb[28].mxu0 %vm112_vm1, %v69_v30 }
  0x3d   :  { %4562 = vmatprep.mubr.msk.f32.mxu0 %vm112_vm1, %v70_v31 }
  0x40   :  { %4563 = vmatmul.mubr.msk.f32.gmra.mrb[30].mxu0 %vm112_vm1, %v71_v32 }
  0x41   :  { %4565 = vmatprep.mubr.msk.f32.mxu0 %vm112_vm1, %v72_v33 }
  0x44   :  { %4566 = vmatmul.mubr.msk.f32.gmra.mrb[32].mxu0 %vm112_vm1, %v73_v34 }
  0x45   :  { %4568 = vmatprep.mubr.msk.f32.mxu0 %vm112_vm1, %v74_v35 }
  0x48   :  { %4569 = vmatmul.mubr.msk.f32.gmra.mrb[34].mxu0 %vm112_vm1, %v75_v36 }
  0x49   :  { %4571 = vmatprep.mubr.msk.f32.mxu0 %vm112_vm1, %v76_v37 }
  0x4c   :  { %4572 = vmatmul.mubr.msk.f32.gmra.mrb[36].mxu0 %vm112_vm1, %v77_v38 }
  0x4d   :  { %4574 = vmatprep.mubr.msk.f32.mxu0 %vm112_vm1, %v78_v39 }
  0x50   :  { %4575 = vmatmul.mubr.msk.f32.gmra.mrb[38].mxu0 %vm112_vm1, %v79_v40 }
  0x51   :  { %4577 = vmatprep.mubr.msk.f32.mxu0 %vm112_vm1, %v80_v41 }
  0x54   :  { %4578 = vmatmul.mubr.msk.f32.gmra.mrb[40].mxu0 %vm112_vm1, %v81_v42 }
  0x55   :  { %4580 = vmatprep.mubr.msk.f32.mxu0 %vm112_vm1, %v82_v43 }
  0x58   :  { %4581 = vmatmul.mubr.msk.f32.gmra.mrb[42].mxu0 %vm112_vm1, %v83_v44 }
  0x59   :  { %4583 = vmatprep.mubr.msk.f32.mxu0 %vm112_vm1, %v84_v45 }
  0x5c   :  { %4584 = vmatmul.mubr.msk.f32.gmra.mrb[44].mxu0 %vm112_vm1, %v85_v49 }
  0x5d   :  { %4586 = vmatprep.mubr.msk.f32.mxu0 %vm112_vm1, %v86_v50 }
  0x60   :  { %4587 = vmatmul.mubr.msk.f32.gmra.mrb[46].mxu0 %vm112_vm1, %v87_v51 }
  0x61   :  { %4589 = vmatprep.mubr.msk.f32.mxu0 %vm112_vm1, %v88_v52 }
  0x64   :  { %4590 = vmatmul.mubr.msk.f32.gmra.mrb[48].mxu0 %vm112_vm1, %v89_v53 }
  0x65   :  { %4592 = vmatprep.mubr.msk.f32.mxu0 %vm112_vm1, %v90_v54 }
  0x68   :  { %4593 = vmatmul.mubr.msk.f32.gmra.mrb[50].mxu0 %vm112_vm1, %v91_v55 }
  0x69   :  { %4595 = vmatprep.mubr.msk.f32.mxu0 %vm112_vm1, %v92_v56 }
  0x6c   :  { %4596 = vmatmul.mubr.msk.f32.gmra.mrb[52].mxu0 %vm112_vm1, %v93_v57 }
  0x6d   :  { %4598 = vmatprep.mubr.msk.f32.mxu0 %vm112_vm1, %v94_v58 }
  0x70   :  { %4599 = vmatmul.mubr.msk.f32.gmra.mrb[54].mxu0 %vm112_vm1, %v95_v59 }
  0x71   :  { %4601 = vmatprep.mubr.msk.f32.mxu0 %vm112_vm1, %v96_v60 }
  0x74   :  { %4602 = vmatmul.mubr.msk.f32.gmra.mrb[56].mxu0 %vm112_vm1, %v97_v61 }
  0x75   :  { %4604 = vmatprep.mubr.msk.f32.mxu0 %vm112_vm1, %v98_v62 }
  0x78   :  { %4605 = vmatmul.mubr.msk.f32.gmra.mrb[58].mxu0 %vm112_vm1, %v99_v63 }
  0x79   :  { %4607 = vmatprep.mubr.msk.f32.mxu0 %vm112_vm1, %v100_v0 }
  0x7c   :  { %4608 = vmatmul.mubr.msk.f32.gmra.mrb[60].mxu0 %vm112_vm1, %v101_v1 }
  0x7d   :  { %4610 = vmatprep.mubr.msk.f32.mxu0 %vm112_vm1, %v102_v2 }
  0x80   :  { %4611 = vmatmul.mubr.msk.f32.gmra.mrb[62].mxu0 %vm112_vm1, %v103_v3 }
  0xd7   :  { %v4519_v8 = vpop.f32.mrb[0].mxu0 }
  0xd8   :  { %v381_v9 = vadd.f32 %v4519_v8, %v5694_v7  ;;  %v375_v10 = vpop.f32.mrb[1].mxu0 }
  0xd9   :  { %v376_v11 = vadd.f32 %v5694_v7, %v375_v10 }
  0xda   :  { %v695_v17 = vmax.f32 %v381_v9, 0.0 }
  0xdb   :  { %v694_v14 = vmax.f32 %v376_v11, 0.0  ;;  %v4522_v15 = vpop.f32.mrb[2].mxu0 }
  0xdc   :  { %v391_v18 = vadd.f32 %v4522_v15, %v5694_v7  ;;  %v385_v19 = vpop.f32.mrb[3].mxu0 }
  0xdd   :  { %v386_v20 = vadd.f32 %v5694_v7, %v385_v19  ;;  %4617 = vmatprep.mubr.msk.f32.mxu1 %vm767_vm2, %v694_v14 }
  0xde   :  { %4618 = vmatmul.mubr.msk.f32.vlgmr.msra.gmra.mrb[0].mxu1 %vm767_vm2, %v695_v17  ;;  %v697_v23 = vmax.f32 %v391_v18, 0.0 }
  0xdf   :  { %v696_v21 = vmax.f32 %v386_v20, 0.0  ;;  %v4525_v22 = vpop.f32.mrb[4].mxu0 }
  0xe0   :  { %v401_v24 = vadd.f32 %v4525_v22, %v5694_v7  ;;  %v395_v25 = vpop.f32.mrb[5].mxu0 }
  0xe1   :  { %v396_v26 = vadd.f32 %v5694_v7, %v395_v25  ;;  %4620 = vmatprep.mubr.msk.f32.mxu1 %vm767_vm2, %v696_v21 }
  0xe2   :  { %4621 = vmatmul.mubr.msk.f32.gmra.mrb[2].mxu1 %vm767_vm2, %v697_v23  ;;  %v699_v29 = vmax.f32 %v401_v24, 0.0 }
  0xe3   :  { %v698_v27 = vmax.f32 %v396_v26, 0.0  ;;  %v4528_v28 = vpop.f32.mrb[6].mxu0 }
  0xe4   :  { %v411_v30 = vadd.f32 %v4528_v28, %v5694_v7  ;;  %v405_v31 = vpop.f32.mrb[7].mxu0 }
  0xe5   :  { %v406_v32 = vadd.f32 %v5694_v7, %v405_v31  ;;  %4623 = vmatprep.mubr.msk.f32.mxu1 %vm767_vm2, %v698_v27 }
  0xe6   :  { %4624 = vmatmul.mubr.msk.f32.gmra.mrb[4].mxu1 %vm767_vm2, %v699_v29  ;;  %v701_v35 = vmax.f32 %v411_v30, 0.0 }
  0xe7   :  { %v700_v33 = vmax.f32 %v406_v32, 0.0  ;;  %v4531_v34 = vpop.f32.mrb[8].mxu0 }
  0xe8   :  { %v421_v36 = vadd.f32 %v4531_v34, %v5694_v7  ;;  %v415_v37 = vpop.f32.mrb[9].mxu0 }
  0xe9   :  { %v416_v38 = vadd.f32 %v5694_v7, %v415_v37  ;;  %4626 = vmatprep.mubr.msk.f32.mxu1 %vm767_vm2, %v700_v33 }
  0xea   :  { %4627 = vmatmul.mubr.msk.f32.gmra.mrb[6].mxu1 %vm767_vm2, %v701_v35  ;;  %v703_v41 = vmax.f32 %v421_v36, 0.0 }
  0xeb   :  { %v702_v39 = vmax.f32 %v416_v38, 0.0  ;;  %v4534_v40 = vpop.f32.mrb[10].mxu0 }
  0xec   :  { %v431_v42 = vadd.f32 %v4534_v40, %v5694_v7  ;;  %v425_v43 = vpop.f32.mrb[11].mxu0 }
  0xed   :  { %v426_v44 = vadd.f32 %v5694_v7, %v425_v43  ;;  %4629 = vmatprep.mubr.msk.f32.mxu1 %vm767_vm2, %v702_v39 }
  0xee   :  { %4630 = vmatmul.mubr.msk.f32.gmra.mrb[8].mxu1 %vm767_vm2, %v703_v41  ;;  %v705_v47 = vmax.f32 %v431_v42, 0.0 }
  0xef   :  { %v704_v45 = vmax.f32 %v426_v44, 0.0  ;;  %v4537_v46 = vpop.f32.mrb[12].mxu0 }
  0xf0   :  { %v441_v48 = vadd.f32 %v4537_v46, %v5694_v7  ;;  %v435_v49 = vpop.f32.mrb[13].mxu0 }
  0xf1   :  { %v436_v50 = vadd.f32 %v5694_v7, %v435_v49  ;;  %4632 = vmatprep.mubr.msk.f32.mxu1 %vm767_vm2, %v704_v45 }
  0xf2   :  { %4633 = vmatmul.mubr.msk.f32.gmra.mrb[10].mxu1 %vm767_vm2, %v705_v47  ;;  %v707_v53 = vmax.f32 %v441_v48, 0.0 }
  0xf3   :  { %v706_v51 = vmax.f32 %v436_v50, 0.0  ;;  %v4540_v52 = vpop.f32.mrb[14].mxu0 }
  0xf4   :  { %v451_v54 = vadd.f32 %v4540_v52, %v5694_v7  ;;  %v445_v55 = vpop.f32.mrb[15].mxu0 }
  0xf5   :  { %v446_v56 = vadd.f32 %v5694_v7, %v445_v55  ;;  %4635 = vmatprep.mubr.msk.f32.mxu1 %vm767_vm2, %v706_v51 }
  0xf6   :  { %4636 = vmatmul.mubr.msk.f32.gmra.mrb[12].mxu1 %vm767_vm2, %v707_v53  ;;  %v709_v59 = vmax.f32 %v451_v54, 0.0 }
  0xf7   :  { %v708_v57 = vmax.f32 %v446_v56, 0.0  ;;  %v4543_v58 = vpop.f32.mrb[16].mxu0 }
  0xf8   :  { %v461_v60 = vadd.f32 %v4543_v58, %v5694_v7  ;;  %v455_v61 = vpop.f32.mrb[17].mxu0 }
  0xf9   :  { %v456_v62 = vadd.f32 %v5694_v7, %v455_v61  ;;  %4638 = vmatprep.mubr.msk.f32.mxu1 %vm767_vm2, %v708_v57 }
  0xfa   :  { %4639 = vmatmul.mubr.msk.f32.gmra.mrb[14].mxu1 %vm767_vm2, %v709_v59  ;;  %v711_v1 = vmax.f32 %v461_v60, 0.0 }
  0xfb   :  { %v710_v63 = vmax.f32 %v456_v62, 0.0  ;;  %v4546_v0 = vpop.f32.mrb[18].mxu0 }
  0xfc   :  { %v471_v2 = vadd.f32 %v4546_v0, %v5694_v7  ;;  %v465_v3 = vpop.f32.mrb[19].mxu0 }
  0xfd   :  { %v466_v4 = vadd.f32 %v5694_v7, %v465_v3  ;;  %4641 = vmatprep.mubr.msk.f32.mxu1 %vm767_vm2, %v710_v63 }
  0xfe   :  { %4642 = vmatmul.mubr.msk.f32.gmra.mrb[16].mxu1 %vm767_vm2, %v711_v1  ;;  %v713_v8 = vmax.f32 %v471_v2, 0.0 }
  0xff   :  { %v712_v5 = vmax.f32 %v466_v4, 0.0  ;;  %v4549_v6 = vpop.f32.mrb[20].mxu0 }
 0x100   :  { %v481_v9 = vadd.f32 %v4549_v6, %v5694_v7  ;;  %v475_v10 = vpop.f32.mrb[21].mxu0 }
 0x101   :  { %v476_v11 = vadd.f32 %v5694_v7, %v475_v10  ;;  %4644 = vmatprep.mubr.msk.f32.mxu1 %vm767_vm2, %v712_v5 }
 0x102   :  { %4645 = vmatmul.mubr.msk.f32.gmra.mrb[18].mxu1 %vm767_vm2, %v713_v8  ;;  %v715_v14 = vmax.f32 %v481_v9, 0.0 }
 0x103   :  { %v714_v12 = vmax.f32 %v476_v11, 0.0  ;;  %v4552_v13 = vpop.f32.mrb[22].mxu0 }
 0x104   :  { %v491_v15 = vadd.f32 %v4552_v13, %v5694_v7  ;;  %v485_v16 = vpop.f32.mrb[23].mxu0 }
 0x105   :  { %v486_v17 = vadd.f32 %v5694_v7, %v485_v16  ;;  %4647 = vmatprep.mubr.msk.f32.mxu1 %vm767_vm2, %v714_v12 }
 0x106   :  { %4648 = vmatmul.mubr.msk.f32.gmra.mrb[20].mxu1 %vm767_vm2, %v715_v14  ;;  %v717_v20 = vmax.f32 %v491_v15, 0.0 }
 0x107   :  { %v716_v18 = vmax.f32 %v486_v17, 0.0  ;;  %v4555_v19 = vpop.f32.mrb[24].mxu0 }
 0x108   :  { %v501_v21 = vadd.f32 %v4555_v19, %v5694_v7  ;;  %v495_v22 = vpop.f32.mrb[25].mxu0 }
 0x109   :  { %v496_v23 = vadd.f32 %v5694_v7, %v495_v22  ;;  %4650 = vmatprep.mubr.msk.f32.mxu1 %vm767_vm2, %v716_v18 }
 0x10a   :  { %4651 = vmatmul.mubr.msk.f32.gmra.mrb[22].mxu1 %vm767_vm2, %v717_v20  ;;  %v719_v26 = vmax.f32 %v501_v21, 0.0 }
 0x10b   :  { %v718_v24 = vmax.f32 %v496_v23, 0.0  ;;  %v4558_v25 = vpop.f32.mrb[26].mxu0 }
 0x10c   :  { %v511_v27 = vadd.f32 %v4558_v25, %v5694_v7  ;;  %v505_v28 = vpop.f32.mrb[27].mxu0 }
 0x10d   :  { %v506_v29 = vadd.f32 %v5694_v7, %v505_v28  ;;  %4653 = vmatprep.mubr.msk.f32.mxu1 %vm767_vm2, %v718_v24 }
 0x10e   :  { %4654 = vmatmul.mubr.msk.f32.gmra.mrb[24].mxu1 %vm767_vm2, %v719_v26  ;;  %v721_v32 = vmax.f32 %v511_v27, 0.0 }
 0x10f   :  { %v720_v30 = vmax.f32 %v506_v29, 0.0  ;;  %v4561_v31 = vpop.f32.mrb[28].mxu0 }
 0x110   :  { %v521_v33 = vadd.f32 %v4561_v31, %v5694_v7  ;;  %v515_v34 = vpop.f32.mrb[29].mxu0 }
 0x111   :  { %v516_v35 = vadd.f32 %v5694_v7, %v515_v34  ;;  %4656 = vmatprep.mubr.msk.f32.mxu1 %vm767_vm2, %v720_v30 }
 0x112   :  { %4657 = vmatmul.mubr.msk.f32.gmra.mrb[26].mxu1 %vm767_vm2, %v721_v32  ;;  %v723_v38 = vmax.f32 %v521_v33, 0.0 }
 0x113   :  { %v722_v36 = vmax.f32 %v516_v35, 0.0  ;;  %v4564_v37 = vpop.f32.mrb[30].mxu0 }
 0x114   :  { %v531_v39 = vadd.f32 %v4564_v37, %v5694_v7  ;;  %v525_v40 = vpop.f32.mrb[31].mxu0 }
 0x115   :  { %v526_v41 = vadd.f32 %v5694_v7, %v525_v40  ;;  %4659 = vmatprep.mubr.msk.f32.mxu1 %vm767_vm2, %v722_v36 }
 0x116   :  { %4660 = vmatmul.mubr.msk.f32.gmra.mrb[28].mxu1 %vm767_vm2, %v723_v38  ;;  %v725_v44 = vmax.f32 %v531_v39, 0.0 }
 0x117   :  { %v724_v42 = vmax.f32 %v526_v41, 0.0  ;;  %v4567_v43 = vpop.f32.mrb[32].mxu0 }
 0x118   :  { %v541_v45 = vadd.f32 %v4567_v43, %v5694_v7  ;;  %v535_v46 = vpop.f32.mrb[33].mxu0 }
 0x119   :  { %v536_v47 = vadd.f32 %v5694_v7, %v535_v46  ;;  %4662 = vmatprep.mubr.msk.f32.mxu1 %vm767_vm2, %v724_v42 }
 0x11a   :  { %4663 = vmatmul.mubr.msk.f32.gmra.mrb[30].mxu1 %vm767_vm2, %v725_v44  ;;  %v727_v50 = vmax.f32 %v541_v45, 0.0 }
 0x11b   :  { %v726_v48 = vmax.f32 %v536_v47, 0.0  ;;  %v4570_v49 = vpop.f32.mrb[34].mxu0 }
 0x11c   :  { %v551_v51 = vadd.f32 %v4570_v49, %v5694_v7  ;;  %v545_v52 = vpop.f32.mrb[35].mxu0 }
 0x11d   :  { %v546_v53 = vadd.f32 %v5694_v7, %v545_v52  ;;  %4665 = vmatprep.mubr.msk.f32.mxu1 %vm767_vm2, %v726_v48 }
 0x11e   :  { %4666 = vmatmul.mubr.msk.f32.gmra.mrb[32].mxu1 %vm767_vm2, %v727_v50  ;;  %v729_v56 = vmax.f32 %v551_v51, 0.0 }
 0x11f   :  { %v728_v54 = vmax.f32 %v546_v53, 0.0  ;;  %v4573_v55 = vpop.f32.mrb[36].mxu0 }
 0x120   :  { %v561_v57 = vadd.f32 %v4573_v55, %v5694_v7  ;;  %v555_v58 = vpop.f32.mrb[37].mxu0 }
 0x121   :  { %v556_v59 = vadd.f32 %v5694_v7, %v555_v58  ;;  %4668 = vmatprep.mubr.msk.f32.mxu1 %vm767_vm2, %v728_v54 }
 0x122   :  { %4669 = vmatmul.mubr.msk.f32.gmra.mrb[34].mxu1 %vm767_vm2, %v729_v56  ;;  %v731_v62 = vmax.f32 %v561_v57, 0.0 }
 0x123   :  { %v730_v60 = vmax.f32 %v556_v59, 0.0  ;;  %v4576_v61 = vpop.f32.mrb[38].mxu0 }
 0x124   :  { %v571_v63 = vadd.f32 %v4576_v61, %v5694_v7  ;;  %v565_v0 = vpop.f32.mrb[39].mxu0 }
 0x125   :  { %v566_v1 = vadd.f32 %v5694_v7, %v565_v0  ;;  %4671 = vmatprep.mubr.msk.f32.mxu1 %vm767_vm2, %v730_v60 }
 0x126   :  { %4672 = vmatmul.mubr.msk.f32.gmra.mrb[36].mxu1 %vm767_vm2, %v731_v62  ;;  %v733_v4 = vmax.f32 %v571_v63, 0.0 }
 0x127   :  { %v732_v2 = vmax.f32 %v566_v1, 0.0  ;;  %v4579_v3 = vpop.f32.mrb[40].mxu0 }
 0x128   :  { %v581_v5 = vadd.f32 %v4579_v3, %v5694_v7  ;;  %v575_v6 = vpop.f32.mrb[41].mxu0 }
 0x129   :  { %v576_v8 = vadd.f32 %v5694_v7, %v575_v6  ;;  %4674 = vmatprep.mubr.msk.f32.mxu1 %vm767_vm2, %v732_v2 }
 0x12a   :  { %4675 = vmatmul.mubr.msk.f32.gmra.mrb[38].mxu1 %vm767_vm2, %v733_v4  ;;  %v735_v11 = vmax.f32 %v581_v5, 0.0 }
 0x12b   :  { %v734_v9 = vmax.f32 %v576_v8, 0.0  ;;  %v4582_v10 = vpop.f32.mrb[42].mxu0 }
 0x12c   :  { %v591_v12 = vadd.f32 %v4582_v10, %v5694_v7  ;;  %v585_v13 = vpop.f32.mrb[43].mxu0 }
 0x12d   :  { %v586_v14 = vadd.f32 %v5694_v7, %v585_v13  ;;  %4677 = vmatprep.mubr.msk.f32.mxu1 %vm767_vm2, %v734_v9 }
 0x12e   :  { %4678 = vmatmul.mubr.msk.f32.gmra.mrb[40].mxu1 %vm767_vm2, %v735_v11  ;;  %v737_v17 = vmax.f32 %v591_v12, 0.0 }
 0x12f   :  { %v736_v15 = vmax.f32 %v586_v14, 0.0  ;;  %v4585_v16 = vpop.f32.mrb[44].mxu0  ;;  %v2638_v14 = vld [vmem:[%s6696_s7] sm:$0xff] }
 0x130   :  { %v601_v18 = vadd.f32 %v4585_v16, %v5694_v7  ;;  %v595_v19 = vpop.f32.mrb[45].mxu0 }
 0x131   :  { %v596_v20 = vadd.f32 %v5694_v7, %v595_v19  ;;  %4680 = vmatprep.mubr.msk.f32.mxu1 %vm767_vm2, %v736_v15  ;;  %v2639_v15 = vld [vmem:[%s6696_s7 + $0x8] sm:$0xff] }
 0x132   :  { %4681 = vmatmul.mubr.msk.f32.gmra.mrb[42].mxu1 %vm767_vm2, %v737_v17  ;;  %v739_v23 = vmax.f32 %v601_v18, 0.0  ;;  %v4968_v16 = vpack.c.bf16 %v2639_v15, %v2638_v14 }
 0x133   :  { %v738_v21 = vmax.f32 %v596_v20, 0.0  ;;  %v4588_v22 = vpop.f32.mrb[46].mxu0 }
 0x134   :  { %v611_v24 = vadd.f32 %v4588_v22, %v5694_v7  ;;  %v605_v25 = vpop.f32.mrb[47].mxu0  ;;  %4969 = vmatprep.subr.bf16.mxu1 %v4968_v16  ;;  %v2641_v22 = vld [vmem:[%s6696_s7 + $0x18] sm:$0xff] }
 0x135   :  { %v606_v26 = vadd.f32 %v5694_v7, %v605_v25  ;;  %4683 = vmatprep.mubr.msk.f32.mxu1 %vm767_vm2, %v738_v21  ;;  %4971 = vmatpush3.bf16.msra.mxu1 %v4968_v16  ;;  %v2640_v21 = vld [vmem:[%s6696_s7 + $0x10] sm:$0xff] }
 0x136   :  { %4684 = vmatmul.mubr.msk.f32.gmra.mrb[44].mxu1 %vm767_vm2, %v739_v23  ;;  %v741_v29 = vmax.f32 %v611_v24, 0.0  ;;  %v4972_v25 = vpack.c.bf16 %v2641_v22, %v2640_v21 }
 0x137   :  { %v740_v27 = vmax.f32 %v606_v26, 0.0  ;;  %v4591_v28 = vpop.f32.mrb[48].mxu0 }
 0x138   :  { %v621_v30 = vadd.f32 %v4591_v28, %v5694_v7  ;;  %v615_v31 = vpop.f32.mrb[49].mxu0  ;;  %4973 = vmatprep.subr.bf16.mxu1 %v4972_v25 }
 0x139   :  { %v616_v32 = vadd.f32 %v5694_v7, %v615_v31  ;;  %4686 = vmatprep.mubr.msk.f32.mxu1 %vm767_vm2, %v740_v27  ;;  %4975 = vmatpush3.bf16.msra.mxu1 %v4972_v25 }
 0x13a   :  { %4687 = vmatmul.mubr.msk.f32.gmra.mrb[46].mxu1 %vm767_vm2, %v741_v29  ;;  %v743_v35 = vmax.f32 %v621_v30, 0.0 }
 0x13b   :  { %v742_v33 = vmax.f32 %v616_v32, 0.0  ;;  %v4594_v34 = vpop.f32.mrb[50].mxu0 }
 0x13c   :  { %v631_v36 = vadd.f32 %v4594_v34, %v5694_v7  ;;  %v625_v37 = vpop.f32.mrb[51].mxu0 }
 0x13d   :  { %v626_v38 = vadd.f32 %v5694_v7, %v625_v37  ;;  %4689 = vmatprep.mubr.msk.f32.mxu1 %vm767_vm2, %v742_v33 }
 0x13e   :  { %4690 = vmatmul.mubr.msk.f32.gmra.mrb[48].mxu1 %vm767_vm2, %v743_v35  ;;  %v745_v41 = vmax.f32 %v631_v36, 0.0 }
 0x13f   :  { %v744_v39 = vmax.f32 %v626_v38, 0.0  ;;  %v4597_v40 = vpop.f32.mrb[52].mxu0 }
 0x140   :  { %v641_v42 = vadd.f32 %v4597_v40, %v5694_v7  ;;  %v635_v43 = vpop.f32.mrb[53].mxu0 }
 0x141   :  { %v636_v44 = vadd.f32 %v5694_v7, %v635_v43  ;;  %4692 = vmatprep.mubr.msk.f32.mxu1 %vm767_vm2, %v744_v39 }
 0x142   :  { %4693 = vmatmul.mubr.msk.f32.gmra.mrb[50].mxu1 %vm767_vm2, %v745_v41  ;;  %v747_v47 = vmax.f32 %v641_v42, 0.0 }
 0x143   :  { %v746_v45 = vmax.f32 %v636_v44, 0.0  ;;  %v4600_v46 = vpop.f32.mrb[54].mxu0 }
 0x144   :  { %v651_v48 = vadd.f32 %v4600_v46, %v5694_v7  ;;  %v645_v49 = vpop.f32.mrb[55].mxu0 }
 0x145   :  { %v646_v50 = vadd.f32 %v5694_v7, %v645_v49  ;;  %4695 = vmatprep.mubr.msk.f32.mxu1 %vm767_vm2, %v746_v45 }
 0x146   :  { %4696 = vmatmul.mubr.msk.f32.gmra.mrb[52].mxu1 %vm767_vm2, %v747_v47  ;;  %v749_v53 = vmax.f32 %v651_v48, 0.0 }
 0x147   :  { %v748_v51 = vmax.f32 %v646_v50, 0.0  ;;  %v4603_v52 = vpop.f32.mrb[56].mxu0 }
 0x148   :  { %v661_v54 = vadd.f32 %v4603_v52, %v5694_v7  ;;  %v655_v55 = vpop.f32.mrb[57].mxu0 }
 0x149   :  { %v656_v56 = vadd.f32 %v5694_v7, %v655_v55  ;;  %4698 = vmatprep.mubr.msk.f32.mxu1 %vm767_vm2, %v748_v51 }
 0x14a   :  { %4699 = vmatmul.mubr.msk.f32.gmra.mrb[54].mxu1 %vm767_vm2, %v749_v53  ;;  %v751_v59 = vmax.f32 %v661_v54, 0.0 }
 0x14b   :  { %v750_v57 = vmax.f32 %v656_v56, 0.0  ;;  %v4606_v58 = vpop.f32.mrb[58].mxu0 }
 0x14c   :  { %v671_v60 = vadd.f32 %v4606_v58, %v5694_v7  ;;  %v665_v61 = vpop.f32.mrb[59].mxu0 }
 0x14d   :  { %v666_v62 = vadd.f32 %v5694_v7, %v665_v61  ;;  %4701 = vmatprep.mubr.msk.f32.mxu1 %vm767_vm2, %v750_v57 }
 0x14e   :  { %4702 = vmatmul.mubr.msk.f32.gmra.mrb[56].mxu1 %vm767_vm2, %v751_v59  ;;  %v753_v1 = vmax.f32 %v671_v60, 0.0 }
 0x14f   :  { %v752_v63 = vmax.f32 %v666_v62, 0.0  ;;  %v4609_v0 = vpop.f32.mrb[60].mxu0 }
 0x150   :  { %v681_v2 = vadd.f32 %v4609_v0, %v5694_v7  ;;  %v675_v3 = vpop.f32.mrb[61].mxu0 }
 0x151   :  { %v676_v4 = vadd.f32 %v5694_v7, %v675_v3  ;;  %4704 = vmatprep.mubr.msk.f32.mxu1 %vm767_vm2, %v752_v63 }
 0x152   :  { %4705 = vmatmul.mubr.msk.f32.gmra.mrb[58].mxu1 %vm767_vm2, %v753_v1  ;;  %v755_v8 = vmax.f32 %v681_v2, 0.0 }
 0x153   :  { %v754_v5 = vmax.f32 %v676_v4, 0.0  ;;  %v4612_v6 = vpop.f32.mrb[62].mxu0 }
 0x154   :  { %v691_v9 = vadd.f32 %v4612_v6, %v5694_v7  ;;  %v685_v10 = vpop.f32.mrb[63].mxu0 }
 0x155   :  { %v686_v11 = vadd.f32 %v5694_v7, %v685_v10  ;;  %4707 = vmatprep.mubr.msk.f32.mxu1 %vm767_vm2, %v754_v5  ;;  %v5839_v7 = vld [vmem:[%s6693_s4] ss:$0 sm:$0xff] }
 0x156   :  { %4708 = vmatmul.mubr.msk.f32.gmra.mrb[60].mxu1 %vm767_vm2, %v755_v8  ;;  %v757_v13 = vmax.f32 %v691_v9, 0.0 }
 0x157   :  { %v756_v12 = vmax.f32 %v686_v11, 0.0 }
 0x159   :  { %4710 = vmatprep.mubr.msk.f32.mxu1 %vm767_vm2, %v756_v12 }
 0x15a   :  { %4711 = vmatmul.mubr.msk.f32.gmra.mrb[62].mxu1 %vm767_vm2, %v757_v13 }
 0x1b1   :  { %v4619_v17 = vpop.f32.mrb[0].mxu1 }
 0x1b2   :  { %v1032_v18 = vadd.f32 %v4619_v17, %v5839_v7  ;;  %v1026_v19 = vpop.f32.mrb[1].mxu1 }
 0x1b3   :  { %v1027_v20 = vadd.f32 %v5839_v7, %v1026_v19 }
 0x1b4   :  { %v1346_v26 = vmax.f32 %v1032_v18, 0.0 }
 0x1b5   :  { %v1345_v23 = vmax.f32 %v1027_v20, 0.0  ;;  %v4622_v24 = vpop.f32.mrb[2].mxu1 }
 0x1b6   :  { %v1042_v27 = vadd.f32 %v4622_v24, %v5839_v7  ;;  %v1036_v28 = vpop.f32.mrb[3].mxu1 }
 0x1b7   :  { %v1037_v29 = vadd.f32 %v5839_v7, %v1036_v28  ;;  %4721 = vmatprep.mubr.msk.f32.mxu0 %vm1420_vm3, %v1345_v23 }
 0x1b8   :  { %4722 = vmatmul.mubr.msk.f32.vlgmr.msra.gmra.mrb[64].mxu0 %vm1420_vm3, %v1346_v26  ;;  %v1348_v32 = vmax.f32 %v1042_v27, 0.0 }
 0x1b9   :  { %v1347_v30 = vmax.f32 %v1037_v29, 0.0  ;;  %v4625_v31 = vpop.f32.mrb[4].mxu1 }
 0x1ba   :  { %v1052_v33 = vadd.f32 %v4625_v31, %v5839_v7  ;;  %v1046_v34 = vpop.f32.mrb[5].mxu1 }
 0x1bb   :  { %v1047_v35 = vadd.f32 %v5839_v7, %v1046_v34  ;;  %4724 = vmatprep.mubr.msk.f32.mxu0 %vm1420_vm3, %v1347_v30 }
 0x1bc   :  { %4725 = vmatmul.mubr.msk.f32.gmra.mrb[66].mxu0 %vm1420_vm3, %v1348_v32  ;;  %v1350_v38 = vmax.f32 %v1052_v33, 0.0 }
 0x1bd   :  { %v1349_v36 = vmax.f32 %v1047_v35, 0.0  ;;  %v4628_v37 = vpop.f32.mrb[6].mxu1 }
 0x1be   :  { %v1062_v39 = vadd.f32 %v4628_v37, %v5839_v7  ;;  %v1056_v40 = vpop.f32.mrb[7].mxu1 }
 0x1bf   :  { %v1057_v41 = vadd.f32 %v5839_v7, %v1056_v40  ;;  %4727 = vmatprep.mubr.msk.f32.mxu0 %vm1420_vm3, %v1349_v36 }
 0x1c0   :  { %4728 = vmatmul.mubr.msk.f32.gmra.mrb[68].mxu0 %vm1420_vm3, %v1350_v38  ;;  %v1352_v44 = vmax.f32 %v1062_v39, 0.0 }
 0x1c1   :  { %v1351_v42 = vmax.f32 %v1057_v41, 0.0  ;;  %v4631_v43 = vpop.f32.mrb[8].mxu1 }
 0x1c2   :  { %v1072_v45 = vadd.f32 %v4631_v43, %v5839_v7  ;;  %v1066_v46 = vpop.f32.mrb[9].mxu1 }
 0x1c3   :  { %v1067_v47 = vadd.f32 %v5839_v7, %v1066_v46  ;;  %4730 = vmatprep.mubr.msk.f32.mxu0 %vm1420_vm3, %v1351_v42 }
 0x1c4   :  { %4731 = vmatmul.mubr.msk.f32.gmra.mrb[70].mxu0 %vm1420_vm3, %v1352_v44  ;;  %v1354_v50 = vmax.f32 %v1072_v45, 0.0 }
 0x1c5   :  { %v1353_v48 = vmax.f32 %v1067_v47, 0.0  ;;  %v4634_v49 = vpop.f32.mrb[10].mxu1 }
 0x1c6   :  { %v1082_v51 = vadd.f32 %v4634_v49, %v5839_v7  ;;  %v1076_v52 = vpop.f32.mrb[11].mxu1 }
 0x1c7   :  { %v1077_v53 = vadd.f32 %v5839_v7, %v1076_v52  ;;  %4733 = vmatprep.mubr.msk.f32.mxu0 %vm1420_vm3, %v1353_v48 }
 0x1c8   :  { %4734 = vmatmul.mubr.msk.f32.gmra.mrb[72].mxu0 %vm1420_vm3, %v1354_v50  ;;  %v1356_v56 = vmax.f32 %v1082_v51, 0.0 }
 0x1c9   :  { %v1355_v54 = vmax.f32 %v1077_v53, 0.0  ;;  %v4637_v55 = vpop.f32.mrb[12].mxu1 }
 0x1ca   :  { %v1092_v57 = vadd.f32 %v4637_v55, %v5839_v7  ;;  %v1086_v58 = vpop.f32.mrb[13].mxu1 }
 0x1cb   :  { %v1087_v59 = vadd.f32 %v5839_v7, %v1086_v58  ;;  %4736 = vmatprep.mubr.msk.f32.mxu0 %vm1420_vm3, %v1355_v54 }
 0x1cc   :  { %4737 = vmatmul.mubr.msk.f32.gmra.mrb[74].mxu0 %vm1420_vm3, %v1356_v56  ;;  %v1358_v62 = vmax.f32 %v1092_v57, 0.0 }
 0x1cd   :  { %v1357_v60 = vmax.f32 %v1087_v59, 0.0  ;;  %v4640_v61 = vpop.f32.mrb[14].mxu1 }
 0x1ce   :  { %v1102_v63 = vadd.f32 %v4640_v61, %v5839_v7  ;;  %v1096_v0 = vpop.f32.mrb[15].mxu1 }
 0x1cf   :  { %v1097_v1 = vadd.f32 %v5839_v7, %v1096_v0  ;;  %4739 = vmatprep.mubr.msk.f32.mxu0 %vm1420_vm3, %v1357_v60 }
 0x1d0   :  { %4740 = vmatmul.mubr.msk.f32.gmra.mrb[76].mxu0 %vm1420_vm3, %v1358_v62  ;;  %v1360_v4 = vmax.f32 %v1102_v63, 0.0 }
 0x1d1   :  { %v1359_v2 = vmax.f32 %v1097_v1, 0.0  ;;  %v4643_v3 = vpop.f32.mrb[16].mxu1 }
 0x1d2   :  { %v1112_v5 = vadd.f32 %v4643_v3, %v5839_v7  ;;  %v1106_v6 = vpop.f32.mrb[17].mxu1 }
 0x1d3   :  { %v1107_v8 = vadd.f32 %v5839_v7, %v1106_v6  ;;  %4742 = vmatprep.mubr.msk.f32.mxu0 %vm1420_vm3, %v1359_v2 }
 0x1d4   :  { %4743 = vmatmul.mubr.msk.f32.gmra.mrb[78].mxu0 %vm1420_vm3, %v1360_v4  ;;  %v1362_v11 = vmax.f32 %v1112_v5, 0.0 }
 0x1d5   :  { %v1361_v9 = vmax.f32 %v1107_v8, 0.0  ;;  %v4646_v10 = vpop.f32.mrb[18].mxu1 }
 0x1d6   :  { %v1122_v12 = vadd.f32 %v4646_v10, %v5839_v7  ;;  %v1116_v13 = vpop.f32.mrb[19].mxu1 }
 0x1d7   :  { %v1117_v14 = vadd.f32 %v5839_v7, %v1116_v13  ;;  %4745 = vmatprep.mubr.msk.f32.mxu0 %vm1420_vm3, %v1361_v9 }
 0x1d8   :  { %4746 = vmatmul.mubr.msk.f32.gmra.mrb[80].mxu0 %vm1420_vm3, %v1362_v11  ;;  %v1364_v17 = vmax.f32 %v1122_v12, 0.0 }
 0x1d9   :  { %v1363_v15 = vmax.f32 %v1117_v14, 0.0  ;;  %v4649_v16 = vpop.f32.mrb[20].mxu1 }
 0x1da   :  { %v1132_v18 = vadd.f32 %v4649_v16, %v5839_v7  ;;  %v1126_v19 = vpop.f32.mrb[21].mxu1 }
 0x1db   :  { %v1127_v20 = vadd.f32 %v5839_v7, %v1126_v19  ;;  %4748 = vmatprep.mubr.msk.f32.mxu0 %vm1420_vm3, %v1363_v15 }
 0x1dc   :  { %4749 = vmatmul.mubr.msk.f32.gmra.mrb[82].mxu0 %vm1420_vm3, %v1364_v17  ;;  %v1366_v23 = vmax.f32 %v1132_v18, 0.0 }
 0x1dd   :  { %v1365_v21 = vmax.f32 %v1127_v20, 0.0  ;;  %v4652_v22 = vpop.f32.mrb[22].mxu1 }
 0x1de   :  { %v1142_v24 = vadd.f32 %v4652_v22, %v5839_v7  ;;  %v1136_v25 = vpop.f32.mrb[23].mxu1 }
 0x1df   :  { %v1137_v26 = vadd.f32 %v5839_v7, %v1136_v25  ;;  %4751 = vmatprep.mubr.msk.f32.mxu0 %vm1420_vm3, %v1365_v21 }
 0x1e0   :  { %4752 = vmatmul.mubr.msk.f32.gmra.mrb[84].mxu0 %vm1420_vm3, %v1366_v23  ;;  %v1368_v29 = vmax.f32 %v1142_v24, 0.0 }
 0x1e1   :  { %v1367_v27 = vmax.f32 %v1137_v26, 0.0  ;;  %v4655_v28 = vpop.f32.mrb[24].mxu1 }
 0x1e2   :  { %v1152_v30 = vadd.f32 %v4655_v28, %v5839_v7  ;;  %v1146_v31 = vpop.f32.mrb[25].mxu1 }
 0x1e3   :  { %v1147_v32 = vadd.f32 %v5839_v7, %v1146_v31  ;;  %4754 = vmatprep.mubr.msk.f32.mxu0 %vm1420_vm3, %v1367_v27 }
 0x1e4   :  { %4755 = vmatmul.mubr.msk.f32.gmra.mrb[86].mxu0 %vm1420_vm3, %v1368_v29  ;;  %v1370_v35 = vmax.f32 %v1152_v30, 0.0 }
 0x1e5   :  { %v1369_v33 = vmax.f32 %v1147_v32, 0.0  ;;  %v4658_v34 = vpop.f32.mrb[26].mxu1 }
 0x1e6   :  { %v1162_v36 = vadd.f32 %v4658_v34, %v5839_v7  ;;  %v1156_v37 = vpop.f32.mrb[27].mxu1 }
 0x1e7   :  { %v1157_v38 = vadd.f32 %v5839_v7, %v1156_v37  ;;  %4757 = vmatprep.mubr.msk.f32.mxu0 %vm1420_vm3, %v1369_v33 }
 0x1e8   :  { %4758 = vmatmul.mubr.msk.f32.gmra.mrb[88].mxu0 %vm1420_vm3, %v1370_v35  ;;  %v1372_v41 = vmax.f32 %v1162_v36, 0.0 }
 0x1e9   :  { %v1371_v39 = vmax.f32 %v1157_v38, 0.0  ;;  %v4661_v40 = vpop.f32.mrb[28].mxu1 }
 0x1ea   :  { %v1172_v42 = vadd.f32 %v4661_v40, %v5839_v7  ;;  %v1166_v43 = vpop.f32.mrb[29].mxu1 }
 0x1eb   :  { %v1167_v44 = vadd.f32 %v5839_v7, %v1166_v43  ;;  %4760 = vmatprep.mubr.msk.f32.mxu0 %vm1420_vm3, %v1371_v39 }
 0x1ec   :  { %4761 = vmatmul.mubr.msk.f32.gmra.mrb[90].mxu0 %vm1420_vm3, %v1372_v41  ;;  %v1374_v47 = vmax.f32 %v1172_v42, 0.0 }
 0x1ed   :  { %v1373_v45 = vmax.f32 %v1167_v44, 0.0  ;;  %v4664_v46 = vpop.f32.mrb[30].mxu1 }
 0x1ee   :  { %v1182_v48 = vadd.f32 %v4664_v46, %v5839_v7  ;;  %v1176_v49 = vpop.f32.mrb[31].mxu1 }
 0x1ef   :  { %v1177_v50 = vadd.f32 %v5839_v7, %v1176_v49  ;;  %4763 = vmatprep.mubr.msk.f32.mxu0 %vm1420_vm3, %v1373_v45 }
 0x1f0   :  { %4764 = vmatmul.mubr.msk.f32.gmra.mrb[92].mxu0 %vm1420_vm3, %v1374_v47  ;;  %v1376_v53 = vmax.f32 %v1182_v48, 0.0 }
 0x1f1   :  { %v1375_v51 = vmax.f32 %v1177_v50, 0.0  ;;  %v4667_v52 = vpop.f32.mrb[32].mxu1 }
 0x1f2   :  { %v1192_v54 = vadd.f32 %v4667_v52, %v5839_v7  ;;  %v1186_v55 = vpop.f32.mrb[33].mxu1 }
 0x1f3   :  { %v1187_v56 = vadd.f32 %v5839_v7, %v1186_v55  ;;  %4766 = vmatprep.mubr.msk.f32.mxu0 %vm1420_vm3, %v1375_v51 }
 0x1f4   :  { %4767 = vmatmul.mubr.msk.f32.gmra.mrb[94].mxu0 %vm1420_vm3, %v1376_v53  ;;  %v1378_v59 = vmax.f32 %v1192_v54, 0.0 }
 0x1f5   :  { %v1377_v57 = vmax.f32 %v1187_v56, 0.0  ;;  %v4670_v58 = vpop.f32.mrb[34].mxu1 }
 0x1f6   :  { %v1202_v60 = vadd.f32 %v4670_v58, %v5839_v7  ;;  %v1196_v61 = vpop.f32.mrb[35].mxu1 }
 0x1f7   :  { %v1197_v62 = vadd.f32 %v5839_v7, %v1196_v61  ;;  %4769 = vmatprep.mubr.msk.f32.mxu0 %vm1420_vm3, %v1377_v57 }
 0x1f8   :  { %4770 = vmatmul.mubr.msk.f32.gmra.mrb[96].mxu0 %vm1420_vm3, %v1378_v59  ;;  %v1380_v1 = vmax.f32 %v1202_v60, 0.0 }
 0x1f9   :  { %v1379_v63 = vmax.f32 %v1197_v62, 0.0  ;;  %v4673_v0 = vpop.f32.mrb[36].mxu1 }
 0x1fa   :  { %v1212_v2 = vadd.f32 %v4673_v0, %v5839_v7  ;;  %v1206_v3 = vpop.f32.mrb[37].mxu1 }
 0x1fb   :  { %v1207_v4 = vadd.f32 %v5839_v7, %v1206_v3  ;;  %4772 = vmatprep.mubr.msk.f32.mxu0 %vm1420_vm3, %v1379_v63 }
 0x1fc   :  { %4773 = vmatmul.mubr.msk.f32.gmra.mrb[98].mxu0 %vm1420_vm3, %v1380_v1  ;;  %v1382_v8 = vmax.f32 %v1212_v2, 0.0 }
 0x1fd   :  { %v1381_v5 = vmax.f32 %v1207_v4, 0.0  ;;  %v4676_v6 = vpop.f32.mrb[38].mxu1 }
 0x1fe   :  { %v1222_v9 = vadd.f32 %v4676_v6, %v5839_v7  ;;  %v1216_v10 = vpop.f32.mrb[39].mxu1 }
 0x1ff   :  { %v1217_v11 = vadd.f32 %v5839_v7, %v1216_v10  ;;  %4775 = vmatprep.mubr.msk.f32.mxu0 %vm1420_vm3, %v1381_v5 }
 0x200   :  { %4776 = vmatmul.mubr.msk.f32.gmra.mrb[100].mxu0 %vm1420_vm3, %v1382_v8  ;;  %v1384_v14 = vmax.f32 %v1222_v9, 0.0 }
 0x201   :  { %v1383_v12 = vmax.f32 %v1217_v11, 0.0  ;;  %v4679_v13 = vpop.f32.mrb[40].mxu1 }
 0x202   :  { %v1232_v15 = vadd.f32 %v4679_v13, %v5839_v7  ;;  %v1226_v16 = vpop.f32.mrb[41].mxu1 }
 0x203   :  { %v1227_v17 = vadd.f32 %v5839_v7, %v1226_v16  ;;  %4778 = vmatprep.mubr.msk.f32.mxu0 %vm1420_vm3, %v1383_v12 }
 0x204   :  { %4779 = vmatmul.mubr.msk.f32.gmra.mrb[102].mxu0 %vm1420_vm3, %v1384_v14  ;;  %v1386_v20 = vmax.f32 %v1232_v15, 0.0 }
 0x205   :  { %v1385_v18 = vmax.f32 %v1227_v17, 0.0  ;;  %v4682_v19 = vpop.f32.mrb[42].mxu1 }
 0x206   :  { %v1242_v21 = vadd.f32 %v4682_v19, %v5839_v7  ;;  %v1236_v22 = vpop.f32.mrb[43].mxu1 }
 0x207   :  { %v1237_v23 = vadd.f32 %v5839_v7, %v1236_v22  ;;  %4781 = vmatprep.mubr.msk.f32.mxu0 %vm1420_vm3, %v1385_v18 }
 0x208   :  { %4782 = vmatmul.mubr.msk.f32.gmra.mrb[104].mxu0 %vm1420_vm3, %v1386_v20  ;;  %v1388_v26 = vmax.f32 %v1242_v21, 0.0 }
 0x209   :  { %v1387_v24 = vmax.f32 %v1237_v23, 0.0  ;;  %v4685_v25 = vpop.f32.mrb[44].mxu1  ;;  %v5978_v23 = vld [vmem:[%s6695_s6] ss:$0 sm:$0xff] }
 0x20a   :  { %v1252_v27 = vadd.f32 %v4685_v25, %v5839_v7  ;;  %v1246_v28 = vpop.f32.mrb[45].mxu1 }
 0x20b   :  { %v1247_v29 = vadd.f32 %v5839_v7, %v1246_v28  ;;  %4784 = vmatprep.mubr.msk.f32.mxu0 %vm1420_vm3, %v1387_v24 }
 0x20c   :  { %4785 = vmatmul.mubr.msk.f32.gmra.mrb[106].mxu0 %vm1420_vm3, %v1388_v26  ;;  %v1390_v32 = vmax.f32 %v1252_v27, 0.0 }
 0x20d   :  { %v1389_v30 = vmax.f32 %v1247_v29, 0.0  ;;  %v4688_v31 = vpop.f32.mrb[46].mxu1 }
 0x20e   :  { %v1262_v33 = vadd.f32 %v4688_v31, %v5839_v7  ;;  %v1256_v34 = vpop.f32.mrb[47].mxu1 }
 0x20f   :  { %v1257_v35 = vadd.f32 %v5839_v7, %v1256_v34  ;;  %4787 = vmatprep.mubr.msk.f32.mxu0 %vm1420_vm3, %v1389_v30 }
 0x210   :  { %4788 = vmatmul.mubr.msk.f32.gmra.mrb[108].mxu0 %vm1420_vm3, %v1390_v32  ;;  %v1392_v38 = vmax.f32 %v1262_v33, 0.0 }
 0x211   :  { %v1391_v36 = vmax.f32 %v1257_v35, 0.0  ;;  %v4691_v37 = vpop.f32.mrb[48].mxu1 }
 0x212   :  { %v1272_v39 = vadd.f32 %v4691_v37, %v5839_v7  ;;  %v1266_v40 = vpop.f32.mrb[49].mxu1 }
 0x213   :  { %v1267_v41 = vadd.f32 %v5839_v7, %v1266_v40  ;;  %4790 = vmatprep.mubr.msk.f32.mxu0 %vm1420_vm3, %v1391_v36 }
 0x214   :  { %4791 = vmatmul.mubr.msk.f32.gmra.mrb[110].mxu0 %vm1420_vm3, %v1392_v38  ;;  %v1394_v44 = vmax.f32 %v1272_v39, 0.0 }
 0x215   :  { %v1393_v42 = vmax.f32 %v1267_v41, 0.0  ;;  %v4694_v43 = vpop.f32.mrb[50].mxu1 }
 0x216   :  { %v1282_v45 = vadd.f32 %v4694_v43, %v5839_v7  ;;  %v1276_v46 = vpop.f32.mrb[51].mxu1 }
 0x217   :  { %v1277_v47 = vadd.f32 %v5839_v7, %v1276_v46  ;;  %4793 = vmatprep.mubr.msk.f32.mxu0 %vm1420_vm3, %v1393_v42 }
 0x218   :  { %4794 = vmatmul.mubr.msk.f32.gmra.mrb[112].mxu0 %vm1420_vm3, %v1394_v44  ;;  %v1396_v50 = vmax.f32 %v1282_v45, 0.0 }
 0x219   :  { %v1395_v48 = vmax.f32 %v1277_v47, 0.0  ;;  %v4697_v49 = vpop.f32.mrb[52].mxu1 }
 0x21a   :  { %v1292_v51 = vadd.f32 %v4697_v49, %v5839_v7  ;;  %v1286_v52 = vpop.f32.mrb[53].mxu1 }
 0x21b   :  { %v1287_v53 = vadd.f32 %v5839_v7, %v1286_v52  ;;  %4796 = vmatprep.mubr.msk.f32.mxu0 %vm1420_vm3, %v1395_v48 }
 0x21c   :  { %4797 = vmatmul.mubr.msk.f32.gmra.mrb[114].mxu0 %vm1420_vm3, %v1396_v50  ;;  %v1398_v56 = vmax.f32 %v1292_v51, 0.0 }
 0x21d   :  { %v1397_v54 = vmax.f32 %v1287_v53, 0.0  ;;  %v4700_v55 = vpop.f32.mrb[54].mxu1 }
 0x21e   :  { %v1302_v57 = vadd.f32 %v4700_v55, %v5839_v7  ;;  %v1296_v58 = vpop.f32.mrb[55].mxu1 }
 0x21f   :  { %v1297_v59 = vadd.f32 %v5839_v7, %v1296_v58  ;;  %4799 = vmatprep.mubr.msk.f32.mxu0 %vm1420_vm3, %v1397_v54 }
 0x220   :  { %4800 = vmatmul.mubr.msk.f32.gmra.mrb[116].mxu0 %vm1420_vm3, %v1398_v56  ;;  %v1400_v62 = vmax.f32 %v1302_v57, 0.0 }
 0x221   :  { %v1399_v60 = vmax.f32 %v1297_v59, 0.0  ;;  %v4703_v61 = vpop.f32.mrb[56].mxu1 }
 0x222   :  { %v1312_v63 = vadd.f32 %v4703_v61, %v5839_v7  ;;  %v1306_v0 = vpop.f32.mrb[57].mxu1 }
 0x223   :  { %v1307_v1 = vadd.f32 %v5839_v7, %v1306_v0  ;;  %4802 = vmatprep.mubr.msk.f32.mxu0 %vm1420_vm3, %v1399_v60 }
 0x224   :  { %4803 = vmatmul.mubr.msk.f32.gmra.mrb[118].mxu0 %vm1420_vm3, %v1400_v62  ;;  %v1402_v4 = vmax.f32 %v1312_v63, 0.0 }
 0x225   :  { %v1401_v2 = vmax.f32 %v1307_v1, 0.0  ;;  %v4706_v3 = vpop.f32.mrb[58].mxu1 }
 0x226   :  { %v1322_v5 = vadd.f32 %v4706_v3, %v5839_v7  ;;  %v1316_v6 = vpop.f32.mrb[59].mxu1 }
 0x227   :  { %v1317_v8 = vadd.f32 %v5839_v7, %v1316_v6  ;;  %4805 = vmatprep.mubr.msk.f32.mxu0 %vm1420_vm3, %v1401_v2 }
 0x228   :  { %4806 = vmatmul.mubr.msk.f32.gmra.mrb[120].mxu0 %vm1420_vm3, %v1402_v4  ;;  %v1404_v11 = vmax.f32 %v1322_v5, 0.0 }
 0x229   :  { %v1403_v9 = vmax.f32 %v1317_v8, 0.0  ;;  %v4709_v10 = vpop.f32.mrb[60].mxu1 }
 0x22a   :  { %v1332_v12 = vadd.f32 %v4709_v10, %v5839_v7  ;;  %v1326_v13 = vpop.f32.mrb[61].mxu1 }
 0x22b   :  { %v1327_v14 = vadd.f32 %v5839_v7, %v1326_v13  ;;  %4808 = vmatprep.mubr.msk.f32.mxu0 %vm1420_vm3, %v1403_v9 }
 0x22c   :  { %4809 = vmatmul.mubr.msk.f32.gmra.mrb[122].mxu0 %vm1420_vm3, %v1404_v11  ;;  %v1406_v17 = vmax.f32 %v1332_v12, 0.0 }
 0x22d   :  { %v1405_v15 = vmax.f32 %v1327_v14, 0.0  ;;  %v4712_v16 = vpop.f32.mrb[62].mxu1 }
 0x22e   :  { %v1342_v18 = vadd.f32 %v4712_v16, %v5839_v7  ;;  %v1336_v19 = vpop.f32.mrb[63].mxu1 }
 0x22f   :  { %v1337_v20 = vadd.f32 %v5839_v7, %v1336_v19  ;;  %4811 = vmatprep.mubr.msk.f32.mxu0 %vm1420_vm3, %v1405_v15 }
 0x230   :  { %4812 = vmatmul.mubr.msk.f32.gmra.mrb[124].mxu0 %vm1420_vm3, %v1406_v17  ;;  %v1408_v22 = vmax.f32 %v1342_v18, 0.0 }
 0x231   :  { %v1407_v21 = vmax.f32 %v1337_v20, 0.0 }
 0x233   :  { %4814 = vmatprep.mubr.msk.f32.mxu0 %vm1420_vm3, %v1407_v21 }
 0x234   :  { %4815 = vmatmul.mubr.msk.f32.gmra.mrb[126].mxu0 %vm1420_vm3, %v1408_v22 }
 0x28b   :  { %v4723_v24 = vpop.f32.mrb[64].mxu0 }
 0x28c   :  { %v1685_v25 = vadd.f32 %v4723_v24, %v5978_v23  ;;  %v1679_v26 = vpop.f32.mrb[65].mxu0 }
 0x28d   :  { %v1680_v7 = vadd.f32 %v5978_v23, %v1679_v26 }
 0x28e   :  { %v4101_v27 = vmul.f32 -1.442695, %v1685_v25 }
 0x28f   :  { %v4100_v28 = vmul.f32 -1.442695, %v1680_v7  ;;  %v4726_v29 = vpop.f32.mrb[66].mxu0 }
 0x290   :  { %5010 = vpow2.f32 %v4101_v27  ;;  %v1695_v30 = vadd.f32 %v4726_v29, %v5978_v23  ;;  %v1689_v31 = vpop.f32.mrb[67].mxu0 }
 0x291   :  { %5012 = vpow2.f32 %v4100_v28  ;;  %v1690_v32 = vadd.f32 %v5978_v23, %v1689_v31 }
 0x292   :  { %v4103_v33 = vmul.f32 -1.442695, %v1695_v30 }
 0x293   :  { %v4102_v34 = vmul.f32 -1.442695, %v1690_v32  ;;  %v4729_v35 = vpop.f32.mrb[68].mxu0 }
 0x294   :  { %5014 = vpow2.f32 %v4103_v33  ;;  %v1705_v36 = vadd.f32 %v4729_v35, %v5978_v23  ;;  %v1699_v37 = vpop.f32.mrb[69].mxu0 }
 0x295   :  { %5016 = vpow2.f32 %v4102_v34  ;;  %v1700_v38 = vadd.f32 %v5978_v23, %v1699_v37 }
 0x296   :  { %v4105_v39 = vmul.f32 -1.442695, %v1705_v36 }
 0x297   :  { %v4104_v40 = vmul.f32 -1.442695, %v1700_v38  ;;  %v4732_v41 = vpop.f32.mrb[70].mxu0 }
 0x298   :  { %5018 = vpow2.f32 %v4105_v39  ;;  %v1715_v42 = vadd.f32 %v4732_v41, %v5978_v23  ;;  %v1709_v43 = vpop.f32.mrb[71].mxu0 }
 0x299   :  { %5020 = vpow2.f32 %v4104_v40  ;;  %v1710_v44 = vadd.f32 %v5978_v23, %v1709_v43 }
 0x29a   :  { %v5011_v45 = vpop.eup %5010  ;;  %v4107_v46 = vmul.f32 -1.442695, %v1715_v42 }
 0x29b   :  { %v5013_v47 = vpop.eup %5012  ;;  %v2191_v48 = vadd.f32 1.0, %v5011_v45  ;;  %v4106_v49 = vmul.f32 -1.442695, %v1710_v44  ;;  %v4735_v50 = vpop.f32.mrb[72].mxu0 }
 0x29c   :  { %v2190_v51 = vadd.f32 1.0, %v5013_v47  ;;  %5022 = vpow2.f32 %v4107_v46  ;;  %v1725_v52 = vadd.f32 %v4735_v50, %v5978_v23  ;;  %v1719_v53 = vpop.f32.mrb[73].mxu0 }
 0x29d   :  { %5024 = vrcp.f32 %v2191_v48  ;;  %v1720_v54 = vadd.f32 %v5978_v23, %v1719_v53 }
 0x29e   :  { %v5015_v55 = vpop.eup %5014  ;;  %5026 = vrcp.f32 %v2190_v51  ;;  %v4109_v56 = vmul.f32 -1.442695, %v1725_v52 }
 0x29f   :  { %v5017_v57 = vpop.eup %5016  ;;  %v2193_v58 = vadd.f32 1.0, %v5015_v55  ;;  %5028 = vpow2.f32 %v4106_v49  ;;  %v4108_v59 = vmul.f32 -1.442695, %v1720_v54  ;;  %v4738_v60 = vpop.f32.mrb[74].mxu0 }
 0x2a0   :  { %v2192_v61 = vadd.f32 1.0, %v5017_v57  ;;  %5030 = vpow2.f32 %v4109_v56  ;;  %v1735_v62 = vadd.f32 %v4738_v60, %v5978_v23  ;;  %v1729_v63 = vpop.f32.mrb[75].mxu0 }
 0x2a1   :  { %5032 = vrcp.f32 %v2193_v58  ;;  %v1730_v0 = vadd.f32 %v5978_v23, %v1729_v63 }
 0x2a2   :  { %v5019_v1 = vpop.eup %5018  ;;  %5034 = vrcp.f32 %v2192_v61  ;;  %v4111_v2 = vmul.f32 -1.442695, %v1735_v62 }
 0x2a3   :  { %v5021_v3 = vpop.eup %5020  ;;  %v2195_v4 = vadd.f32 1.0, %v5019_v1  ;;  %5036 = vpow2.f32 %v4108_v59  ;;  %v4110_v5 = vmul.f32 -1.442695, %v1730_v0  ;;  %v4741_v6 = vpop.f32.mrb[76].mxu0 }
 0x2a4   :  { %v2194_v8 = vadd.f32 1.0, %v5021_v3  ;;  %5038 = vpow2.f32 %v4111_v2  ;;  %v1745_v9 = vadd.f32 %v4741_v6, %v5978_v23  ;;  %v1739_v10 = vpop.f32.mrb[77].mxu0 }
 0x2a5   :  { %5040 = vrcp.f32 %v2195_v4  ;;  %v1740_v11 = vadd.f32 %v5978_v23, %v1739_v10 }
 0x2a6   :  { %v5023_v12 = vpop.eup %5022  ;;  %5042 = vrcp.f32 %v2194_v8  ;;  %v4113_v13 = vmul.f32 -1.442695, %v1745_v9 }
 0x2a7   :  { %v5025_v14 = vpop.eup %5024  ;;  %v2197_v15 = vadd.f32 1.0, %v5023_v12  ;;  %5044 = vpow2.f32 %v4110_v5  ;;  %v4112_v16 = vmul.f32 -1.442695, %v1740_v11  ;;  %v4744_v17 = vpop.f32.mrb[78].mxu0 }
 0x2a8   :  { %v5027_v18 = vpop.eup %5026  ;;  %5046 = vpow2.f32 %v4113_v13  ;;  %v1755_v19 = vadd.f32 %v4744_v17, %v5978_v23  ;;  %v1749_v20 = vpop.f32.mrb[79].mxu0  ;;  %v2383_v21 = vmul.f32 %v5025_v14, %v5025_v14 }
 0x2a9   :  { %v5029_v22 = vpop.eup %5028  ;;  %5048 = vrcp.f32 %v2197_v15  ;;  %v1750_v24 = vadd.f32 %v5978_v23, %v1749_v20  ;;  %4825 = vmatprep.mubr.msk.f32.mxu1 %vm1420_vm3, %v5027_v18  ;;  %v2382_v25 = vmul.f32 %v5027_v18, %v5027_v18 }
 0x2aa   :  { %v5031_v26 = vpop.eup %5030  ;;  %v2196_v7 = vadd.f32 1.0, %v5029_v22  ;;  %5050 = vpow2.f32 %v4112_v16  ;;  %v4115_v27 = vmul.f32 -1.442695, %v1755_v19  ;;  %4826 = vmatmul.mubr.msk.f32.vlgmr.msra.gmra.mrb[64].mxu1 %vm1420_vm3, %v5025_v14  ;;  %v2449_v28 = vsel %vm1420_vm3, %v2383_v21, 0.0 }
 0x2ab   :  { %v5033_v29 = vpop.eup %5032  ;;  %v2199_v30 = vadd.f32 1.0, %v5031_v26  ;;  %v4114_v31 = vmul.f32 -1.442695, %v1750_v24  ;;  %2450 = vadd.xlane.f32.xlu0 %v2449_v28  ;;  %v4747_v32 = vpop.f32.mrb[80].mxu0  ;;  %v2446_v39 = vsel %vm1420_vm3, %v2382_v25, 0.0 }
 0x2ac   :  { %v5035_v33 = vpop.eup %5034  ;;  %5052 = vrcp.f32 %v2196_v7  ;;  %v1765_v34 = vadd.f32 %v4747_v32, %v5978_v23  ;;  %v1759_v35 = vpop.f32.mrb[81].mxu0  ;;  %v2385_v36 = vmul.f32 %v5033_v29, %v5033_v29 }
 0x2ad   :  { %v5037_v37 = vpop.eup %5036  ;;  %5054 = vrcp.f32 %v2199_v30  ;;  %v1760_v38 = vadd.f32 %v5978_v23, %v1759_v35  ;;  %4828 = vmatprep.mubr.msk.f32.mxu1 %vm1420_vm3, %v5035_v33  ;;  %v2384_v40 = vmul.f32 %v5035_v33, %v5035_v33 }
 0x2ae   :  { %v5039_v41 = vpop.eup %5038  ;;  %v2198_v42 = vadd.f32 1.0, %v5037_v37  ;;  %5056 = vpow2.f32 %v4115_v27  ;;  %v4117_v43 = vmul.f32 -1.442695, %v1765_v34  ;;  %4829 = vmatmul.mubr.msk.f32.gmra.mrb[66].mxu1 %vm1420_vm3, %v5033_v29  ;;  %v2455_v44 = vsel %vm1420_vm3, %v2385_v36, 0.0 }
 0x2af   :  { %v5041_v45 = vpop.eup %5040  ;;  %v2201_v46 = vadd.f32 1.0, %v5039_v41  ;;  %5058 = vpow2.f32 %v4114_v31  ;;  %v4116_v47 = vmul.f32 -1.442695, %v1760_v38  ;;  %2456 = vadd.xlane.f32.xlu1 %v2455_v44  ;;  %v4750_v48 = vpop.f32.mrb[82].mxu0  ;;  %2447 = vadd.xlane.f32.xlu0 %v2446_v39  ;;  %v2452_v54 = vsel %vm1420_vm3, %v2384_v40, 0.0 }
 0x2b0   :  { %v5043_v49 = vpop.eup %5042  ;;  %5060 = vrcp.f32 %v2198_v42  ;;  %v1775_v50 = vadd.f32 %v4750_v48, %v5978_v23  ;;  %v1769_v51 = vpop.f32.mrb[83].mxu0  ;;  %v2387_v59 = vmul.f32 %v5041_v45, %v5041_v45 }
 0x2b1   :  { %v5045_v52 = vpop.eup %5044  ;;  %5062 = vrcp.f32 %v2201_v46  ;;  %v1770_v53 = vadd.f32 %v5978_v23, %v1769_v51  ;;  %4831 = vmatprep.mubr.msk.f32.mxu1 %vm1420_vm3, %v5043_v49  ;;  %v2386_v55 = vmul.f32 %v5043_v49, %v5043_v49 }
 0x2b2   :  { %v5047_v56 = vpop.eup %5046  ;;  %v2200_v57 = vadd.f32 1.0, %v5045_v52  ;;  %5064 = vpow2.f32 %v4117_v43  ;;  %v4119_v58 = vmul.f32 -1.442695, %v1775_v50  ;;  %4832 = vmatmul.mubr.msk.f32.gmra.mrb[68].mxu1 %vm1420_vm3, %v5041_v45  ;;  %v2461_v10 = vsel %vm1420_vm3, %v2387_v59, 0.0 }
 0x2b3   :  { %v5049_v60 = vpop.eup %5048  ;;  %v2203_v61 = vadd.f32 1.0, %v5047_v56  ;;  %5066 = vpow2.f32 %v4116_v47  ;;  %v4753_v62 = vpop.f32.mrb[84].mxu0  ;;  %2453 = vadd.xlane.f32.xlu1 %v2452_v54  ;;  %v2458_v63 = vsel %vm1420_vm3, %v2386_v55, 0.0  ;;  %v4118_v1 = vmul.f32 -1.442695, %v1770_v53 }
 0x2b4   :  { %v5051_v0 = vpop.eup %5050  ;;  %5068 = vrcp.f32 %v2200_v57  ;;  %v1785_v2 = vadd.f32 %v4753_v62, %v5978_v23  ;;  %v1779_v3 = vpop.f32.mrb[85].mxu0  ;;  %2459 = vadd.xlane.f32.xlu0 %v2458_v63  ;;  %v2389_v4 = vmul.f32 %v5049_v60, %v5049_v60 }
 0x2b5   :  { %5070 = vrcp.f32 %v2203_v61  ;;  %v2202_v5 = vadd.f32 1.0, %v5051_v0  ;;  %v1780_v6 = vadd.f32 %v5978_v23, %v1779_v3 }
 0x2b6   :  { %v5053_v8 = vpop.eup %5052  ;;  %5072 = vpow2.f32 %v4119_v58  ;;  %v4121_v9 = vmul.f32 -1.442695, %v1785_v2  ;;  %v2467_v18 = vsel %vm1420_vm3, %v2389_v4, 0.0 }
 0x2b7   :  { %v5055_v11 = vpop.eup %5054  ;;  %5074 = vrcp.f32 %v2202_v5  ;;  %v4120_v12 = vmul.f32 -1.442695, %v1780_v6  ;;  %4834 = vmatprep.mubr.msk.f32.mxu1 %vm1420_vm3, %v5053_v8  ;;  %v4756_v13 = vpop.f32.mrb[86].mxu0  ;;  %2462 = vadd.xlane.f32.xlu1 %v2461_v10  ;;  %v2388_v14 = vmul.f32 %v5053_v8, %v5053_v8 }
 0x2b8   :  { %v5057_v15 = vpop.eup %5056  ;;  %5076 = vpow2.f32 %v4118_v1  ;;  %4835 = vmatmul.mubr.msk.f32.gmra.mrb[70].mxu1 %vm1420_vm3, %v5049_v60  ;;  %v1795_v16 = vadd.f32 %v4756_v13, %v5978_v23  ;;  %v1789_v17 = vpop.f32.mrb[87].mxu0  ;;  %v2391_v7 = vmul.f32 %v5055_v11, %v5055_v11 }
 0x2b9   :  { %v5059_v19 = vpop.eup %5058  ;;  %v2205_v20 = vadd.f32 1.0, %v5057_v15  ;;  %5078 = vpow2.f32 %v4121_v9  ;;  %v1790_v21 = vadd.f32 %v5978_v23, %v1789_v17  ;;  %v2464_v22 = vsel %vm1420_vm3, %v2388_v14, 0.0 }
 0x2ba   :  { %v5061_v24 = vpop.eup %5060  ;;  %v2204_v25 = vadd.f32 1.0, %v5059_v19  ;;  %5080 = vpow2.f32 %v4120_v12  ;;  %v4123_v26 = vmul.f32 -1.442695, %v1795_v16  ;;  %2465 = vadd.xlane.f32.xlu0 %v2464_v22  ;;  %v2473_v42 = vsel %vm1420_vm3, %v2391_v7, 0.0 }
 0x2bb   :  { %v5063_v27 = vpop.eup %5062  ;;  %5082 = vrcp.f32 %v2205_v20  ;;  %v4122_v28 = vmul.f32 -1.442695, %v1790_v21  ;;  %4837 = vmatprep.mubr.msk.f32.mxu1 %vm1420_vm3, %v5061_v24  ;;  %v4759_v29 = vpop.f32.mrb[88].mxu0  ;;  %2468 = vadd.xlane.f32.xlu1 %v2467_v18  ;;  %v2390_v30 = vmul.f32 %v5061_v24, %v5061_v24 }
 0x2bc   :  { %v5065_v31 = vpop.eup %5064  ;;  %5084 = vrcp.f32 %v2204_v25  ;;  %4838 = vmatmul.mubr.msk.f32.gmra.mrb[72].mxu1 %vm1420_vm3, %v5055_v11  ;;  %v1805_v32 = vadd.f32 %v4759_v29, %v5978_v23  ;;  %v1799_v33 = vpop.f32.mrb[89].mxu0  ;;  %v2393_v34 = vmul.f32 %v5063_v27, %v5063_v27 }
 0x2bd   :  { %v5067_v35 = vpop.eup %5066  ;;  %v2207_v36 = vadd.f32 1.0, %v5065_v31  ;;  %5086 = vpow2.f32 %v4123_v26  ;;  %v1800_v37 = vadd.f32 %v5978_v23, %v1799_v33  ;;  %v2470_v38 = vsel %vm1420_vm3, %v2390_v30, 0.0 }
 0x2be   :  { %v5069_v39 = vpop.eup %5068  ;;  %v2206_v40 = vadd.f32 1.0, %v5067_v35  ;;  %5088 = vpow2.f32 %v4122_v28  ;;  %v4125_v41 = vmul.f32 -1.442695, %v1805_v32  ;;  %2471 = vadd.xlane.f32.xlu0 %v2470_v38  ;;  %v2479_v50 = vsel %vm1420_vm3, %v2393_v34, 0.0 }
 0x2bf   :  { %v5071_v43 = vpop.eup %5070  ;;  %5090 = vrcp.f32 %v2207_v36  ;;  %v4124_v44 = vmul.f32 -1.442695, %v1800_v37  ;;  %4840 = vmatprep.mubr.msk.f32.mxu1 %vm1420_vm3, %v5069_v39  ;;  %v4762_v45 = vpop.f32.mrb[90].mxu0  ;;  %2474 = vadd.xlane.f32.xlu1 %v2473_v42  ;;  %v2392_v46 = vmul.f32 %v5069_v39, %v5069_v39 }
 0x2c0   :  { %v5073_v47 = vpop.eup %5072  ;;  %5092 = vrcp.f32 %v2206_v40  ;;  %4841 = vmatmul.mubr.msk.f32.gmra.mrb[74].mxu1 %vm1420_vm3, %v5063_v27  ;;  %v1815_v48 = vadd.f32 %v4762_v45, %v5978_v23  ;;  %v1809_v49 = vpop.f32.mrb[91].mxu0  ;;  %v2395_v58 = vmul.f32 %v5071_v43, %v5071_v43 }
 0x2c1   :  { %v5075_v51 = vpop.eup %5074  ;;  %v2209_v52 = vadd.f32 1.0, %v5073_v47  ;;  %5094 = vpow2.f32 %v4125_v41  ;;  %v1810_v53 = vadd.f32 %v5978_v23, %v1809_v49  ;;  %v2476_v54 = vsel %vm1420_vm3, %v2392_v46, 0.0 }
 0x2c2   :  { %v5077_v55 = vpop.eup %5076  ;;  %5096 = vpow2.f32 %v4124_v44  ;;  %v4127_v56 = vmul.f32 -1.442695, %v1815_v48  ;;  %2477 = vadd.xlane.f32.xlu0 %v2476_v54  ;;  %4843 = vmatprep.mubr.msk.f32.mxu1 %vm1420_vm3, %v5075_v51  ;;  %v2394_v57 = vmul.f32 %v5075_v51, %v5075_v51  ;;  %v2485_v10 = vsel %vm1420_vm3, %v2395_v58, 0.0 }
 0x2c3   :  { %v5079_v59 = vpop.eup %5078  ;;  %5098 = vrcp.f32 %v2209_v52  ;;  %v2208_v60 = vadd.f32 1.0, %v5077_v55  ;;  %v4126_v61 = vmul.f32 -1.442695, %v1810_v53  ;;  %v4765_v62 = vpop.f32.mrb[92].mxu0  ;;  %2480 = vadd.xlane.f32.xlu1 %v2479_v50 }
 0x2c4   :  { %v5081_v63 = vpop.eup %5080  ;;  %v2211_v0 = vadd.f32 1.0, %v5079_v59  ;;  %5100 = vpow2.f32 %v4127_v56  ;;  %4844 = vmatmul.mubr.msk.f32.gmra.mrb[76].mxu1 %vm1420_vm3, %v5071_v43  ;;  %v1825_v1 = vadd.f32 %v4765_v62, %v5978_v23  ;;  %v1819_v2 = vpop.f32.mrb[93].mxu0  ;;  %v2482_v3 = vsel %vm1420_vm3, %v2394_v57, 0.0 }
 0x2c5   :  { %v5083_v4 = vpop.eup %5082  ;;  %5102 = vrcp.f32 %v2208_v60  ;;  %v2210_v5 = vadd.f32 1.0, %v5081_v63  ;;  %v1820_v6 = vadd.f32 %v5978_v23, %v1819_v2 }
 0x2c6   :  { %v5085_v8 = vpop.eup %5084  ;;  %5104 = vrcp.f32 %v2211_v0  ;;  %v4129_v9 = vmul.f32 -1.442695, %v1825_v1  ;;  %2483 = vadd.xlane.f32.xlu0 %v2482_v3  ;;  %v2397_v11 = vmul.f32 %v5083_v4, %v5083_v4 }
 0x2c7   :  { %v5087_v12 = vpop.eup %5086  ;;  %5106 = vrcp.f32 %v2210_v5  ;;  %4846 = vmatprep.mubr.msk.f32.mxu1 %vm1420_vm3, %v5085_v8  ;;  %v4768_v13 = vpop.f32.mrb[94].mxu0  ;;  %2486 = vadd.xlane.f32.xlu1 %v2485_v10  ;;  %v2396_v14 = vmul.f32 %v5085_v8, %v5085_v8  ;;  %v4128_v17 = vmul.f32 -1.442695, %v1820_v6 }
 0x2c8   :  { %v5089_v15 = vpop.eup %5088  ;;  %v2213_v16 = vadd.f32 1.0, %v5087_v12  ;;  %5108 = vpow2.f32 %v4126_v61  ;;  %4847 = vmatmul.mubr.msk.f32.gmra.mrb[78].mxu1 %vm1420_vm3, %v5083_v4  ;;  %v1835_v18 = vadd.f32 %v4768_v13, %v5978_v23  ;;  %v1829_v19 = vpop.f32.mrb[95].mxu0  ;;  %v2491_v7 = vsel %vm1420_vm3, %v2397_v11, 0.0 }
 0x2c9   :  { %v5091_v20 = vpop.eup %5090  ;;  %v2212_v21 = vadd.f32 1.0, %v5089_v15  ;;  %5110 = vpow2.f32 %v4129_v9  ;;  %v1830_v22 = vadd.f32 %v5978_v23, %v1829_v19  ;;  %v2488_v24 = vsel %vm1420_vm3, %v2396_v14, 0.0 }
 0x2ca   :  { %v5093_v25 = vpop.eup %5092  ;;  %5112 = vrcp.f32 %v2213_v16  ;;  %v4131_v26 = vmul.f32 -1.442695, %v1835_v18  ;;  %2489 = vadd.xlane.f32.xlu0 %v2488_v24  ;;  %v2399_v27 = vmul.f32 %v5091_v20, %v5091_v20 }
 0x2cb   :  { %v5095_v28 = vpop.eup %5094  ;;  %5114 = vrcp.f32 %v2212_v21  ;;  %4849 = vmatprep.mubr.msk.f32.mxu1 %vm1420_vm3, %v5093_v25  ;;  %v4771_v29 = vpop.f32.mrb[96].mxu0  ;;  %2492 = vadd.xlane.f32.xlu1 %v2491_v7  ;;  %v2398_v30 = vmul.f32 %v5093_v25, %v5093_v25  ;;  %v4130_v33 = vmul.f32 -1.442695, %v1830_v22 }
 0x2cc   :  { %v5097_v31 = vpop.eup %5096  ;;  %v2215_v32 = vadd.f32 1.0, %v5095_v28  ;;  %5116 = vpow2.f32 %v4128_v17  ;;  %4850 = vmatmul.mubr.msk.f32.gmra.mrb[80].mxu1 %vm1420_vm3, %v5091_v20  ;;  %v1845_v34 = vadd.f32 %v4771_v29, %v5978_v23  ;;  %v1839_v35 = vpop.f32.mrb[97].mxu0  ;;  %v2497_v42 = vsel %vm1420_vm3, %v2399_v27, 0.0 }
 0x2cd   :  { %v5099_v36 = vpop.eup %5098  ;;  %v2214_v37 = vadd.f32 1.0, %v5097_v31  ;;  %5118 = vpow2.f32 %v4131_v26  ;;  %v1840_v38 = vadd.f32 %v5978_v23, %v1839_v35  ;;  %v2494_v39 = vsel %vm1420_vm3, %v2398_v30, 0.0 }
 0x2ce   :  { %v5101_v40 = vpop.eup %5100  ;;  %5120 = vrcp.f32 %v2215_v32  ;;  %v4133_v41 = vmul.f32 -1.442695, %v1845_v34  ;;  %2495 = vadd.xlane.f32.xlu0 %v2494_v39  ;;  %v2401_v43 = vmul.f32 %v5099_v36, %v5099_v36 }
 0x2cf   :  { %v5103_v44 = vpop.eup %5102  ;;  %5122 = vrcp.f32 %v2214_v37  ;;  %v2217_v45 = vadd.f32 1.0, %v5101_v40  ;;  %v4132_v46 = vmul.f32 -1.442695, %v1840_v38  ;;  %v4774_v47 = vpop.f32.mrb[98].mxu0  ;;  %2498 = vadd.xlane.f32.xlu1 %v2497_v42 }
 0x2d0   :  { %v5105_v48 = vpop.eup %5104  ;;  %5124 = vpow2.f32 %v4130_v33  ;;  %4852 = vmatprep.mubr.msk.f32.mxu1 %vm1420_vm3, %v5103_v44  ;;  %v1855_v49 = vadd.f32 %v4774_v47, %v5978_v23  ;;  %v1849_v50 = vpop.f32.mrb[99].mxu0  ;;  %v2400_v51 = vmul.f32 %v5103_v44, %v5103_v44  ;;  %v2503_v54 = vsel %vm1420_vm3, %v2401_v43, 0.0 }
 0x2d1   :  { %v5107_v52 = vpop.eup %5106  ;;  %5126 = vrcp.f32 %v2217_v45  ;;  %4853 = vmatmul.mubr.msk.f32.gmra.mrb[82].mxu1 %vm1420_vm3, %v5099_v36  ;;  %v1850_v53 = vadd.f32 %v5978_v23, %v1849_v50  ;;  %v2403_v55 = vmul.f32 %v5105_v48, %v5105_v48 }
 0x2d2   :  { %v5109_v56 = vpop.eup %5108  ;;  %5128 = vpow2.f32 %v4133_v41  ;;  %v4135_v57 = vmul.f32 -1.442695, %v1855_v49  ;;  %v2500_v58 = vsel %vm1420_vm3, %v2400_v51, 0.0  ;;  %4855 = vmatprep.mubr.msk.f32.mxu1 %vm1420_vm3, %v5107_v52  ;;  %v2402_v59 = vmul.f32 %v5107_v52, %v5107_v52 }
 0x2d3   :  { %v5111_v60 = vpop.eup %5110  ;;  %v2216_v61 = vadd.f32 1.0, %v5109_v56  ;;  %5130 = vpow2.f32 %v4132_v46  ;;  %v4134_v62 = vmul.f32 -1.442695, %v1850_v53  ;;  %2501 = vadd.xlane.f32.xlu0 %v2500_v58  ;;  %v4777_v63 = vpop.f32.mrb[100].mxu0  ;;  %2504 = vadd.xlane.f32.xlu1 %v2503_v54  ;;  %v2509_v11 = vsel %vm1420_vm3, %v2403_v55, 0.0 }
 0x2d4   :  { %v5113_v0 = vpop.eup %5112  ;;  %v2219_v1 = vadd.f32 1.0, %v5111_v60  ;;  %5132 = vpow2.f32 %v4135_v57  ;;  %v1865_v2 = vadd.f32 %v4777_v63, %v5978_v23  ;;  %v1859_v3 = vpop.f32.mrb[101].mxu0  ;;  %v2506_v4 = vsel %vm1420_vm3, %v2402_v59, 0.0 }
 0x2d5   :  { %v5115_v5 = vpop.eup %5114  ;;  %5134 = vrcp.f32 %v2216_v61  ;;  %4856 = vmatmul.mubr.msk.f32.gmra.mrb[84].mxu1 %vm1420_vm3, %v5105_v48  ;;  %v1860_v6 = vadd.f32 %v5978_v23, %v1859_v3  ;;  %v2405_v8 = vmul.f32 %v5113_v0, %v5113_v0 }
 0x2d6   :  { %v5117_v9 = vpop.eup %5116  ;;  %5136 = vrcp.f32 %v2219_v1  ;;  %v4137_v10 = vmul.f32 -1.442695, %v1865_v2  ;;  %4858 = vmatprep.mubr.msk.f32.mxu1 %vm1420_vm3, %v5115_v5  ;;  %v2404_v12 = vmul.f32 %v5115_v5, %v5115_v5 }
 0x2d7   :  { %v5119_v13 = vpop.eup %5118  ;;  %v2218_v14 = vadd.f32 1.0, %v5117_v9  ;;  %5138 = vpow2.f32 %v4134_v62  ;;  %v4136_v15 = vmul.f32 -1.442695, %v1860_v6  ;;  %2507 = vadd.xlane.f32.xlu0 %v2506_v4  ;;  %v4780_v16 = vpop.f32.mrb[102].mxu0  ;;  %2510 = vadd.xlane.f32.xlu1 %v2509_v11  ;;  %v2515_v25 = vsel %vm1420_vm3, %v2405_v8, 0.0 }
 0x2d8   :  { %v5121_v17 = vpop.eup %5120  ;;  %v2221_v18 = vadd.f32 1.0, %v5119_v13  ;;  %5140 = vpow2.f32 %v4137_v10  ;;  %v1875_v19 = vadd.f32 %v4780_v16, %v5978_v23  ;;  %v1869_v20 = vpop.f32.mrb[103].mxu0  ;;  %v2512_v21 = vsel %vm1420_vm3, %v2404_v12, 0.0 }
 0x2d9   :  { %v5123_v22 = vpop.eup %5122  ;;  %5142 = vrcp.f32 %v2218_v14  ;;  %4859 = vmatmul.mubr.msk.f32.gmra.mrb[86].mxu1 %vm1420_vm3, %v5113_v0  ;;  %v1870_v24 = vadd.f32 %v5978_v23, %v1869_v20  ;;  %v2407_v28 = vmul.f32 %v5121_v17, %v5121_v17 }
 0x2da   :  { %v5125_v26 = vpop.eup %5124  ;;  %5144 = vrcp.f32 %v2221_v18  ;;  %v4139_v7 = vmul.f32 -1.442695, %v1875_v19  ;;  %4861 = vmatprep.mubr.msk.f32.mxu1 %vm1420_vm3, %v5123_v22  ;;  %v2406_v27 = vmul.f32 %v5123_v22, %v5123_v22 }
 0x2db   :  { %v5127_v29 = vpop.eup %5126  ;;  %v2220_v30 = vadd.f32 1.0, %v5125_v26  ;;  %5146 = vpow2.f32 %v4136_v15  ;;  %v4138_v31 = vmul.f32 -1.442695, %v1870_v24  ;;  %2513 = vadd.xlane.f32.xlu0 %v2512_v21  ;;  %v4783_v32 = vpop.f32.mrb[104].mxu0  ;;  %2516 = vadd.xlane.f32.xlu1 %v2515_v25  ;;  %v2521_v44 = vsel %vm1420_vm3, %v2407_v28, 0.0 }
 0x2dc   :  { %v5129_v33 = vpop.eup %5128  ;;  %5148 = vpow2.f32 %v4139_v7  ;;  %v1885_v34 = vadd.f32 %v4783_v32, %v5978_v23  ;;  %v1879_v35 = vpop.f32.mrb[105].mxu0  ;;  %v2518_v36 = vsel %vm1420_vm3, %v2406_v27, 0.0  ;;  %v2409_v40 = vmul.f32 %v5127_v29, %v5127_v29 }
 0x2dd   :  { %v5131_v37 = vpop.eup %5130  ;;  %5150 = vrcp.f32 %v2220_v30  ;;  %v2223_v38 = vadd.f32 1.0, %v5129_v33  ;;  %4862 = vmatmul.mubr.msk.f32.gmra.mrb[88].mxu1 %vm1420_vm3, %v5121_v17  ;;  %v1880_v39 = vadd.f32 %v5978_v23, %v1879_v35 }
 0x2de   :  { %v5133_v41 = vpop.eup %5132  ;;  %v2222_v42 = vadd.f32 1.0, %v5131_v37  ;;  %5152 = vpow2.f32 %v4138_v31  ;;  %v4141_v43 = vmul.f32 -1.442695, %v1885_v34  ;;  %v2527_v55 = vsel %vm1420_vm3, %v2409_v40, 0.0 }
 0x2df   :  { %v5135_v45 = vpop.eup %5134  ;;  %5154 = vrcp.f32 %v2223_v38  ;;  %v2225_v46 = vadd.f32 1.0, %v5133_v41  ;;  %v4140_v47 = vmul.f32 -1.442695, %v1880_v39  ;;  %2519 = vadd.xlane.f32.xlu0 %v2518_v36  ;;  %v4786_v48 = vpop.f32.mrb[106].mxu0  ;;  %2522 = vadd.xlane.f32.xlu1 %v2521_v44 }
 0x2e0   :  { %v5137_v49 = vpop.eup %5136  ;;  %5156 = vrcp.f32 %v2222_v42  ;;  %4864 = vmatprep.mubr.msk.f32.mxu1 %vm1420_vm3, %v5135_v45  ;;  %v1895_v50 = vadd.f32 %v4786_v48, %v5978_v23  ;;  %v1889_v51 = vpop.f32.mrb[107].mxu0  ;;  %v2408_v52 = vmul.f32 %v5135_v45, %v5135_v45 }
 0x2e1   :  { %v5139_v53 = vpop.eup %5138  ;;  %5158 = vrcp.f32 %v2225_v46  ;;  %4865 = vmatmul.mubr.msk.f32.gmra.mrb[90].mxu1 %vm1420_vm3, %v5127_v29  ;;  %v1890_v54 = vadd.f32 %v5978_v23, %v1889_v51  ;;  %v2411_v56 = vmul.f32 %v5137_v49, %v5137_v49 }
 0x2e2   :  { %v5141_v57 = vpop.eup %5140  ;;  %v2224_v58 = vadd.f32 1.0, %v5139_v53  ;;  %5160 = vpow2.f32 %v4141_v43  ;;  %v4143_v59 = vmul.f32 -1.442695, %v1895_v50  ;;  %v2524_v60 = vsel %vm1420_vm3, %v2408_v52, 0.0 }
 0x2e3   :  { %v5143_v61 = vpop.eup %5142  ;;  %v2227_v62 = vadd.f32 1.0, %v5141_v57  ;;  %5162 = vpow2.f32 %v4140_v47  ;;  %v4142_v63 = vmul.f32 -1.442695, %v1890_v54  ;;  %2525 = vadd.xlane.f32.xlu0 %v2524_v60  ;;  %v4789_v0 = vpop.f32.mrb[108].mxu0  ;;  %2528 = vadd.xlane.f32.xlu1 %v2527_v55  ;;  %v2533_v8 = vsel %vm1420_vm3, %v2411_v56, 0.0 }
 0x2e4   :  { %v5145_v1 = vpop.eup %5144  ;;  %5164 = vrcp.f32 %v2224_v58  ;;  %4867 = vmatprep.mubr.msk.f32.mxu1 %vm1420_vm3, %v5143_v61  ;;  %v1905_v2 = vadd.f32 %v4789_v0, %v5978_v23  ;;  %v1899_v3 = vpop.f32.mrb[109].mxu0  ;;  %v2410_v4 = vmul.f32 %v5143_v61, %v5143_v61 }
 0x2e5   :  { %v5147_v5 = vpop.eup %5146  ;;  %5166 = vrcp.f32 %v2227_v62  ;;  %4868 = vmatmul.mubr.msk.f32.gmra.mrb[92].mxu1 %vm1420_vm3, %v5137_v49  ;;  %v1900_v6 = vadd.f32 %v5978_v23, %v1899_v3  ;;  %v2413_v16 = vmul.f32 %v5145_v1, %v5145_v1 }
 0x2e6   :  { %v5149_v9 = vpop.eup %5148  ;;  %v2226_v10 = vadd.f32 1.0, %v5147_v5  ;;  %5168 = vpow2.f32 %v4143_v59  ;;  %v4145_v11 = vmul.f32 -1.442695, %v1905_v2  ;;  %v2530_v12 = vsel %vm1420_vm3, %v2410_v4, 0.0 }
 0x2e7   :  { %v5151_v13 = vpop.eup %5150  ;;  %v2229_v14 = vadd.f32 1.0, %v5149_v9  ;;  %5170 = vpow2.f32 %v4142_v63  ;;  %2531 = vadd.xlane.f32.xlu0 %v2530_v12  ;;  %v4792_v15 = vpop.f32.mrb[110].mxu0  ;;  %2534 = vadd.xlane.f32.xlu1 %v2533_v8  ;;  %v4144_v18 = vmul.f32 -1.442695, %v1900_v6  ;;  %v2539_v32 = vsel %vm1420_vm3, %v2413_v16, 0.0 }
 0x2e8   :  { %v5153_v17 = vpop.eup %5152  ;;  %5172 = vrcp.f32 %v2226_v10  ;;  %4870 = vmatprep.mubr.msk.f32.mxu1 %vm1420_vm3, %v5151_v13  ;;  %v1915_v19 = vadd.f32 %v4792_v15, %v5978_v23  ;;  %v1909_v20 = vpop.f32.mrb[111].mxu0  ;;  %v2412_v21 = vmul.f32 %v5151_v13, %v5151_v13 }
 0x2e9   :  { %v5155_v22 = vpop.eup %5154  ;;  %5174 = vrcp.f32 %v2229_v14  ;;  %v2228_v24 = vadd.f32 1.0, %v5153_v17  ;;  %4871 = vmatmul.mubr.msk.f32.gmra.mrb[94].mxu1 %vm1420_vm3, %v5145_v1  ;;  %v1910_v25 = vadd.f32 %v5978_v23, %v1909_v20 }
 0x2ea   :  { %v5157_v26 = vpop.eup %5156  ;;  %5176 = vpow2.f32 %v4145_v11  ;;  %v4147_v7 = vmul.f32 -1.442695, %v1915_v19  ;;  %v2536_v27 = vsel %vm1420_vm3, %v2412_v21, 0.0  ;;  %v2415_v28 = vmul.f32 %v5155_v22, %v5155_v22 }
 0x2eb   :  { %v5159_v29 = vpop.eup %5158  ;;  %5178 = vrcp.f32 %v2228_v24  ;;  %v4146_v30 = vmul.f32 -1.442695, %v1910_v25  ;;  %2537 = vadd.xlane.f32.xlu0 %v2536_v27  ;;  %4873 = vmatprep.mubr.msk.f32.mxu1 %vm1420_vm3, %v5157_v26  ;;  %v4795_v31 = vpop.f32.mrb[112].mxu0  ;;  %v2414_v33 = vmul.f32 %v5157_v26, %v5157_v26 }
 0x2ec   :  { %v5161_v34 = vpop.eup %5160  ;;  %5180 = vpow2.f32 %v4144_v18  ;;  %v1925_v35 = vadd.f32 %v4795_v31, %v5978_v23  ;;  %2540 = vadd.xlane.f32.xlu1 %v2539_v32  ;;  %v1919_v36 = vpop.f32.mrb[113].mxu0  ;;  %v2545_v44 = vsel %vm1420_vm3, %v2415_v28, 0.0  ;;  %v2417_v49 = vmul.f32 %v5159_v29, %v5159_v29 }
 0x2ed   :  { %v5163_v37 = vpop.eup %5162  ;;  %v2231_v38 = vadd.f32 1.0, %v5161_v34  ;;  %5182 = vpow2.f32 %v4147_v7  ;;  %4874 = vmatmul.mubr.msk.f32.gmra.mrb[96].mxu1 %vm1420_vm3, %v5155_v22  ;;  %v1920_v39 = vadd.f32 %v5978_v23, %v1919_v36  ;;  %v2542_v40 = vsel %vm1420_vm3, %v2414_v33, 0.0 }
 0x2ee   :  { %v5165_v41 = vpop.eup %5164  ;;  %v2230_v42 = vadd.f32 1.0, %v5163_v37  ;;  %5184 = vpow2.f32 %v4146_v30  ;;  %v4149_v43 = vmul.f32 -1.442695, %v1925_v35  ;;  %v2551_v0 = vsel %vm1420_vm3, %v2417_v49, 0.0 }
 0x2ef   :  { %v5167_v45 = vpop.eup %5166  ;;  %5186 = vrcp.f32 %v2231_v38  ;;  %v4148_v46 = vmul.f32 -1.442695, %v1920_v39  ;;  %2543 = vadd.xlane.f32.xlu0 %v2542_v40  ;;  %4876 = vmatprep.mubr.msk.f32.mxu1 %vm1420_vm3, %v5165_v41  ;;  %v4798_v47 = vpop.f32.mrb[114].mxu0  ;;  %v2416_v48 = vmul.f32 %v5165_v41, %v5165_v41 }
 0x2f0   :  { %v5169_v50 = vpop.eup %5168  ;;  %5188 = vrcp.f32 %v2230_v42  ;;  %v1935_v51 = vadd.f32 %v4798_v47, %v5978_v23  ;;  %2546 = vadd.xlane.f32.xlu1 %v2545_v44  ;;  %v1929_v52 = vpop.f32.mrb[115].mxu0  ;;  %v2419_v60 = vmul.f32 %v5167_v45, %v5167_v45 }
 0x2f1   :  { %v5171_v53 = vpop.eup %5170  ;;  %v2233_v54 = vadd.f32 1.0, %v5169_v50  ;;  %5190 = vpow2.f32 %v4149_v43  ;;  %4877 = vmatmul.mubr.msk.f32.gmra.mrb[98].mxu1 %vm1420_vm3, %v5159_v29  ;;  %v1930_v55 = vadd.f32 %v5978_v23, %v1929_v52  ;;  %v2548_v56 = vsel %vm1420_vm3, %v2416_v48, 0.0  ;;  %v6108_v23 = vld [vmem:[%s6695_s6] ss:$0 sm:$0xff] }
 0x2f2   :  { %v5173_v57 = vpop.eup %5172  ;;  %v2232_v58 = vadd.f32 1.0, %v5171_v53  ;;  %5192 = vpow2.f32 %v4148_v46  ;;  %v4151_v59 = vmul.f32 -1.442695, %v1935_v51  ;;  %v2557_v12 = vsel %vm1420_vm3, %v2419_v60, 0.0 }
 0x2f3   :  { %v5175_v61 = vpop.eup %5174  ;;  %5194 = vrcp.f32 %v2233_v54  ;;  %v4150_v62 = vmul.f32 -1.442695, %v1930_v55  ;;  %2549 = vadd.xlane.f32.xlu0 %v2548_v56  ;;  %4879 = vmatprep.mubr.msk.f32.mxu1 %vm1420_vm3, %v5173_v57  ;;  %v4801_v63 = vpop.f32.mrb[116].mxu0  ;;  %v2418_v1 = vmul.f32 %v5173_v57, %v5173_v57 }
 0x2f4   :  { %v5177_v2 = vpop.eup %5176  ;;  %5196 = vrcp.f32 %v2232_v58  ;;  %v1945_v3 = vadd.f32 %v6108_v23, %v4801_v63  ;;  %2552 = vadd.xlane.f32.xlu1 %v2551_v0  ;;  %v1939_v4 = vpop.f32.mrb[117].mxu0  ;;  %v2421_v18 = vmul.f32 %v5175_v61, %v5175_v61 }
 0x2f5   :  { %v5179_v5 = vpop.eup %5178  ;;  %v2235_v6 = vadd.f32 1.0, %v5177_v2  ;;  %5198 = vpow2.f32 %v4151_v59  ;;  %4880 = vmatmul.mubr.msk.f32.gmra.mrb[100].mxu1 %vm1420_vm3, %v5167_v45  ;;  %v1940_v8 = vadd.f32 %v6108_v23, %v1939_v4  ;;  %v2554_v9 = vsel %vm1420_vm3, %v2418_v1, 0.0 }
 0x2f6   :  { %v5181_v10 = vpop.eup %5180  ;;  %5200 = vpow2.f32 %v4150_v62  ;;  %v4153_v11 = vmul.f32 -1.442695, %v1945_v3  ;;  %4882 = vmatprep.mubr.msk.f32.mxu1 %vm1420_vm3, %v5179_v5  ;;  %v2420_v13 = vmul.f32 %v5179_v5, %v5179_v5  ;;  %v2563_v31 = vsel %vm1420_vm3, %v2421_v18, 0.0 }
 0x2f7   :  { %v5183_v14 = vpop.eup %5182  ;;  %5202 = vrcp.f32 %v2235_v6  ;;  %v2234_v15 = vadd.f32 1.0, %v5181_v10  ;;  %v4152_v16 = vmul.f32 -1.442695, %v1940_v8  ;;  %2555 = vadd.xlane.f32.xlu0 %v2554_v9  ;;  %v4804_v17 = vpop.f32.mrb[118].mxu0 }
 0x2f8   :  { %v5185_v19 = vpop.eup %5184  ;;  %v2237_v20 = vadd.f32 1.0, %v5183_v14  ;;  %5204 = vpow2.f32 %v4153_v11  ;;  %v1955_v21 = vadd.f32 %v6108_v23, %v4804_v17  ;;  %2558 = vadd.xlane.f32.xlu1 %v2557_v12  ;;  %v1949_v22 = vpop.f32.mrb[119].mxu0  ;;  %v2560_v24 = vsel %vm1420_vm3, %v2420_v13, 0.0 }
 0x2f9   :  { %v5187_v25 = vpop.eup %5186  ;;  %5206 = vrcp.f32 %v2234_v15  ;;  %v2236_v26 = vadd.f32 1.0, %v5185_v19  ;;  %4883 = vmatmul.mubr.msk.f32.gmra.mrb[102].mxu1 %vm1420_vm3, %v5175_v61  ;;  %v1950_v7 = vadd.f32 %v6108_v23, %v1949_v22 }
 0x2fa   :  { %v5189_v27 = vpop.eup %5188  ;;  %5208 = vrcp.f32 %v2237_v20  ;;  %v4155_v28 = vmul.f32 -1.442695, %v1955_v21  ;;  %v2423_v33 = vmul.f32 %v5187_v25, %v5187_v25 }
 0x2fb   :  { %v5191_v29 = vpop.eup %5190  ;;  %5210 = vrcp.f32 %v2236_v26  ;;  %2561 = vadd.xlane.f32.xlu0 %v2560_v24  ;;  %4885 = vmatprep.mubr.msk.f32.mxu1 %vm1420_vm3, %v5189_v27  ;;  %v4807_v30 = vpop.f32.mrb[120].mxu0  ;;  %v2422_v32 = vmul.f32 %v5189_v27, %v5189_v27  ;;  %v4154_v36 = vmul.f32 -1.442695, %v1950_v7 }
 0x2fc   :  { %v5193_v34 = vpop.eup %5192  ;;  %v2239_v35 = vadd.f32 1.0, %v5191_v29  ;;  %5212 = vpow2.f32 %v4152_v16  ;;  %v1965_v37 = vadd.f32 %v6108_v23, %v4807_v30  ;;  %2564 = vadd.xlane.f32.xlu1 %v2563_v31  ;;  %v1959_v38 = vpop.f32.mrb[121].mxu0  ;;  %v2569_v48 = vsel %vm1420_vm3, %v2423_v33, 0.0 }
 0x2fd   :  { %v5195_v39 = vpop.eup %5194  ;;  %v2238_v40 = vadd.f32 1.0, %v5193_v34  ;;  %5214 = vpow2.f32 %v4155_v28  ;;  %4886 = vmatmul.mubr.msk.f32.gmra.mrb[104].mxu1 %vm1420_vm3, %v5187_v25  ;;  %v1960_v41 = vadd.f32 %v6108_v23, %v1959_v38  ;;  %v2566_v42 = vsel %vm1420_vm3, %v2422_v32, 0.0 }
 0x2fe   :  { %v5197_v43 = vpop.eup %5196  ;;  %5216 = vrcp.f32 %v2239_v35  ;;  %v4157_v44 = vmul.f32 -1.442695, %v1965_v37  ;;  %v2425_v45 = vmul.f32 %v5195_v39, %v5195_v39 }
 0x2ff   :  { %v5199_v46 = vpop.eup %5198  ;;  %5218 = vrcp.f32 %v2238_v40  ;;  %2567 = vadd.xlane.f32.xlu0 %v2566_v42  ;;  %4888 = vmatprep.mubr.msk.f32.mxu1 %vm1420_vm3, %v5197_v43  ;;  %v4810_v47 = vpop.f32.mrb[122].mxu0  ;;  %v2424_v49 = vmul.f32 %v5197_v43, %v5197_v43  ;;  %v4156_v52 = vmul.f32 -1.442695, %v1960_v41 }
 0x300   :  { %v5201_v50 = vpop.eup %5200  ;;  %v2241_v51 = vadd.f32 1.0, %v5199_v46  ;;  %5220 = vpow2.f32 %v4154_v36  ;;  %v1975_v53 = vadd.f32 %v6108_v23, %v4810_v47  ;;  %2570 = vadd.xlane.f32.xlu1 %v2569_v48  ;;  %v1969_v54 = vpop.f32.mrb[123].mxu0  ;;  %v2575_v61 = vsel %vm1420_vm3, %v2425_v45, 0.0 }
 0x301   :  { %v5203_v55 = vpop.eup %5202  ;;  %v2240_v56 = vadd.f32 1.0, %v5201_v50  ;;  %5222 = vpow2.f32 %v4157_v44  ;;  %4889 = vmatmul.mubr.msk.f32.gmra.mrb[106].mxu1 %vm1420_vm3, %v5195_v39  ;;  %v1970_v57 = vadd.f32 %v6108_v23, %v1969_v54  ;;  %v2572_v58 = vsel %vm1420_vm3, %v2424_v49, 0.0 }
 0x302   :  { %v5205_v59 = vpop.eup %5204  ;;  %5224 = vrcp.f32 %v2241_v51  ;;  %v4159_v60 = vmul.f32 -1.442695, %v1975_v53  ;;  %v2427_v2 = vmul.f32 %v5203_v55, %v5203_v55 }
 0x303   :  { %v5207_v62 = vpop.eup %5206  ;;  %5226 = vrcp.f32 %v2240_v56  ;;  %v2243_v63 = vadd.f32 1.0, %v5205_v59  ;;  %v4158_v0 = vmul.f32 -1.442695, %v1970_v57  ;;  %2573 = vadd.xlane.f32.xlu0 %v2572_v58  ;;  %v4813_v1 = vpop.f32.mrb[124].mxu0 }
 0x304   :  { %v5209_v3 = vpop.eup %5208  ;;  %5228 = vpow2.f32 %v4156_v52  ;;  %4891 = vmatprep.mubr.msk.f32.mxu1 %vm1420_vm3, %v5207_v62  ;;  %v1985_v4 = vadd.f32 %v6108_v23, %v4813_v1  ;;  %2576 = vadd.xlane.f32.xlu1 %v2575_v61  ;;  %v1979_v5 = vpop.f32.mrb[125].mxu0  ;;  %v2426_v6 = vmul.f32 %v5207_v62, %v5207_v62  ;;  %v2581_v19 = vsel %vm1420_vm3, %v2427_v2, 0.0 }
 0x305   :  { %v5211_v8 = vpop.eup %5210  ;;  %5230 = vrcp.f32 %v2243_v63  ;;  %4892 = vmatmul.mubr.msk.f32.gmra.mrb[108].mxu1 %vm1420_vm3, %v5203_v55  ;;  %v1980_v9 = vadd.f32 %v6108_v23, %v1979_v5  ;;  %v2429_v10 = vmul.f32 %v5209_v3, %v5209_v3 }
 0x306   :  { %v5213_v11 = vpop.eup %5212  ;;  %5232 = vpow2.f32 %v4159_v60  ;;  %v4161_v12 = vmul.f32 -1.442695, %v1985_v4  ;;  %v2578_v13 = vsel %vm1420_vm3, %v2426_v6, 0.0  ;;  %4894 = vmatprep.mubr.msk.f32.mxu1 %vm1420_vm3, %v5211_v8  ;;  %v2428_v14 = vmul.f32 %v5211_v8, %v5211_v8 }
 0x307   :  { %v5215_v15 = vpop.eup %5214  ;;  %v2242_v16 = vadd.f32 1.0, %v5213_v11  ;;  %5234 = vpow2.f32 %v4158_v0  ;;  %v4160_v17 = vmul.f32 -1.442695, %v1980_v9  ;;  %2579 = vadd.xlane.f32.xlu0 %v2578_v13  ;;  %v4816_v18 = vpop.f32.mrb[126].mxu0  ;;  %v2587_v29 = vsel %vm1420_vm3, %v2429_v10, 0.0 }
 0x308   :  { %v5217_v20 = vpop.eup %5216  ;;  %v2245_v21 = vadd.f32 1.0, %v5215_v15  ;;  %5236 = vpow2.f32 %v4161_v12  ;;  %v1995_v22 = vadd.f32 %v6108_v23, %v4816_v18  ;;  %2582 = vadd.xlane.f32.xlu1 %v2581_v19  ;;  %v1989_v24 = vpop.f32.mrb[127].mxu0  ;;  %v2584_v25 = vsel %vm1420_vm3, %v2428_v14, 0.0 }
 0x309   :  { %v5219_v26 = vpop.eup %5218  ;;  %5238 = vrcp.f32 %v2242_v16  ;;  %4895 = vmatmul.mubr.msk.f32.gmra.mrb[110].mxu1 %vm1420_vm3, %v5209_v3  ;;  %v1990_v7 = vadd.f32 %v6108_v23, %v1989_v24  ;;  %v2431_v34 = vmul.f32 %v5217_v20, %v5217_v20 }
 0x30a   :  { %v5221_v27 = vpop.eup %5220  ;;  %5240 = vrcp.f32 %v2245_v21  ;;  %v4163_v28 = vmul.f32 -1.442695, %v1995_v22  ;;  %4897 = vmatprep.mubr.msk.f32.mxu1 %vm1420_vm3, %v5219_v26  ;;  %v2430_v30 = vmul.f32 %v5219_v26, %v5219_v26 }
 0x30b   :  { %v5223_v31 = vpop.eup %5222  ;;  %v2244_v32 = vadd.f32 1.0, %v5221_v27  ;;  %5242 = vpow2.f32 %v4160_v17  ;;  %v4162_v33 = vmul.f32 -1.442695, %v1990_v7  ;;  %2585 = vadd.xlane.f32.xlu0 %v2584_v25  ;;  %v2593_v42 = vsel %vm1420_vm3, %v2431_v34, 0.0 }
 0x30c   :  { %v5225_v35 = vpop.eup %5224  ;;  %v2247_v36 = vadd.f32 1.0, %v5223_v31  ;;  %5244 = vpow2.f32 %v4163_v28  ;;  %2588 = vadd.xlane.f32.xlu1 %v2587_v29  ;;  %v2590_v23 = vsel %vm1420_vm3, %v2430_v30, 0.0  ;;  %v5345_v30 = vmov 0.0|0.0   ;;  %v3726_v31 = vld [vmem:[%s6698_s9] sm:$0xff] }
 0x30d   :  { %v5227_v37 = vpop.eup %5226  ;;  %5246 = vrcp.f32 %v2244_v32  ;;  %4898 = vmatmul.mubr.msk.f32.gmra.mrb[112].mxu1 %vm1420_vm3, %v5217_v20  ;;  %v2433_v43 = vmul.f32 %v5225_v35, %v5225_v35  ;;  %4976 = vmatprep.subr.bf16.mxu0 %v5345_v30  ;;  %v3727_v32 = vld [vmem:[%s6698_s9 + $0x8] sm:$0xff] }
 0x30e   :  { %v5229_v38 = vpop.eup %5228  ;;  %5248 = vrcp.f32 %v2247_v36  ;;  %4900 = vmatprep.mubr.msk.f32.mxu1 %vm1420_vm3, %v5227_v37  ;;  %v2432_v39 = vmul.f32 %v5227_v37, %v5227_v37  ;;  %v4977_v34 = vpack.c.bf16 %v3727_v32, %v3726_v31 }
 0x30f   :  { %v5231_v40 = vpop.eup %5230  ;;  %v2246_v41 = vadd.f32 1.0, %v5229_v38  ;;  %5250 = vpow2.f32 %v4162_v33  ;;  %2591 = vadd.xlane.f32.xlu0 %v2590_v23  ;;  %v2599_v52 = vsel %vm1420_vm3, %v2433_v43, 0.0 }
 0x310   :  { %v5233_v44 = vpop.eup %5232  ;;  %2594 = vadd.xlane.f32.xlu1 %v2593_v42  ;;  %v2596_v45 = vsel %vm1420_vm3, %v2432_v39, 0.0  ;;  %v2435_v53 = vmul.f32 %v5231_v40, %v5231_v40  ;;  %4978 = vmatpush3.bf16.msra.mxu0 %v4977_v34  ;;  %v3728_v39 = vld [vmem:[%s6698_s9 + $0x10] sm:$0xff] }
 0x311   :  { %v5235_v46 = vpop.eup %5234  ;;  %5252 = vrcp.f32 %v2246_v41  ;;  %v2249_v47 = vadd.f32 1.0, %v5233_v44  ;;  %4901 = vmatmul.mubr.msk.f32.gmra.mrb[114].mxu1 %vm1420_vm3, %v5225_v35  ;;  %4979 = vmatprep.subr.bf16.mxu0 %v5345_v30 }
 0x312   :  { %v5237_v48 = vpop.eup %5236  ;;  %v2248_v49 = vadd.f32 1.0, %v5235_v46  ;;  %v2605_v62 = vsel %vm1420_vm3, %v2435_v53, 0.0 }
 0x313   :  { %v5239_v50 = vpop.eup %5238  ;;  %5254 = vrcp.f32 %v2249_v47  ;;  %v2251_v51 = vadd.f32 1.0, %v5237_v48  ;;  %2597 = vadd.xlane.f32.xlu0 %v2596_v45  ;;  %v3730_v48 = vld [vmem:[%s6698_s9 + $0x20] sm:$0xff] }
 0x314   :  { %v5241_v54 = vpop.eup %5240  ;;  %5256 = vrcp.f32 %v2248_v49  ;;  %4903 = vmatprep.mubr.msk.f32.mxu1 %vm1420_vm3, %v5239_v50  ;;  %2600 = vadd.xlane.f32.xlu1 %v2599_v52  ;;  %v2434_v55 = vmul.f32 %v5239_v50, %v5239_v50  ;;  %v3731_v49 = vld [vmem:[%s6698_s9 + $0x28] sm:$0xff] }
 0x315   :  { %v5243_v56 = vpop.eup %5242  ;;  %4904 = vmatmul.mubr.msk.f32.gmra.mrb[116].mxu1 %vm1420_vm3, %v5231_v40  ;;  %5258 = vrcp.f32 %v2251_v51  ;;  %v2437_v63 = vmul.f32 %v5241_v54, %v5241_v54  ;;  %v3729_v40 = vld [vmem:[%s6698_s9 + $0x18] sm:$0xff]  ;;  %v4983_v50 = vpack.c.bf16 %v3731_v49, %v3730_v48 }
 0x316   :  { %v5245_v57 = vpop.eup %5244  ;;  %v2250_v58 = vadd.f32 1.0, %v5243_v56  ;;  %v2602_v59 = vsel %vm1420_vm3, %v2434_v55, 0.0  ;;  %v4980_v41 = vpack.c.bf16 %v3729_v40, %v3728_v39  ;;  %v3732_v55 = vld [vmem:[%s6698_s9 + $0x30] sm:$0xff]  ;;  %v3733_v56 = vld [vmem:[%s6698_s9 + $0x38] sm:$0xff] }
 0x317   :  { %v5247_v60 = vpop.eup %5246  ;;  %v2253_v61 = vadd.f32 1.0, %v5245_v57  ;;  %2603 = vadd.xlane.f32.xlu0 %v2602_v59  ;;  %v2611_v6 = vsel %vm1420_vm3, %v2437_v63, 0.0 }
 0x318   :  { %v5249_v0 = vpop.eup %5248  ;;  %5260 = vrcp.f32 %v2250_v58  ;;  %4906 = vmatprep.mubr.msk.f32.mxu1 %vm1420_vm3, %v5247_v60  ;;  %2606 = vadd.xlane.f32.xlu1 %v2605_v62  ;;  %v2436_v1 = vmul.f32 %v5247_v60, %v5247_v60  ;;  %v4986_v58 = vpack.c.bf16 %v3733_v56, %v3732_v55 }
 0x319   :  { %v5251_v2 = vpop.eup %5250  ;;  %4907 = vmatmul.mubr.msk.f32.gmra.mrb[118].mxu1 %vm1420_vm3, %v5241_v54  ;;  %5262 = vrcp.f32 %v2253_v61  ;;  %v2439_v8 = vmul.f32 %v5249_v0, %v5249_v0  ;;  %4981 = vmatpush3.bf16.msra.mxu0 %v4980_v41 }
 0x31a   :  { %v2252_v3 = vadd.f32 1.0, %v5251_v2  ;;  %v2608_v4 = vsel %vm1420_vm3, %v2436_v1, 0.0  ;;  %4982 = vmatprep.subr.bf16.mxu0 %v5345_v30 }
 0x31b   :  { %v5253_v5 = vpop.eup %5252  ;;  %2609 = vadd.xlane.f32.xlu0 %v2608_v4  ;;  %v2617_v13 = vsel %vm1420_vm3, %v2439_v8, 0.0  ;;  %v6247_v4 = vld [vmem:[%s6697_s8] ss:$0 sm:$0xff] }
 0x31c   :  { %5264 = vrcp.f32 %v2252_v3  ;;  %4909 = vmatprep.mubr.msk.f32.mxu1 %vm1420_vm3, %v5253_v5  ;;  %2612 = vadd.xlane.f32.xlu1 %v2611_v6  ;;  %v2438_v9 = vmul.f32 %v5253_v5, %v5253_v5 }
 0x31d   :  { %v5255_v10 = vpop.eup %5254  ;;  %4910 = vmatmul.mubr.msk.f32.gmra.mrb[120].mxu1 %vm1420_vm3, %v5249_v0  ;;  %4984 = vmatpush3.bf16.msra.mxu0 %v4983_v50 }
 0x31e   :  { %v5257_v11 = vpop.eup %5256  ;;  %v2614_v12 = vsel %vm1420_vm3, %v2438_v9, 0.0  ;;  %v2441_v15 = vmul.f32 %v5255_v10, %v5255_v10  ;;  %4985 = vmatprep.subr.bf16.mxu0 %v5345_v30 }
 0x31f   :  { %2615 = vadd.xlane.f32.xlu0 %v2614_v12  ;;  %4912 = vmatprep.mubr.msk.f32.mxu1 %vm1420_vm3, %v5257_v11  ;;  %v2440_v14 = vmul.f32 %v5257_v11, %v5257_v11  ;;  %v5259_v16 = vpop.eup %5258  ;;  %v3734_v11 = vld [vmem:[%s6698_s9 + $0x40] sm:$0xff]  ;;  %v3735_v12 = vld [vmem:[%s6698_s9 + $0x48] sm:$0xff] }
 0x320   :  { %2618 = vadd.xlane.f32.xlu1 %v2617_v13  ;;  %v2623_v19 = vsel %vm1420_vm3, %v2441_v15, 0.0  ;;  %v2443_v21 = vmul.f32 %v5259_v16, %v5259_v16  ;;  %v4989_v15 = vpack.c.bf16 %v3735_v12, %v3734_v11 }
 0x321   :  { %4913 = vmatmul.mubr.msk.f32.gmra.mrb[122].mxu1 %vm1420_vm3, %v5255_v10  ;;  %v2620_v17 = vsel %vm1420_vm3, %v2440_v14, 0.0  ;;  %4987 = vmatpush3.bf16.msra.mxu0 %v4986_v58  ;;  %v3736_v58 = vld [vmem:[%s6698_s9 + $0x50] sm:$0xff] }
 0x322   :  { %v5261_v18 = vpop.eup %5260  ;;  %v2629_v26 = vsel %vm1420_vm3, %v2443_v21, 0.0  ;;  %4988 = vmatprep.subr.bf16.mxu0 %v5345_v30 }
 0x323   :  { %2621 = vadd.xlane.f32.xlu0 %v2620_v17  ;;  %4915 = vmatprep.mubr.msk.f32.mxu1 %vm1420_vm3, %v5261_v18  ;;  %v2442_v20 = vmul.f32 %v5261_v18, %v5261_v18  ;;  %v5263_v22 = vpop.eup %5262 }
 0x324   :  { %2624 = vadd.xlane.f32.xlu1 %v2623_v19  ;;  %v2445_v27 = vmul.f32 %v5263_v22, %v5263_v22 }
 0x325   :  { %4916 = vmatmul.mubr.msk.f32.gmra.mrb[124].mxu1 %vm1420_vm3, %v5259_v16  ;;  %v2626_v24 = vsel %vm1420_vm3, %v2442_v20, 0.0  ;;  %4990 = vmatpush3.bf16.msra.mxu0 %v4989_v15 }
 0x326   :  { %v5265_v25 = vpop.eup %5264  ;;  %v2635_v29 = vsel %vm1420_vm3, %v2445_v27, 0.0  ;;  %4991 = vmatprep.subr.bf16.mxu0 %v5345_v30 }
 0x327   :  { %2627 = vadd.xlane.f32.xlu0 %v2626_v24  ;;  %4918 = vmatprep.mubr.msk.f32.mxu1 %vm1420_vm3, %v5265_v25  ;;  %v2444_v7 = vmul.f32 %v5265_v25, %v5265_v25 }
 0x328   :  { %2630 = vadd.xlane.f32.xlu1 %v2629_v26 }
 0x329   :  { %4919 = vmatmul.mubr.msk.f32.gmra.mrb[126].mxu1 %vm1420_vm3, %v5263_v22  ;;  %v2632_v28 = vsel %vm1420_vm3, %v2444_v7, 0.0 }
 0x32b   :  { %2633 = vadd.xlane.f32.xlu0 %v2632_v28 }
 0x32c   :  { %2636 = vadd.xlane.f32.xlu1 %v2635_v29 }
 0x338   :  { %v2451_v35 = vpop.xlane.xlu0 %2450 }
 0x33c   :  { %v6184_v33 = vpop.xlane.xlu1 %2456  ;;  %v2448_v23 = vpop.xlane.xlu0 %2447 }
 0x340   :  { %v6187_v36 = vpop.xlane.xlu1 %2453 }
 0x341   :  { %v6191_v38 = vpop.xlane.xlu0 %2459 }
 0x344   :  { %v6189_v37 = vpop.xlane.xlu1 %2462 }
 0x347   :  { %v6201_v43 = vpop.xlane.xlu0 %2465 }
 0x348   :  { %v6199_v42 = vpop.xlane.xlu1 %2468 }
 0x34b   :  { %v6206_v45 = vpop.xlane.xlu0 %2471 }
 0x34c   :  { %v6204_v44 = vpop.xlane.xlu1 %2474 }
 0x34f   :  { %v6210_v47 = vpop.xlane.xlu0 %2477 }
 0x350   :  { %v6208_v46 = vpop.xlane.xlu1 %2480 }
 0x353   :  { %v6221_v52 = vpop.xlane.xlu0 %2483 }
 0x354   :  { %v6218_v51 = vpop.xlane.xlu1 %2486 }
 0x357   :  { %v6225_v54 = vpop.xlane.xlu0 %2489 }
 0x358   :  { %v6223_v53 = vpop.xlane.xlu1 %2492 }
 0x35b   :  { %v6235_v59 = vpop.xlane.xlu0 %2495 }
 0x35c   :  { %v6233_v57 = vpop.xlane.xlu1 %2498 }
 0x360   :  { %v6238_v60 = vpop.xlane.xlu1 %2504  ;;  %v6240_v61 = vpop.xlane.xlu0 %2501 }
 0x364   :  { %v6242_v2 = vpop.xlane.xlu1 %2510  ;;  %v6249_v5 = vpop.xlane.xlu0 %2507 }
 0x368   :  { %v6261_v21 = vpop.xlane.xlu1 %2516  ;;  %v6265_v26 = vpop.xlane.xlu0 %2513 }
 0x36c   :  { %v6274_v40 = vpop.xlane.xlu1 %2522  ;;  %v6277_v49 = vpop.xlane.xlu0 %2519 }
 0x370   :  { %v6291_v11 = vpop.xlane.xlu1 %2528 }
 0x37d   :  { %v4827_v62 = vpop.f32.mrb[64].mxu1 }
 0x37e   :  { %v3220_v63 = vmul.f32 2.0, %v4827_v62  ;;  %v2900_v0 = vpop.f32.mrb[65].mxu1  ;;  %v3737_v62 = vld [vmem:[%s6698_s9 + $0x58] sm:$0xff] }
 0x37f   :  { %v3219_v1 = vmul.f32 2.0, %v2900_v0 }
 0x380   :  { %v3284_v3 = vsub.f32 %v2451_v35, %v3220_v63 }
 0x381   :  { %v3283_v6 = vsub.f32 %v2448_v23, %v3219_v1  ;;  %v4830_v8 = vpop.f32.mrb[66].mxu1 }
 0x382   :  { %v3222_v9 = vmul.f32 2.0, %v4830_v8  ;;  %v2910_v10 = vpop.f32.mrb[67].mxu1  ;;  %v3355_v17 = vadd.f32 %v6247_v4, %v3284_v3  ;;  %v4992_v3 = vpack.c.bf16 %v3737_v62, %v3736_v58 }
 0x383   :  { %v3221_v13 = vmul.f32 2.0, %v2910_v10  ;;  %v3354_v14 = vadd.f32 %v6247_v4, %v3283_v6 }
 0x384   :  { %v3286_v16 = vsub.f32 %v6184_v33, %v3222_v9  ;;  %v3419_v29 = vmax.f32 %v3355_v17, 0.0  ;;  %4993 = vmatpush3.bf16.msra.mxu0 %v4992_v3  ;;  %v3739_v3 = vld [vmem:[%s6698_s9 + $0x68] sm:$0xff] }
 0x385   :  { %v3285_v18 = vsub.f32 %v6187_v36, %v3221_v13  ;;  %v4833_v19 = vpop.f32.mrb[68].mxu1  ;;  %v3418_v20 = vmax.f32 %v3354_v14, 0.0  ;;  %4994 = vmatprep.subr.bf16.mxu0 %v5345_v30 }
 0x386   :  { %v3224_v22 = vmul.f32 2.0, %v4833_v19  ;;  %v2920_v24 = vpop.f32.mrb[69].mxu1  ;;  %v3357_v25 = vadd.f32 %v6247_v4, %v3286_v16 }
 0x387   :  { %v3356_v7 = vadd.f32 %v6247_v4, %v3285_v18  ;;  %v3223_v27 = vmul.f32 2.0, %v2920_v24  ;;  %3482 = vxpose.xlu0.b32.start [1/16] (narrow) %v3418_v20, 16 }
 0x388   :  { %v3288_v28 = vsub.f32 %v6189_v37, %v3224_v22  ;;  %v3421_v31 = vmax.f32 %v3357_v25, 0.0 }
 0x389   :  { %v3420_v32 = vmax.f32 %v3356_v7, 0.0  ;;  %v3287_v33 = vsub.f32 %v6191_v38, %v3223_v27 }
 0x38a   :  { %v3620_v34 = vmin.f32 %v3419_v29, %v3421_v31  ;;  %v6271_v35 = vadd.f32 %v6247_v4, %v3288_v28 }
 0x38b   :  { %v3619_v36 = vmin.f32 %v3418_v20, %v3420_v32  ;;  %v4836_v23 = vpop.f32.mrb[70].mxu1  ;;  %3483 = vxpose.xlu0.b32.cont [2/16] (narrow) %v3419_v29, 16  ;;  %v3358_v39 = vadd.f32 %v6247_v4, %v3287_v33  ;;  %v6311_v29 = vpop.xlane.xlu1 %2534 }
 0x38c   :  { %v3226_v41 = vmul.f32 2.0, %v4836_v23  ;;  %v2930_v48 = vpop.f32.mrb[71].mxu1  ;;  %v3423_v37 = vmax.f32 %v6271_v35, 0.0 }
 0x38d   :  { %v3225_v50 = vmul.f32 2.0, %v2930_v48  ;;  %v3422_v55 = vmax.f32 %v3358_v39, 0.0 }
 0x38e   :  { %v3290_v38 = vsub.f32 %v6199_v42, %v3226_v41  ;;  %v3622_v56 = vmin.f32 %v3620_v34, %v3423_v37 }
 0x38f   :  { %v3289_v63 = vsub.f32 %v6201_v43, %v3225_v50  ;;  %v4839_v0 = vpop.f32.mrb[72].mxu1  ;;  %3484 = vxpose.xlu0.b32.cont [3/16] (narrow) %v3420_v32, 16  ;;  %v3621_v1 = vmin.f32 %v3619_v36, %v3422_v55  ;;  %v6296_v43 = vpop.xlane.xlu0 %2525 }
 0x390   :  { %v3228_v6 = vmul.f32 2.0, %v4839_v0  ;;  %v2940_v8 = vpop.f32.mrb[73].mxu1  ;;  %v6288_v9 = vadd.f32 %v6247_v4, %v3290_v38  ;;  %v6337_v0 = vpop.xlane.xlu1 %2540 }
 0x391   :  { %v3227_v42 = vmul.f32 2.0, %v2940_v8  ;;  %v3360_v10 = vadd.f32 %v6247_v4, %v3289_v63 }
 0x392   :  { %v3292_v12 = vsub.f32 %v6204_v44, %v3228_v6  ;;  %v3425_v13 = vmax.f32 %v6288_v9, 0.0 }
 0x393   :  { %v3291_v14 = vsub.f32 %v6206_v45, %v3227_v42  ;;  %v4842_v15 = vpop.f32.mrb[74].mxu1  ;;  %3485 = vxpose.xlu0.b32.cont [4/16] (narrow) %v3421_v31, 16  ;;  %v3424_v16 = vmax.f32 %v3360_v10, 0.0  ;;  %v6318_v35 = vpop.xlane.xlu0 %2531 }
 0x394   :  { %v3230_v17 = vmul.f32 2.0, %v4842_v15  ;;  %v2950_v18 = vpop.f32.mrb[75].mxu1  ;;  %v3624_v19 = vmin.f32 %v3622_v56, %v3425_v13  ;;  %v6302_v20 = vadd.f32 %v6247_v4, %v3292_v12 }
 0x395   :  { %v3229_v44 = vmul.f32 2.0, %v2950_v18  ;;  %v3623_v22 = vmin.f32 %v3621_v1, %v3424_v16  ;;  %v6305_v24 = vadd.f32 %v6247_v4, %v3291_v14  ;;  %v3738_v1 = vld [vmem:[%s6698_s9 + $0x60] sm:$0xff] }
 0x396   :  { %v3294_v25 = vsub.f32 %v6208_v46, %v3230_v17  ;;  %v3427_v45 = vmax.f32 %v6302_v20, 0.0  ;;  %v4995_v12 = vpack.c.bf16 %v3739_v3, %v3738_v1 }
 0x397   :  { %v3293_v7 = vsub.f32 %v6210_v47, %v3229_v44  ;;  %v4845_v27 = vpop.f32.mrb[76].mxu1  ;;  %3486 = vxpose.xlu0.b32.cont [5/16] (narrow) %v3422_v55, 16  ;;  %v3426_v28 = vmax.f32 %v6305_v24, 0.0  ;;  %v6347_v6 = vpop.xlane.xlu0 %2537 }
 0x398   :  { %v3232_v31 = vmul.f32 2.0, %v4845_v27  ;;  %v2960_v32 = vpop.f32.mrb[77].mxu1  ;;  %v3626_v33 = vmin.f32 %v3624_v19, %v3427_v45  ;;  %v6316_v34 = vadd.f32 %v6247_v4, %v3294_v25  ;;  %4996 = vmatpush3.bf16.msra.mxu0 %v4995_v12  ;;  %v6368_v25 = vpop.xlane.xlu1 %2546 }
 0x399   :  { %v6321_v46 = vadd.f32 %v6247_v4, %v3293_v7  ;;  %v3231_v47 = vmul.f32 2.0, %v2960_v32  ;;  %v3625_v36 = vmin.f32 %v3623_v22, %v3426_v28  ;;  %4997 = vmatprep.subr.bf16.mxu0 %v5345_v30 }
 0x39a   :  { %v3296_v23 = vsub.f32 %v6218_v51, %v3232_v31  ;;  %v3429_v39 = vmax.f32 %v6316_v34, 0.0 }
 0x39b   :  { %v3428_v41 = vmax.f32 %v6321_v46, 0.0  ;;  %v3295_v48 = vsub.f32 %v6221_v52, %v3231_v47  ;;  %v4848_v50 = vpop.f32.mrb[78].mxu1  ;;  %3487 = vxpose.xlu0.b32.cont [6/16] (narrow) %v3423_v37, 16 }
 0x39c   :  { %v3234_v55 = vmul.f32 2.0, %v4848_v50  ;;  %v2970_v38 = vpop.f32.mrb[79].mxu1  ;;  %v3628_v56 = vmin.f32 %v3626_v33, %v3429_v39  ;;  %v6330_v58 = vadd.f32 %v6247_v4, %v3296_v23 }
 0x39d   :  { %v6333_v62 = vadd.f32 %v6247_v4, %v3295_v48  ;;  %v3233_v51 = vmul.f32 2.0, %v2970_v38  ;;  %v3627_v63 = vmin.f32 %v3625_v36, %v3428_v41  ;;  %v3741_v36 = vld [vmem:[%s6698_s9 + $0x78] sm:$0xff] }
 0x39e   :  { %v3298_v52 = vsub.f32 %v6223_v53, %v3234_v55  ;;  %v3431_v37 = vmax.f32 %v6330_v58, 0.0  ;;  %v5347_v55 = vmov 0.0  }
 0x39f   :  { %v3430_v8 = vmax.f32 %v6333_v62, 0.0  ;;  %v3297_v42 = vsub.f32 %v6225_v54, %v3233_v51  ;;  %v4851_v10 = vpop.f32.mrb[80].mxu1  ;;  %3488 = vxpose.xlu0.b32.cont [7/16] (narrow) %v3424_v16, 16  ;;  %4953 = vmatprep.mubr.msk.f32.mxu0 %vm5346_vm4, %v5347_v55 }
 0x3a0   :  { %v3236_v53 = vmul.f32 2.0, %v4851_v10  ;;  %v2980_v14 = vpop.f32.mrb[81].mxu1  ;;  %v3630_v15 = vmin.f32 %v3628_v56, %v3431_v37  ;;  %v6354_v17 = vadd.f32 %v6247_v4, %v3298_v52 }
 0x3a1   :  { %v6357_v18 = vadd.f32 %v6247_v4, %v3297_v42  ;;  %v3235_v19 = vmul.f32 2.0, %v2980_v14  ;;  %v3629_v44 = vmin.f32 %v3627_v63, %v3430_v8  ;;  %v6387_v42 = vpop.xlane.xlu1 %2552 }
 0x3a2   :  { %v3300_v54 = vsub.f32 %v6233_v57, %v3236_v53  ;;  %v3433_v16 = vmax.f32 %v6354_v17, 0.0  ;;  %v6373_v57 = vpop.xlane.xlu0 %2543 }
 0x3a3   :  { %v3432_v22 = vmax.f32 %v6357_v18, 0.0  ;;  %v3299_v24 = vsub.f32 %v6235_v59, %v3235_v19  ;;  %3489 = vxpose.xlu0.b32.cont [8/16] (narrow) %v3425_v13, 16  ;;  %v3740_v13 = vld [vmem:[%s6698_s9 + $0x70] sm:$0xff]  ;;  %s5349_s9 = smov [#allocation4]  }
 0x3a4   :  { %v4854_v7 = vpop.f32.mrb[82].mxu1  ;;  %v3371_v27 = vadd.f32 %v6247_v4, %v3300_v54  ;;  %v3632_v31 = vmin.f32 %v3630_v15, %v3433_v16  ;;  %v4998_v50 = vpack.c.bf16 %v3741_v36, %v3740_v13  ;;  %s3874_s25 = sshll.u32 %s5349_s9, 4  ;;  %s3875_s25 = int_to_ptr.vmem [resolvable:$true] %s3874_s25 }
 0x3a5   :  { %v3238_v32 = vmul.f32 2.0, %v4854_v7  ;;  %v2990_v33 = vpop.f32.mrb[83].mxu1  ;;  %v3370_v30 = vadd.f32 %v6247_v4, %v3299_v24  ;;  %v3631_v59 = vmin.f32 %v3629_v44, %v3432_v22  ;;  %s5275_s26 = scalar_lea.vmem %s3875_s25, 32  ;;  %p5280_p1 = scmp.lt.s32.totalorder %s3875_s25, %s3875_s25 }
 0x3a6   :  { %v3237_v47 = vmul.f32 2.0, %v2990_v33  ;;  %v3435_v9 = vmax.f32 %v3371_v27, 0.0  ;;  %4999 = vmatpush3.bf16.msra.mxu0 %v4998_v50  ;;  %v6390_v10 = vpop.xlane.xlu0 %2549  ;;  %p5276_p0 = scmp.ne.s32.totalorder %s3875_s25, %s5275_s26  ;;  %p5281_p2 = scmp.lt.s32.totalorder %s5275_s26, %s5275_s26 }
 0x3a7   :  { %v3302_v23 = vsub.f32 %v6238_v60, %v3238_v32  ;;  %3490 = vxpose.xlu0.b32.cont [9/16] (narrow) %v3426_v28, 16  ;;  %v3434_v48 = vmax.f32 %v3370_v30, 0.0 }
 0x3a8   :  { %v3301_v38 = vsub.f32 %v6240_v61, %v3237_v47  ;;  %v4857_v56 = vpop.f32.mrb[84].mxu1  ;;  %v3634_v51 = vmin.f32 %v3632_v31, %v3435_v9  ;;  %p5282_p3 = por %p5281_p2, %p5280_p1 }
 0x3a9   :  { %v3240_v63 = vmul.f32 2.0, %v4857_v56  ;;  %v3000_v52 = vpop.f32.mrb[85].mxu1  ;;  %3514 = vxpose.xlu1.b32.start [1/16] (narrow) %v3434_v48, 16  ;;  %v3633_v1 = vmin.f32 %v3631_v59, %v3434_v48  ;;  %v3373_v3 = vadd.f32 %v6247_v4, %v3302_v23 }
 0x3aa   :  { %v3239_v60 = vmul.f32 2.0, %v3000_v52  ;;  %v3372_v28 = vadd.f32 %v6247_v4, %v3301_v38  ;;  %v6404_v30 = vpop.xlane.xlu0 %2555  ;;  %p5283_p4 = pnand %p5282_p3, %p5276_p0 }
 0x3ab   :  { %v3304_v12 = vsub.f32 %v6242_v2, %v3240_v63  ;;  %3491 = vxpose.xlu0.b32.cont [10/16] (narrow) %v3427_v45, 16  ;;  %v3437_v61 = vmax.f32 %v3373_v3, 0.0  ;;  %v6401_v45 = vpop.xlane.xlu1 %2558 }
 0x3ac   :  { %v3303_v53 = vsub.f32 %v6249_v5, %v3239_v60  ;;  %v4860_v14 = vpop.f32.mrb[86].mxu1  ;;  %v3436_v15 = vmax.f32 %v3372_v28, 0.0 }
 0x3ad   :  { %v3242_v19 = vmul.f32 2.0, %v4860_v14  ;;  %v3010_v44 = vpop.f32.mrb[87].mxu1  ;;  %3515 = vxpose.xlu1.b32.cont [2/16] (narrow) %v3435_v9, 16  ;;  %v3375_v54 = vadd.f32 %v6247_v4, %v3304_v12  ;;  %v3636_v24 = vmin.f32 %v3634_v51, %v3437_v61 }
 0x3ae   :  { %v3241_v7 = vmul.f32 2.0, %v3010_v44  ;;  %v3635_v27 = vmin.f32 %v3633_v1, %v3436_v15  ;;  %v3374_v31 = vadd.f32 %v6247_v4, %v3303_v53  ;;  %v6425_v52 = vpop.xlane.xlu0 %2561 }
 0x3af   :  { %v3306_v2 = vsub.f32 %v6261_v21, %v3242_v19  ;;  %3492 = vxpose.xlu0.b32.cont [11/16] (narrow) %v3428_v41, 16  ;;  %v3439_v20 = vmax.f32 %v3375_v54, 0.0  ;;  %v6420_v63 = vpop.xlane.xlu1 %2564 }
 0x3b0   :  { %v3305_v5 = vsub.f32 %v6265_v26, %v3241_v7  ;;  %v4863_v32 = vpop.f32.mrb[88].mxu1  ;;  %v3438_v33 = vmax.f32 %v3374_v31, 0.0 }
 0x3b1   :  { %v3244_v59 = vmul.f32 2.0, %v4863_v32  ;;  %v3020_v47 = vpop.f32.mrb[89].mxu1  ;;  %3516 = vxpose.xlu1.b32.cont [3/16] (narrow) %v3436_v15, 16  ;;  %v6407_v9 = vadd.f32 %v6247_v4, %v3306_v2  ;;  %v3638_v13 = vmin.f32 %v3636_v24, %v3439_v20 }
 0x3b2   :  { %v3243_v21 = vmul.f32 2.0, %v3020_v47  ;;  %v3637_v36 = vmin.f32 %v3635_v27, %v3438_v33  ;;  %v3376_v46 = vadd.f32 %v6247_v4, %v3305_v5  ;;  %v6451_v7 = vpop.xlane.xlu0 %2567 }
 0x3b3   :  { %v3308_v41 = vsub.f32 %v6274_v40, %v3244_v59  ;;  %3493 = vxpose.xlu0.b32.cont [12/16] (narrow) %v3429_v39, 16  ;;  %v3441_v26 = vmax.f32 %v6407_v9, 0.0  ;;  %v6447_v19 = vpop.xlane.xlu1 %2570 }
 0x3b4   :  { %v3307_v23 = vsub.f32 %v6277_v49, %v3243_v21  ;;  %v4866_v48 = vpop.f32.mrb[90].mxu1  ;;  %v3440_v50 = vmax.f32 %v3376_v46, 0.0 }
 0x3b5   :  { %v3246_v55 = vmul.f32 2.0, %v4866_v48  ;;  %v3030_v38 = vpop.f32.mrb[91].mxu1  ;;  %3517 = vxpose.xlu1.b32.cont [4/16] (narrow) %v3437_v61, 16  ;;  %v3640_v56 = vmin.f32 %v3638_v13, %v3441_v26  ;;  %v6418_v51 = vadd.f32 %v6247_v4, %v3308_v41 }
 0x3b6   :  { %v3245_v40 = vmul.f32 2.0, %v3030_v38  ;;  %v3639_v34 = vmin.f32 %v3637_v36, %v3440_v50  ;;  %v6423_v39 = vadd.f32 %v6247_v4, %v3307_v23  ;;  %v6481_v46 = vpop.xlane.xlu0 %2573 }
 0x3b7   :  { %v3310_v49 = vsub.f32 %v6291_v11, %v3246_v55  ;;  %3494 = vxpose.xlu0.b32.cont [13/16] (narrow) %v3430_v8, 16  ;;  %v3443_v1 = vmax.f32 %v6418_v51, 0.0 }
 0x3b8   :  { %v3309_v3 = vsub.f32 %v6296_v43, %v3245_v40  ;;  %v4869_v60 = vpop.f32.mrb[92].mxu1  ;;  %v3442_v28 = vmax.f32 %v6423_v39, 0.0 }
 0x3b9   :  { %v3248_v12 = vmul.f32 2.0, %v4869_v60  ;;  %v3040_v61 = vpop.f32.mrb[93].mxu1  ;;  %3518 = vxpose.xlu1.b32.cont [5/16] (narrow) %v3438_v33, 16  ;;  %v3642_v53 = vmin.f32 %v3640_v56, %v3443_v1  ;;  %v6436_v14 = vadd.f32 %v6247_v4, %v3310_v49 }
 0x3ba   :  { %v3247_v11 = vmul.f32 2.0, %v3040_v61  ;;  %v3641_v62 = vmin.f32 %v3639_v34, %v3442_v28  ;;  %v6441_v8 = vadd.f32 %v6247_v4, %v3309_v3 }
 0x3bb   :  { %v3312_v43 = vsub.f32 %v6311_v29, %v3248_v12  ;;  %3495 = vxpose.xlu0.b32.cont [14/16] (narrow) %v3431_v37, 16  ;;  %v3445_v15 = vmax.f32 %v6436_v14, 0.0  ;;  %v6501_v12 = vpop.xlane.xlu0 %2579 }
 0x3bc   :  { %v3311_v44 = vsub.f32 %v6318_v35, %v3247_v11  ;;  %v4872_v54 = vpop.f32.mrb[94].mxu1  ;;  %v3444_v24 = vmax.f32 %v6441_v8, 0.0 }
 0x3bd   :  { %v3250_v27 = vmul.f32 2.0, %v4872_v54  ;;  %v3050_v31 = vpop.f32.mrb[95].mxu1  ;;  %3519 = vxpose.xlu1.b32.cont [6/16] (narrow) %v3439_v20, 16  ;;  %v3644_v29 = vmin.f32 %v3642_v53, %v3445_v15  ;;  %v6456_v58 = vadd.f32 %v6247_v4, %v3312_v43 }
 0x3be   :  { %v3249_v37 = vmul.f32 2.0, %v3050_v31  ;;  %v3643_v2 = vmin.f32 %v3641_v62, %v3444_v24  ;;  %v6461_v35 = vadd.f32 %v6247_v4, %v3311_v44 }
 0x3bf   :  { %v3314_v5 = vsub.f32 %v6337_v0, %v3250_v27  ;;  %3496 = vxpose.xlu0.b32.cont [15/16] (narrow) %v3432_v22, 16  ;;  %v3447_v20 = vmax.f32 %v6456_v58, 0.0  ;;  %v6474_v0 = vpop.xlane.xlu1 %2576 }
 0x3c0   :  { %v3313_v32 = vsub.f32 %v6347_v6, %v3249_v37  ;;  %v4875_v33 = vpop.f32.mrb[96].mxu1  ;;  %v3446_v59 = vmax.f32 %v6461_v35, 0.0 }
 0x3c1   :  { %v3252_v47 = vmul.f32 2.0, %v4875_v33  ;;  %v3060_v13 = vpop.f32.mrb[97].mxu1  ;;  %3520 = vxpose.xlu1.b32.cont [7/16] (narrow) %v3440_v50, 16  ;;  %v3646_v21 = vmin.f32 %v3644_v29, %v3447_v20  ;;  %v6472_v36 = vadd.f32 %v6247_v4, %v3314_v5 }
 0x3c2   :  { %v3251_v18 = vmul.f32 2.0, %v3060_v13  ;;  %v3645_v22 = vmin.f32 %v3643_v2, %v3446_v59  ;;  %v6479_v6 = vadd.f32 %v6247_v4, %v3313_v32 }
 0x3c3   :  { %v3316_v41 = vsub.f32 %v6368_v25, %v3252_v47  ;;  %3497 = vxpose.xlu0.b32.end [16/16] (narrow) %v3433_v16, 16  ;;  %v3449_v23 = vmax.f32 %v6472_v36, 0.0  ;;  %v6498_v49 = vpop.xlane.xlu1 %2582 }
 0x3c4   :  { %v3315_v48 = vsub.f32 %v6373_v57, %v3251_v18  ;;  %v4878_v50 = vpop.f32.mrb[98].mxu1  ;;  %v3448_v55 = vmax.f32 %v6479_v6, 0.0 }
 0x3c5   :  { %v3254_v38 = vmul.f32 2.0, %v4878_v50  ;;  %v3070_v56 = vpop.f32.mrb[99].mxu1  ;;  %3521 = vxpose.xlu1.b32.cont [8/16] (narrow) %v3441_v26, 16  ;;  %v3648_v40 = vmin.f32 %v3646_v21, %v3449_v23  ;;  %v3387_v57 = vadd.f32 %v6247_v4, %v3316_v41 }
 0x3c6   :  { %v3253_v34 = vmul.f32 2.0, %v3070_v56  ;;  %v3386_v25 = vadd.f32 %v6247_v4, %v3315_v48  ;;  %v3647_v17 = vmin.f32 %v3645_v22, %v3448_v55 }
 0x3c7   :  { %v3318_v16 = vsub.f32 %v6387_v42, %v3254_v38  ;;  %v6514_v32 = vpop.xlane.xlu1 %2588 }
 0x3c8   :  { %v3317_v3 = vsub.f32 %v6390_v10, %v3253_v34  ;;  %v4881_v60 = vpop.f32.mrb[100].mxu1  ;;  %v3450_v9 = vmax.f32 %v3386_v25, 0.0  ;;  %v3649_v26 = vmin.f32 %v3647_v17, %v3648_v40  ;;  %v3451_v10 = vmax.f32 %v3387_v57, 0.0 }
 0x3c9   :  { %v3256_v61 = vmul.f32 2.0, %v4881_v60  ;;  %v3080_v53 = vpop.f32.mrb[101].mxu1  ;;  %3522 = vxpose.xlu1.b32.cont [9/16] (narrow) %v3442_v28, 16  ;;  %v3389_v11 = vadd.f32 %v6247_v4, %v3318_v16 }
 0x3ca   :  { %v3388_v42 = vadd.f32 %v6247_v4, %v3317_v3  ;;  %v3255_v62 = vmul.f32 2.0, %v3080_v53  ;;  %3550 = vxpose.xlu0.b32.start [1/16] (narrow) %v3450_v9, 16  ;;  %v3650_v43 = vrot.slane %v3649_v26, 4 }
 0x3cb   :  { %v3320_v44 = vsub.f32 %v6401_v45, %v3256_v61  ;;  %v3453_v54 = vmax.f32 %v3389_v11, 0.0  ;;  %v6532_v16 = vpop.xlane.xlu1 %2594 }
 0x3cc   :  { %v3452_v27 = vmax.f32 %v3388_v42, 0.0  ;;  %v3319_v31 = vsub.f32 %v6404_v30, %v3255_v62  ;;  %v4884_v29 = vpop.f32.mrb[102].mxu1  ;;  %v3651_v37 = vmin.f32 %v3649_v26, %v3650_v43  ;;  %v6517_v30 = vpop.xlane.xlu0 %2585 }
 0x3cd   :  { %v3258_v2 = vmul.f32 2.0, %v4884_v29  ;;  %v3090_v5 = vpop.f32.mrb[103].mxu1  ;;  %3523 = vxpose.xlu1.b32.cont [10/16] (narrow) %v3443_v1, 16  ;;  %v3657_v39 = vmin.f32 %v3451_v10, %v3453_v54  ;;  %v6512_v28 = vadd.f32 %v6247_v4, %v3320_v44 }
 0x3ce   :  { %v3656_v33 = vmin.f32 %v3450_v9, %v3452_v27  ;;  %v3257_v45 = vmul.f32 2.0, %v3090_v5  ;;  %3551 = vxpose.xlu0.b32.cont [2/16] (narrow) %v3451_v10, 16  ;;  %v3390_v47 = vadd.f32 %v6247_v4, %v3319_v31  ;;  %v3652_v13 = vrot.slane %v3651_v37, 2 }
 0x3cf   :  { %v3322_v21 = vsub.f32 %v6420_v63, %v3258_v2  ;;  %v3455_v18 = vmax.f32 %v6512_v28, 0.0  ;;  %v2601_v31 = vpop.xlane.xlu1 %2600 }
 0x3d0   :  { %v3321_v51 = vsub.f32 %v6425_v52, %v3257_v45  ;;  %v4887_v1 = vpop.f32.mrb[104].mxu1  ;;  %v3454_v22 = vmax.f32 %v3390_v47, 0.0  ;;  %v3653_v41 = vmin.f32 %v3651_v37, %v3652_v13  ;;  %v6536_v60 = vpop.xlane.xlu0 %2591 }
 0x3d1   :  { %v3260_v48 = vmul.f32 2.0, %v4887_v1  ;;  %v3100_v50 = vpop.f32.mrb[105].mxu1  ;;  %3524 = vxpose.xlu1.b32.cont [11/16] (narrow) %v3444_v24, 16  ;;  %v3659_v38 = vmin.f32 %v3657_v39, %v3455_v18  ;;  %v6525_v56 = vadd.f32 %v6247_v4, %v3322_v21 }
 0x3d2   :  { %v3259_v40 = vmul.f32 2.0, %v3100_v50  ;;  %3552 = vxpose.xlu0.b32.cont [3/16] (narrow) %v3452_v27, 16  ;;  %v3658_v34 = vmin.f32 %v3656_v33, %v3454_v22  ;;  %v6528_v63 = vadd.f32 %v6247_v4, %v3321_v51  ;;  %v3654_v25 = vrot.slane %v3653_v41, 1 }
 0x3d3   :  { %v3324_v52 = vsub.f32 %v6447_v19, %v3260_v48  ;;  %v3457_v17 = vmax.f32 %v6525_v56, 0.0  ;;  %v2607_v58 = vpop.xlane.xlu1 %2606 }
 0x3d4   :  { %v3323_v8 = vsub.f32 %v6451_v7, %v3259_v40  ;;  %v4890_v24 = vpop.f32.mrb[106].mxu1  ;;  %v3456_v57 = vmax.f32 %v6528_v63, 0.0  ;;  %v3655_v3 = vmin.f32 %v3653_v41, %v3654_v25  ;;  %v2598_v37 = vpop.xlane.xlu0 %2597 }
 0x3d5   :  { %v3262_v9 = vmul.f32 2.0, %v4890_v24  ;;  %v3110_v26 = vpop.f32.mrb[107].mxu1  ;;  %3525 = vxpose.xlu1.b32.cont [12/16] (narrow) %v3445_v15, 16  ;;  %v3661_v19 = vmin.f32 %v3659_v38, %v3457_v17  ;;  %v6543_v61 = vadd.f32 %v6247_v4, %v3324_v52 }
 0x3d6   :  { %v3261_v53 = vmul.f32 2.0, %v3110_v26  ;;  %3553 = vxpose.xlu0.b32.cont [4/16] (narrow) %v3453_v54, 16  ;;  %v3660_v7 = vmin.f32 %v3658_v34, %v3456_v57  ;;  %3697 = vst [vmem:[#allocation4] sm:$0x1] %v3655_v3  ;;  %v6546_v11 = vadd.f32 %v6247_v4, %v3323_v8 }
 0x3d7   :  { %v3326_v42 = vsub.f32 %v6474_v0, %v3262_v9  ;;  %v3459_v62 = vmax.f32 %v6543_v61, 0.0  ;;  %v2613_v3 = vpop.xlane.xlu1 %2612 }
 0x3d8   :  { %v3325_v14 = vsub.f32 %v6481_v46, %v3261_v53  ;;  %v4893_v15 = vpop.f32.mrb[108].mxu1  ;;  %v3458_v43 = vmax.f32 %v6546_v11, 0.0  ;;  %v2604_v41 = vpop.xlane.xlu0 %2603 }
 0x3d9   :  { %v3264_v44 = vmul.f32 2.0, %v4893_v15  ;;  %v3120_v10 = vpop.f32.mrb[109].mxu1  ;;  %3526 = vxpose.xlu1.b32.cont [13/16] (narrow) %v3446_v59, 16  ;;  %v3663_v54 = vmin.f32 %v3661_v19, %v3459_v62  ;;  %v6557_v27 = vadd.f32 %v6247_v4, %v3326_v42 }
 0x3da   :  { %v6560_v0 = vadd.f32 %v6247_v4, %v3325_v14  ;;  %v3263_v29 = vmul.f32 2.0, %v3120_v10  ;;  %3554 = vxpose.xlu0.b32.cont [5/16] (narrow) %v3454_v22, 16  ;;  %v3662_v46 = vmin.f32 %v3660_v7, %v3458_v43 }
 0x3db   :  { %v3328_v2 = vsub.f32 %v6498_v49, %v3264_v44  ;;  %v3461_v35 = vmax.f32 %v6557_v27, 0.0 }
 0x3dc   :  { %v3460_v59 = vmax.f32 %v6560_v0, 0.0  ;;  %v3327_v5 = vsub.f32 %v6501_v12, %v3263_v29  ;;  %v4896_v39 = vpop.f32.mrb[110].mxu1  ;;  %v2610_v26 = vpop.xlane.xlu0 %2609 }
 0x3dd   :  { %v3266_v28 = vmul.f32 2.0, %v4896_v39  ;;  %v3130_v33 = vpop.f32.mrb[111].mxu1  ;;  %3527 = vxpose.xlu1.b32.cont [14/16] (narrow) %v3447_v20, 16  ;;  %v3665_v45 = vmin.f32 %v3663_v54, %v3461_v35  ;;  %v6573_v47 = vadd.f32 %v6247_v4, %v3328_v2 }
 0x3de   :  { %v6576_v49 = vadd.f32 %v6247_v4, %v3327_v5  ;;  %v3265_v13 = vmul.f32 2.0, %v3130_v33  ;;  %3555 = vxpose.xlu0.b32.cont [6/16] (narrow) %v3455_v18, 16  ;;  %v3664_v12 = vmin.f32 %v3662_v46, %v3460_v59 }
 0x3df   :  { %v3330_v21 = vsub.f32 %v6514_v32, %v3266_v28  ;;  %v3463_v51 = vmax.f32 %v6573_v47, 0.0 }
 0x3e0   :  { %v3462_v20 = vmax.f32 %v6576_v49, 0.0  ;;  %v3329_v1 = vsub.f32 %v6517_v30, %v3265_v13  ;;  %v4899_v22 = vpop.f32.mrb[112].mxu1  ;;  %v2616_v5 = vpop.xlane.xlu0 %2615 }
 0x3e1   :  { %v3268_v48 = vmul.f32 2.0, %v4899_v22  ;;  %v3140_v50 = vpop.f32.mrb[113].mxu1  ;;  %3528 = vxpose.xlu1.b32.cont [15/16] (narrow) %v3448_v55, 16  ;;  %v3667_v18 = vmin.f32 %v3665_v45, %v3463_v51  ;;  %v6589_v38 = vadd.f32 %v6247_v4, %v3330_v21 }
 0x3e2   :  { %v6592_v32 = vadd.f32 %v6247_v4, %v3329_v1  ;;  %v3267_v40 = vmul.f32 2.0, %v3140_v50  ;;  %3556 = vxpose.xlu0.b32.cont [7/16] (narrow) %v3456_v57, 16  ;;  %v3666_v30 = vmin.f32 %v3664_v12, %v3462_v20 }
 0x3e3   :  { %v3332_v34 = vsub.f32 %v6532_v16, %v3268_v48  ;;  %v3465_v63 = vmax.f32 %v6589_v38, 0.0 }
 0x3e4   :  { %v3464_v6 = vmax.f32 %v6592_v32, 0.0  ;;  %v3331_v55 = vsub.f32 %v6536_v60, %v3267_v40  ;;  %v4902_v25 = vpop.f32.mrb[114].mxu1 }
 0x3e5   :  { %v3270_v52 = vmul.f32 2.0, %v4902_v25  ;;  %v3150_v8 = vpop.f32.mrb[115].mxu1  ;;  %3529 = vxpose.xlu1.b32.end [16/16] (narrow) %v3449_v23, 16  ;;  %v3403_v24 = vadd.f32 %v6247_v4, %v3332_v34  ;;  %v3669_v57 = vmin.f32 %v3667_v18, %v3465_v63  ;;  %v2622_v34 = vpop.xlane.xlu0 %2621 }
 0x3e6   :  { %v3269_v9 = vmul.f32 2.0, %v3150_v8  ;;  %3557 = vxpose.xlu0.b32.cont [8/16] (narrow) %v3457_v17, 16  ;;  %v3402_v16 = vadd.f32 %v6247_v4, %v3331_v55  ;;  %v3668_v60 = vmin.f32 %v3666_v30, %v3464_v6 }
 0x3e7   :  { %v3334_v19 = vsub.f32 %v2601_v31, %v3270_v52  ;;  %v3467_v53 = vmax.f32 %v3403_v24, 0.0  ;;  %v2619_v31 = vpop.xlane.xlu1 %2618 }
 0x3e8   :  { %v3333_v36 = vsub.f32 %v2598_v37, %v3269_v9  ;;  %v4905_v23 = vpop.f32.mrb[116].mxu1  ;;  %v3466_v7 = vmax.f32 %v3402_v16, 0.0 }
 0x3e9   :  { %v3272_v42 = vmul.f32 2.0, %v4905_v23  ;;  %v3160_v14 = vpop.f32.mrb[117].mxu1  ;;  %v3405_v15 = vadd.f32 %v6247_v4, %v3334_v19  ;;  %v3671_v44 = vmin.f32 %v3669_v57, %v3467_v53 }
 0x3ea   :  { %v3271_v10 = vmul.f32 2.0, %v3160_v14  ;;  %3558 = vxpose.xlu0.b32.cont [9/16] (narrow) %v3458_v43, 16  ;;  %3582 = vxpose.xlu1.b32.start [1/16] (narrow) %v3466_v7, 16  ;;  %v3670_v56 = vmin.f32 %v3668_v60, %v3466_v7  ;;  %v3404_v17 = vadd.f32 %v6247_v4, %v3333_v36 }
 0x3eb   :  { %v3336_v54 = vsub.f32 %v2607_v58, %v3272_v42  ;;  %v3469_v29 = vmax.f32 %v3405_v15, 0.0  ;;  %v2625_v40 = vpop.xlane.xlu1 %2624  ;;  %v2628_v42 = vpop.xlane.xlu0 %2627 }
 0x3ec   :  { %v3335_v46 = vsub.f32 %v2604_v41, %v3271_v10  ;;  %v4908_v37 = vpop.f32.mrb[118].mxu1  ;;  %v3468_v2 = vmax.f32 %v3404_v17, 0.0 }
 0x3ed   :  { %v3274_v39 = vmul.f32 2.0, %v4908_v37  ;;  %v3170_v28 = vpop.f32.mrb[119].mxu1  ;;  %v6615_v33 = vadd.f32 %v6247_v4, %v3336_v54  ;;  %v3673_v45 = vmin.f32 %v3671_v44, %v3469_v29 }
 0x3ee   :  { %v3273_v13 = vmul.f32 2.0, %v3170_v28  ;;  %3559 = vxpose.xlu0.b32.cont [10/16] (narrow) %v3459_v62, 16  ;;  %3583 = vxpose.xlu1.b32.cont [2/16] (narrow) %v3467_v53, 16  ;;  %v3672_v11 = vmin.f32 %v3670_v56, %v3468_v2  ;;  %v3406_v43 = vadd.f32 %v6247_v4, %v3335_v46 }
 0x3ef   :  { %v3338_v12 = vsub.f32 %v2613_v3, %v3274_v39  ;;  %v3471_v21 = vmax.f32 %v6615_v33, 0.0  ;;  %v2631_v53 = vpop.xlane.xlu1 %2630 }
 0x3f0   :  { %v3337_v58 = vsub.f32 %v2610_v26, %v3273_v13  ;;  %v4911_v1 = vpop.f32.mrb[120].mxu1  ;;  %v3470_v22 = vmax.f32 %v3406_v43, 0.0 }
 0x3f1   :  { %v3276_v41 = vmul.f32 2.0, %v4911_v1  ;;  %v3180_v48 = vpop.f32.mrb[121].mxu1  ;;  %v6622_v50 = vadd.f32 %v6247_v4, %v3338_v12  ;;  %v3675_v18 = vmin.f32 %v3673_v45, %v3471_v21  ;;  %v2634_v45 = vpop.xlane.xlu0 %2633 }
 0x3f2   :  { %v3275_v30 = vmul.f32 2.0, %v3180_v48  ;;  %3560 = vxpose.xlu0.b32.cont [11/16] (narrow) %v3460_v59, 16  ;;  %3584 = vxpose.xlu1.b32.cont [3/16] (narrow) %v3468_v2, 16  ;;  %v3674_v61 = vmin.f32 %v3672_v11, %v3470_v22  ;;  %v3408_v62 = vadd.f32 %v6247_v4, %v3337_v58 }
 0x3f3   :  { %v3340_v55 = vsub.f32 %v2619_v31, %v3276_v41  ;;  %v3473_v25 = vmax.f32 %v6622_v50, 0.0  ;;  %v2637_v28 = vpop.xlane.xlu1 %2636 }
 0x3f4   :  { %v3339_v52 = vsub.f32 %v2616_v5, %v3275_v30  ;;  %v4914_v8 = vpop.f32.mrb[122].mxu1  ;;  %v3472_v24 = vmax.f32 %v3408_v62, 0.0  ;;  %v3712_v62 = vld [vmem:[#allocation4] sm:$0x1] }
 0x3f5   :  { %v3278_v57 = vmul.f32 2.0, %v4914_v8  ;;  %v3190_v3 = vpop.f32.mrb[123].mxu1  ;;  %v3677_v9 = vmin.f32 %v3675_v18, %v3473_v25  ;;  %v3411_v16 = vadd.f32 %v6247_v4, %v3340_v55  ;;  %v3716_v38 = vadd.f32 0.0001, %v3712_v62 }
 0x3f6   :  { %v3277_v60 = vmul.f32 2.0, %v3190_v3  ;;  %3561 = vxpose.xlu0.b32.cont [12/16] (narrow) %v3461_v35, 16  ;;  %3585 = vxpose.xlu1.b32.cont [4/16] (narrow) %v3469_v29, 16  ;;  %v3676_v0 = vmin.f32 %v3674_v61, %v3472_v24  ;;  %v3410_v59 = vadd.f32 %v6247_v4, %v3339_v52  ;;  %v3714_v52 = vadd.f32 1.0, %v3712_v62 }
 0x3f7   :  { %v3342_v26 = vsub.f32 %v2625_v40, %v3278_v57  ;;  %v3475_v19 = vmax.f32 %v3411_v16, 0.0  ;;  %5266 = vrcp.f32 %v3716_v38 }
 0x3f8   :  { %v3341_v36 = vsub.f32 %v2622_v34, %v3277_v60  ;;  %v4917_v23 = vpop.f32.mrb[124].mxu1  ;;  %v3474_v7 = vmax.f32 %v3410_v59, 0.0  ;;  %v5348_v60 = vmov 1966171168   ;;  %v3748_v59 = vlaneseq }
 0x3f9   :  { %v3280_v14 = vmul.f32 2.0, %v4917_v23  ;;  %v3200_v15 = vpop.f32.mrb[125].mxu1  ;;  %v3679_v44 = vmin.f32 %v3677_v9, %v3475_v19  ;;  %v3413_v10 = vadd.f32 %v6247_v4, %v3342_v26 }
 0x3fa   :  { %v3279_v56 = vmul.f32 2.0, %v3200_v15  ;;  %3562 = vxpose.xlu0.b32.cont [13/16] (narrow) %v3462_v20, 16  ;;  %3586 = vxpose.xlu1.b32.cont [5/16] (narrow) %v3470_v22, 16  ;;  %v3678_v27 = vmin.f32 %v3676_v0, %v3474_v7  ;;  %v3412_v35 = vadd.f32 %v6247_v4, %v3341_v36  ;;  %v3746_v0 = vunpack.c.l.s4 %v5348_v60 }
 0x3fb   :  { %v3344_v17 = vsub.f32 %v2631_v53, %v3280_v14  ;;  %v3477_v54 = vmax.f32 %v3413_v10, 0.0 }
 0x3fc   :  { %v3343_v29 = vsub.f32 %v2628_v42, %v3279_v56  ;;  %v4920_v31 = vpop.f32.mrb[126].mxu1  ;;  %v3476_v46 = vmax.f32 %v3412_v35, 0.0  ;;  %v3747_v26 = vunpack.c.0.s8 %v3746_v0 }
 0x3fd   :  { %v3282_v37 = vmul.f32 2.0, %v4920_v31  ;;  %v3210_v2 = vpop.f32.mrb[127].mxu1  ;;  %v3681_v5 = vmin.f32 %v3679_v44, %v3477_v54  ;;  %v3415_v39 = vadd.f32 %v6247_v4, %v3344_v17 }
 0x3fe   :  { %v3281_v33 = vmul.f32 2.0, %v3210_v2  ;;  %3563 = vxpose.xlu0.b32.cont [14/16] (narrow) %v3463_v51, 16  ;;  %3587 = vxpose.xlu1.b32.cont [6/16] (narrow) %v3471_v21, 16  ;;  %v3680_v49 = vmin.f32 %v3678_v27, %v3476_v46  ;;  %v3414_v20 = vadd.f32 %v6247_v4, %v3343_v29 }
 0x3ff   :  { %v3346_v13 = vsub.f32 %v2637_v28, %v3282_v37  ;;  %v3479_v11 = vmax.f32 %v3415_v39, 0.0 }
 0x400   :  { %v3345_v43 = vsub.f32 %v2634_v45, %v3281_v33  ;;  %v3478_v12 = vmax.f32 %v3414_v20, 0.0 }
 0x401   :  { %v3683_v58 = vmin.f32 %v3681_v5, %v3479_v11  ;;  %v3417_v1 = vadd.f32 %v6247_v4, %v3346_v13 }
 0x402   :  { %v3416_v22 = vadd.f32 %v6247_v4, %v3345_v43  ;;  %3564 = vxpose.xlu0.b32.cont [15/16] (narrow) %v3464_v6, 16  ;;  %3588 = vxpose.xlu1.b32.cont [7/16] (narrow) %v3472_v24, 16  ;;  %v3682_v47 = vmin.f32 %v3680_v49, %v3478_v12 }
 0x403   :  { %v3481_v51 = vmax.f32 %v3417_v1, 0.0 }
 0x404   :  { %v3480_v21 = vmax.f32 %v3416_v22, 0.0 }
 0x405   :  { %v3685_v41 = vmin.f32 %v3683_v58, %v3481_v51 }
 0x406   :  { %3565 = vxpose.xlu0.b32.end [16/16] (narrow) %v3465_v63, 16  ;;  %3589 = vxpose.xlu1.b32.cont [8/16] (narrow) %v3473_v25, 16  ;;  %v3684_v48 = vmin.f32 %v3682_v47, %v3480_v21  ;;  %v5267_v25 = vpop.eup %5266 }
 0x407   :  { %v3498_v50 = vpop.trf.xlu0  ;;  %v3719_v8 = vmul.f32 %v5267_v25, %v3714_v52 }
 0x408   :  { %v3686_v18 = vmin.f32 %v3684_v48, %v3685_v41  ;;  %3546 = vst [vmem:[#allocation2] sm:$0xff] %v3498_v50 }
 0x40a   :  { %3590 = vxpose.xlu1.b32.cont [9/16] (narrow) %v3474_v7, 16  ;;  %v3687_v40 = vrot.slane %v3686_v18, 4 }
 0x40b   :  { %v3499_v30 = vpop.trf.xlu0 }
 0x40c   :  { %v3688_v4 = vmin.f32 %v3686_v18, %v3687_v40  ;;  %3548 = vst [vmem:[#allocation2 + $0x10] sm:$0xff] %v3499_v30 }
 0x40e   :  { %3591 = vxpose.xlu1.b32.cont [10/16] (narrow) %v3475_v19, 16  ;;  %v3689_v32 = vrot.slane %v3688_v4, 2  ;;  %v3749_v19 = vshrl.u32 %v3748_v59, 7 }
 0x410   :  { %v3690_v6 = vmin.f32 %v3688_v4, %v3689_v32  ;;  %v3750_v42 = vsub.s32 %v3747_v26, %v3749_v19 }
 0x412   :  { %3592 = vxpose.xlu1.b32.cont [11/16] (narrow) %v3476_v46, 16  ;;  %v3691_v61 = vrot.slane %v3690_v6, 1 }
 0x414   :  { %v3692_v34 = vmin.f32 %v3690_v6, %v3691_v61 }
 0x416   :  { %3593 = vxpose.xlu1.b32.cont [12/16] (narrow) %v3477_v54, 16  ;;  %3698 = vst [vmem:[#allocation4 + $0x1] sm:$0x1] %v3692_v34 }
 0x41a   :  { %3594 = vxpose.xlu1.b32.cont [13/16] (narrow) %v3478_v12, 16 }
 0x41d   :  { %v3713_v63 = vld [vmem:[#allocation4 + $0x1] sm:$0x1] }
 0x41e   :  { %3595 = vxpose.xlu1.b32.cont [14/16] (narrow) %v3479_v11, 16  ;;  %v3717_v55 = vadd.f32 0.0001, %v3713_v63  ;;  %v3715_v24 = vadd.f32 1.0, %v3713_v63 }
 0x420   :  { %5268 = vrcp.f32 %v3717_v55 }
 0x421   :  { %5270 = vlog2.f32 %v3719_v8 }
 0x422   :  { %3596 = vxpose.xlu1.b32.cont [15/16] (narrow) %v3480_v21, 16 }
 0x426   :  { %3597 = vxpose.xlu1.b32.end [16/16] (narrow) %v3481_v51, 16 }
 0x429   :  { %v3530_v57 = vpop.trf.xlu1 }
 0x42a   :  { %v5269_v3 = vpop.eup %5268  ;;  %3547 = vst [vmem:[#allocation2 + $0x8] sm:$0xff] %v3530_v57 }
 0x42b   :  { %v3721_v9 = vmul.f32 %v5269_v3, %v3715_v24  ;;  %v5271_v53 = vpop.eup %5270 }
 0x42c   :  { %v3723_v23 = vmul.f32 0.6931472, %v5271_v53 }
 0x42d   :  { %5272 = vlog2.f32 %v3721_v9  ;;  %v3531_v16 = vpop.trf.xlu1 }
 0x42e   :  { %3549 = vst [vmem:[#allocation2 + $0x18] sm:$0xff] %v3531_v16 }
 0x437   :  { %v5273_v36 = vpop.eup %5272 }
 0x438   :  { %v3725_v7 = vmul.f32 0.6931472, %v5273_v36 }
 0x43a   :  { %v3744_v14 = vcombine.low %v3723_v23, %v3725_v7 }
 0x43c   :  { %v3751_v15 = vrot.slane %v3744_v14, %v3750_v42 }
 0x43e   :  { %v3758_v44 = vrot.slane %v3751_v15, %v3750_v42 }
 0x440   :  { %4954 = vmatmul.mubr.f32.vlgmr.msra.gmra.mrb[128].mxu0 %v3758_v44 }
 0x44a   :  { %v3566_v56 = vpop.trf.xlu0 }
 0x44b   :  { %3615 = vst [vmem:[#allocation2 + $0x20] sm:$0xff] %v3566_v56 }
 0x44e   :  { %v3567_v35 = vpop.trf.xlu0 }
 0x44f   :  { %3617 = vst [vmem:[#allocation2 + $0x30] sm:$0xff] %v3567_v35 }
 0x46a   :  { %v3598_v10 = vpop.trf.xlu1 }
 0x46b   :  { %3616 = vst [vmem:[#allocation2 + $0x28] sm:$0xff] %v3598_v10 }
 0x46e   :  { %v3599_v27 = vpop.trf.xlu1 }
 0x46f   :  { %3618 = vst [vmem:[#allocation2 + $0x38] sm:$0xff] %v3599_v27 }
 0x470   :  { %5286 = shalt.err (!%p5283_p4)
}
 0x471   :  { %s5287_s5 = scalar_lea.hbm %s6700_s11, 32 }
 0x472   :  { %p5288_p5 = scmp.ne.s32.totalorder %s6700_s11, %s5287_s5  ;;  %p5291_p6 = scmp.lt.u32.totalorder %s5287_s5, %s6700_s11 }
 0x474   :  { %p5293_p7 = pnand %p5291_p6, %p5288_p5 }
 0x476   :  { %5296 = shalt.err (!%p5293_p7)
}
 0x477   :  { %s5351_s13 = smov 16   ;;  %s5352_s14 = smov 1  }
 0x478   :  { %3880 = dma.vmem_to_hbm [thread:$0]  %s3875_s25, 32, %s6700_s11, [#allocation5], %s5351_s13, %s5351_s13, %s5352_s14  }
 0x479   :  { %s5297_s8 = scalar_lea.vmem %s3863_s3, 1024  ;;  %p5302_p9 = scmp.lt.s32.totalorder %s3863_s3, %s3863_s3 }
 0x47a   :  { %p5298_p8 = scmp.ne.s32.totalorder %s3863_s3, %s5297_s8  ;;  %p5303_p10 = scmp.lt.s32.totalorder %s5297_s8, %s5297_s8 }
 0x47c   :  { %p5304_p11 = por %p5303_p10, %p5302_p9 }
 0x47e   :  { %p5305_p12 = pnand %p5304_p11, %p5298_p8 }
 0x480   :  { %5308 = shalt.err (!%p5305_p12)
}
 0x481   :  { %s5309_s17 = scalar_lea.hbm %s6699_s10, 1024 }
 0x482   :  { %p5310_p13 = scmp.ne.s32.totalorder %s6699_s10, %s5309_s17  ;;  %p5313_p0 = scmp.lt.u32.totalorder %s5309_s17, %s6699_s10 }
 0x484   :  { %p5315_p1 = pnand %p5313_p0, %p5310_p13 }
 0x486   :  { %5318 = shalt.err (!%p5315_p1)
}
 0x487   :  { %s5353_s11 = smov 256   ;;  %s5354_s23 = smov [#allocation6]  }
 0x488   :  { %3868 = dma.vmem_to_hbm [thread:$0]  %s3863_s3, 1024, %s6699_s10, [#allocation3], %s5353_s11, %s5353_s11, %s5351_s13  }
 0x489   :  { %s3886_s24 = sshll.u32 %s5354_s23, 4  ;;  %s3887_s24 = int_to_ptr.vmem [resolvable:$true] %s3886_s24 }
 0x48a   :  { %s5319_s9 = scalar_lea.vmem %s3887_s24, 32  ;;  %p5324_p3 = scmp.lt.s32.totalorder %s3887_s24, %s3887_s24 }
 0x48b   :  { %p5320_p2 = scmp.ne.s32.totalorder %s3887_s24, %s5319_s9  ;;  %p5325_p4 = scmp.lt.s32.totalorder %s5319_s9, %s5319_s9 }
 0x48d   :  { %p5326_p5 = por %p5325_p4, %p5324_p3 }
 0x48f   :  { %p5327_p6 = pnand %p5326_p5, %p5320_p2 }
 0x513   :  { %v3826_v17 = vpop.f32.mrb[128].mxu0 }
 0x514   :  { %v3837_v54 = vrot.slane %v3826_v17, %v3750_v42  ;;  %v4955_v29 = vpop.f32.mrb[129].mxu0 }
 0x516   :  { %v3838_v31 = vcombine.high %v3837_v54, %v3837_v54  ;;  %4229 = vst.sshfl [vmem:[#allocation6] sm:$0x1 pattern:$0x73625140] %v3837_v54 }
 0x518   :  { %4230 = vst.sshfl [vmem:[#allocation6 + $0x1] sm:$0x1 pattern:$0x73625140] %v3838_v31 }
 0x519   :  { %5330 = shalt.err (!%p5327_p6)
}
 0x51a   :  { %s5331_s10 = scalar_lea.hbm %s6701_s12, 32 }
 0x51b   :  { %p5332_p7 = scmp.ne.s32.totalorder %s6701_s12, %s5331_s10  ;;  %p5335_p8 = scmp.lt.u32.totalorder %s5331_s10, %s6701_s12 }
 0x51d   :  { %p5337_p9 = pnand %p5335_p8, %p5332_p7 }
 0x51f   :  { %5340 = shalt.err (!%p5337_p9)
}
 0x520   :  { %3892 = dma.vmem_to_hbm [thread:$0]  %s3887_s24, 32, %s6701_s12, [#allocation5], %s5351_s13, %s5351_s13, %s5352_s14  }
 0x521   :  { %5341 = dma.done.wait [#allocation3], 1024  }
 0x522   :  { %5342 = vsyncadd [#allocation3], 4294966272 }
 0x523   :  { %5343 = dma.done.wait [#allocation5], 64  }
 0x524   :  { %5344 = vsyncadd [#allocation5], 4294967232 }
 0x525   :  { %3902 = vsyncpa [#allocation3], 1 }
 0x526   :  { %3903 = vsyncpa [#allocation5], 1 }

</bundles_post_ra>
